<compile_context>
chip_gen: v7x
topology: tpu7x:2x2x1
jax: 0.10.0
libtpu: 0.0.40
codegen_flags: <defaults>
</compile_context>

<pallas_src>
import functools

import jax
import jax.numpy as jnp
from jax.experimental import pallas as pl
from jax.experimental.pallas import tpu as pltpu

LANE = 128


# ----------------------------- Pallas kernels ------------------------------

def _conv_mm_kernel(w_ref, x_ref, b_ref, o_ref):
    # w_ref: (co_blk, K) bf16   x_ref: (K, M) bf16   b_ref: (co_blk, 1) f32
    acc = jnp.dot(w_ref[...], x_ref[...], preferred_element_type=jnp.float32)
    acc = jnp.maximum(acc + b_ref[...], 0.0)
    o_ref[...] = acc.astype(o_ref.dtype)


def conv_matmul_relu(w2d, cols, b_col):
    """relu(w2d @ cols + b).  w2d: (Cout, K) bf16, cols: (K, M) bf16, b: (Cout, 1) f32.

    Output (Cout, M) bf16.  M (= batch*oh*ow) sits on the lane axis; the grid
    splits Cout into two 'parallel' steps (uses both TCs on v7x, just a short
    loop on v5e/v6e).  Whole K/M extents live in VMEM -> no padding/slicing.
    """
    cout, k = w2d.shape
    k2, m = cols.shape
    assert k == k2
    nsplit = 2 if cout % 32 == 0 else 1          # keep bf16 sublane tiling (16) happy
    co_blk = cout // nsplit
    return pl.pallas_call(
        _conv_mm_kernel,
        out_shape=jax.ShapeDtypeStruct((cout, m), jnp.bfloat16),
        grid=(nsplit,),
        in_specs=[
            pl.BlockSpec((co_blk, k), lambda i: (i, 0)),   # weight half
            pl.BlockSpec((k, m), lambda i: (0, 0)),        # full im2col block
            pl.BlockSpec((co_blk, 1), lambda i: (i, 0)),   # bias half
        ],
        out_specs=pl.BlockSpec((co_blk, m), lambda i: (i, 0)),
        compiler_params=pltpu.CompilerParams(
            dimension_semantics=("parallel",)),
    )(w2d, cols, b_col)


def _fc_fused_kernel(x_ref, w1_ref, b1_ref, w2_ref, b2_ref, o_ref):
    # x:(B,3136) bf16  w1:(3136,512) bf16  b1:(1,512) f32  w2:(512,Apad) bf16  b2:(1,Apad) f32
    h = jnp.dot(x_ref[...], w1_ref[...], preferred_element_type=jnp.float32)
    h = jnp.maximum(h + b1_ref[...], 0.0).astype(jnp.bfloat16)
    out = jnp.dot(h, w2_ref[...], preferred_element_type=jnp.float32)
    o_ref[...] = out + b2_ref[...]


def fc_fused(x, w1, b1, w2, b2):
    """relu(x @ w1 + b1) @ w2 + b2 in a single pallas_call (weights VMEM-resident)."""
    b = x.shape[0]
    apad = w2.shape[1]
    return pl.pallas_call(
        _fc_fused_kernel,
        out_shape=jax.ShapeDtypeStruct((b, apad), jnp.float32),
    )(x, w1, b1, w2, b2)


# ----------------------------- JAX glue (im2col) ---------------------------
# TODO(synk): im2col patch extraction + the two one-time layout transposes stay
# as plain-JAX slicing/stack glue (no clean Pallas gather equivalent at these sizes).

def im2col_cfirst(x, kh, kw, stride):
    """x: (C, N, H, W) -> cols (C*kh*kw, N*oh*ow); feature order (C, kh, kw)."""
    c, n, h, w = x.shape
    oh = (h - kh) // stride + 1
    ow = (w - kw) // stride + 1
    slabs = []
    for i in range(kh):
        for j in range(kw):
            slabs.append(x[:, :, i:i + stride * oh:stride, j:j + stride * ow:stride])
    patches = jnp.stack(slabs, axis=1)               # (C, kh*kw, N, oh, ow)
    return patches.reshape(c * kh * kw, n * oh * ow), oh, ow


def conv2d_relu(x_cnhw, w2d, b_col, kh, kw, stride):
    """x: (Cin, N, H, W) bf16 -> (Cout, N, oh, ow) bf16 (no transposes needed)."""
    n = x_cnhw.shape[1]
    cols, oh, ow = im2col_cfirst(x_cnhw, kh, kw, stride)
    out = conv_matmul_relu(w2d, cols, b_col)         # (Cout, N*oh*ow)
    return out.reshape(out.shape[0], n, oh, ow)


# ----------------------------- parameters ----------------------------------

def init_dqn_params(key, in_channels, num_actions):
    """PyTorch-layout parameters (He-normal weights, zero biases)."""
    ks = jax.random.split(key, 5)

    def conv_w(k, shape):  # (Cout, Cin, kh, kw)
        fan_in = shape[1] * shape[2] * shape[3]
        return jax.random.normal(k, shape, jnp.float32) * (2.0 / fan_in) ** 0.5

    def lin_w(k, shape):   # (in, out)
        return jax.random.normal(k, shape, jnp.float32) * (2.0 / shape[0]) ** 0.5

    return {
        "conv1_w": conv_w(ks[0], (32, in_channels, 8, 8)),
        "conv1_b": jnp.zeros((32,), jnp.float32),
        "conv2_w": conv_w(ks[1], (64, 32, 4, 4)),
        "conv2_b": jnp.zeros((64,), jnp.float32),
        "conv3_w": conv_w(ks[2], (64, 64, 3, 3)),
        "conv3_b": jnp.zeros((64,), jnp.float32),
        "fc1_w": lin_w(ks[3], (7 * 7 * 64, 512)),
        "fc1_b": jnp.zeros((512,), jnp.float32),
        "fc2_w": lin_w(ks[4], (512, num_actions)),
        "fc2_b": jnp.zeros((num_actions,), jnp.float32),
    }


def prepare_params(p, num_actions):
    """One-time reorder/cast of PyTorch-layout params into the kernel layout."""
    apad = ((num_actions + LANE - 1) // LANE) * LANE

    def conv(wname, bname):
        w = p[wname]
        cout = w.shape[0]
        return (w.reshape(cout, -1).astype(jnp.bfloat16),       # (Cout, Cin*kh*kw)
                p[bname].reshape(cout, 1).astype(jnp.float32))  # (Cout, 1)

    c1w, c1b = conv("conv1_w", "conv1_b")
    c2w, c2b = conv("conv2_w", "conv2_b")
    c3w, c3b = conv("conv3_w", "conv3_b")
    w2 = jnp.zeros((p["fc2_w"].shape[0], apad), jnp.bfloat16)
    w2 = w2.at[:, :num_actions].set(p["fc2_w"].astype(jnp.bfloat16))
    b2 = jnp.zeros((1, apad), jnp.float32).at[0, :num_actions].set(p["fc2_b"])
    return {
        "c1w": c1w, "c1b": c1b, "c2w": c2w, "c2b": c2b, "c3w": c3w, "c3b": c3b,
        "w1": p["fc1_w"].astype(jnp.bfloat16),                  # (3136, 512)
        "b1": p["fc1_b"].reshape(1, -1).astype(jnp.float32),    # (1, 512)
        "w2": w2, "b2": b2,
    }


# ----------------------------- forward --------------------------------------

def dqn_forward(kp, x, *, num_actions):
    """x: (N, Cin, 84, 84) f32 -> (N, num_actions) f32."""
    # one-time layout change: NCHW -> channel-first (C, N, H, W), cast to bf16
    a = x.astype(jnp.bfloat16).transpose(1, 0, 2, 3)
    a = conv2d_relu(a, kp["c1w"], kp["c1b"], 8, 8, 4)   # (32, N, 20, 20)
    a = conv2d_relu(a, kp["c2w"], kp["c2b"], 4, 4, 2)   # (64, N,  9,  9)
    a = conv2d_relu(a, kp["c3w"], kp["c3b"], 3, 3, 1)   # (64, N,  7,  7)
    # torch-style flatten: (N, C*7*7) with (C, h, w) feature ordering
    n = a.shape[1]
    flat = a.transpose(1, 0, 2, 3).reshape(n, -1)        # (N, 3136) bf16
    q = fc_fused(flat, kp["w1"], kp["b1"], kp["w2"], kp["b2"])  # (N, Apad) f32
    return q[:, :num_actions]


if __name__ == "__main__":
    key = jax.random.PRNGKey(0)
    pkey, xkey = jax.random.split(key)
    in_channels, num_actions, batch = 4, 6, 2
    # fc1 expects 7*7*64 features -> spatial size is fixed at 84x84 (Atari DQN).
    params = init_dqn_params(pkey, in_channels, num_actions)
    kparams = prepare_params(params, num_actions)
    x = jax.random.normal(xkey, (batch, in_channels, 84, 84), jnp.float32)
    fwd = jax.jit(functools.partial(dqn_forward, num_actions=num_actions))
    out = jax.block_until_ready(fwd(kparams, x))
    assert out.shape == (batch, num_actions), out.shape
    assert bool(jnp.all(jnp.isfinite(out)))
    print("KERNEL_OK")
</pallas_src>

<mosaic_0001>
module attributes {stable_mosaic.version = 11 : i64} {
  func.func @_conv_mm_kernel(%arg0: i32, %arg1: memref<16x256xbf16, #tpu.memory_space<vmem>>, %arg2: memref<256x800xbf16, #tpu.memory_space<vmem>>, %arg3: memref<16x1xf32, #tpu.memory_space<vmem>>, %arg4: memref<16x800xbf16, #tpu.memory_space<vmem>>) attributes {dimension_semantics = [#tpu.dimension_semantics<parallel>], iteration_bounds = array<i64: 2>, scalar_prefetch = 0 : i64, scratch_operands = 0 : i64, tpu.core_type = #tpu.core_type<tc>, window_params = [{transform_indices = @transform_0, window_bounds = array<i64: 16, 256>}, {pipeline_mode = #tpu.pipeline_mode<synchronous>, transform_indices = @transform_1, window_bounds = array<i64: 256, 800>}, {transform_indices = @transform_2, window_bounds = array<i64: 16, 1>}, {transform_indices = @transform_3, window_bounds = array<i64: 16, 800>}]} {
    %c0 = arith.constant 0 : index
    %c0_0 = arith.constant 0 : index
    %0 = vector.load %arg1[%c0, %c0_0] : memref<16x256xbf16, #tpu.memory_space<vmem>>, vector<16x256xbf16>
    %c0_1 = arith.constant 0 : index
    %c0_2 = arith.constant 0 : index
    %1 = vector.load %arg2[%c0_1, %c0_2] : memref<256x800xbf16, #tpu.memory_space<vmem>>, vector<256x800xbf16>
    %cst = arith.constant dense<0.000000e+00> : vector<16x800xf32>
    %2 = tpu.matmul %0, %1, %cst {dimension_numbers = #tpu.dot_dimension_numbers<[1], [0], [0], [1], [0, 0, 1, 1], [], []>} : vector<16x256xbf16>, vector<256x800xbf16>, vector<16x800xf32> -> vector<16x800xf32>
    %c0_3 = arith.constant 0 : index
    %c0_4 = arith.constant 0 : index
    %3 = vector.load %arg3[%c0_3, %c0_4] : memref<16x1xf32, #tpu.memory_space<vmem>>, vector<16x1xf32>
    %4 = vector.broadcast %3 : vector<16x1xf32> to vector<16x800xf32>
    %5 = arith.addf %2, %4 : vector<16x800xf32>
    %cst_5 = arith.constant 0.000000e+00 : f32
    %6 = vector.broadcast %cst_5 : f32 to vector<16x800xf32>
    %7 = arith.maximumf %5, %6 : vector<16x800xf32>
    %8 = arith.truncf %7 : vector<16x800xf32> to vector<16x800xbf16>
    %c0_6 = arith.constant 0 : index
    %c0_7 = arith.constant 0 : index
    %9 = vector.load %arg4[%c0_6, %c0_7] : memref<16x800xbf16, #tpu.memory_space<vmem>>, vector<16x800xbf16>
    tpu.vector_store %arg4[%c0_6, %c0_7], %8 {strides = array<i32>} : memref<16x800xbf16, #tpu.memory_space<vmem>>, vector<16x800xbf16>,
    return
  }
  func.func @transform_0(%arg0: i32) -> (i32, i32) {
    %c0_i32 = arith.constant 0 : i32
    %c0_i32_0 = arith.constant 0 : i32
    return %arg0, %c0_i32 : i32, i32
  }
  func.func @transform_1(%arg0: i32) -> (i32, i32) {
    %c0_i32 = arith.constant 0 : i32
    %c0_i32_0 = arith.constant 0 : i32
    %c0_i32_1 = arith.constant 0 : i32
    return %c0_i32, %c0_i32_0 : i32, i32
  }
  func.func @transform_2(%arg0: i32) -> (i32, i32) {
    %c0_i32 = arith.constant 0 : i32
    %c0_i32_0 = arith.constant 0 : i32
    return %arg0, %c0_i32 : i32, i32
  }
  func.func @transform_3(%arg0: i32) -> (i32, i32) {
    %c0_i32 = arith.constant 0 : i32
    %c0_i32_0 = arith.constant 0 : i32
    return %arg0, %c0_i32 : i32, i32
  }
}

module attributes {stable_mosaic.version = 11 : i64} {
  func.func @_conv_mm_kernel(%arg0: i32, %arg1: memref<32x512xbf16, #tpu.memory_space<vmem>>, %arg2: memref<512x162xbf16, #tpu.memory_space<vmem>>, %arg3: memref<32x1xf32, #tpu.memory_space<vmem>>, %arg4: memref<32x162xbf16, #tpu.memory_space<vmem>>) attributes {dimension_semantics = [#tpu.dimension_semantics<parallel>], iteration_bounds = array<i64: 2>, scalar_prefetch = 0 : i64, scratch_operands = 0 : i64, tpu.core_type = #tpu.core_type<tc>, window_params = [{transform_indices = @transform_0, window_bounds = array<i64: 32, 512>}, {pipeline_mode = #tpu.pipeline_mode<synchronous>, transform_indices = @transform_1, window_bounds = array<i64: 512, 162>}, {transform_indices = @transform_2, window_bounds = array<i64: 32, 1>}, {transform_indices = @transform_3, window_bounds = array<i64: 32, 162>}]} {
    %c0 = arith.constant 0 : index
    %c0_0 = arith.constant 0 : index
    %0 = vector.load %arg1[%c0, %c0_0] : memref<32x512xbf16, #tpu.memory_space<vmem>>, vector<32x512xbf16>
    %c0_1 = arith.constant 0 : index
    %c0_2 = arith.constant 0 : index
    %1 = vector.load %arg2[%c0_1, %c0_2] : memref<512x162xbf16, #tpu.memory_space<vmem>>, vector<512x162xbf16>
    %cst = arith.constant dense<0.000000e+00> : vector<32x162xf32>
    %2 = tpu.matmul %0, %1, %cst {dimension_numbers = #tpu.dot_dimension_numbers<[1], [0], [0], [1], [0, 0, 1, 1], [], []>} : vector<32x512xbf16>, vector<512x162xbf16>, vector<32x162xf32> -> vector<32x162xf32>
    %c0_3 = arith.constant 0 : index
    %c0_4 = arith.constant 0 : index
    %3 = vector.load %arg3[%c0_3, %c0_4] : memref<32x1xf32, #tpu.memory_space<vmem>>, vector<32x1xf32>
    %4 = vector.broadcast %3 : vector<32x1xf32> to vector<32x162xf32>
    %5 = arith.addf %2, %4 : vector<32x162xf32>
    %cst_5 = arith.constant 0.000000e+00 : f32
    %6 = vector.broadcast %cst_5 : f32 to vector<32x162xf32>
    %7 = arith.maximumf %5, %6 : vector<32x162xf32>
    %8 = arith.truncf %7 : vector<32x162xf32> to vector<32x162xbf16>
    %c0_6 = arith.constant 0 : index
    %c0_7 = arith.constant 0 : index
    %9 = vector.load %arg4[%c0_6, %c0_7] : memref<32x162xbf16, #tpu.memory_space<vmem>>, vector<32x162xbf16>
    tpu.vector_store %arg4[%c0_6, %c0_7], %8 {strides = array<i32>} : memref<32x162xbf16, #tpu.memory_space<vmem>>, vector<32x162xbf16>,
    return
  }
  func.func @transform_0(%arg0: i32) -> (i32, i32) {
    %c0_i32 = arith.constant 0 : i32
    %c0_i32_0 = arith.constant 0 : i32
    return %arg0, %c0_i32 : i32, i32
  }
  func.func @transform_1(%arg0: i32) -> (i32, i32) {
    %c0_i32 = arith.constant 0 : i32
    %c0_i32_0 = arith.constant 0 : i32
    %c0_i32_1 = arith.constant 0 : i32
    return %c0_i32, %c0_i32_0 : i32, i32
  }
  func.func @transform_2(%arg0: i32) -> (i32, i32) {
    %c0_i32 = arith.constant 0 : i32
    %c0_i32_0 = arith.constant 0 : i32
    return %arg0, %c0_i32 : i32, i32
  }
  func.func @transform_3(%arg0: i32) -> (i32, i32) {
    %c0_i32 = arith.constant 0 : i32
    %c0_i32_0 = arith.constant 0 : i32
    return %arg0, %c0_i32 : i32, i32
  }
}

module attributes {stable_mosaic.version = 11 : i64} {
  func.func @_conv_mm_kernel(%arg0: i32, %arg1: memref<32x576xbf16, #tpu.memory_space<vmem>>, %arg2: memref<576x98xbf16, #tpu.memory_space<vmem>>, %arg3: memref<32x1xf32, #tpu.memory_space<vmem>>, %arg4: memref<32x98xbf16, #tpu.memory_space<vmem>>) attributes {dimension_semantics = [#tpu.dimension_semantics<parallel>], iteration_bounds = array<i64: 2>, scalar_prefetch = 0 : i64, scratch_operands = 0 : i64, tpu.core_type = #tpu.core_type<tc>, window_params = [{transform_indices = @transform_0, window_bounds = array<i64: 32, 576>}, {pipeline_mode = #tpu.pipeline_mode<synchronous>, transform_indices = @transform_1, window_bounds = array<i64: 576, 98>}, {transform_indices = @transform_2, window_bounds = array<i64: 32, 1>}, {transform_indices = @transform_3, window_bounds = array<i64: 32, 98>}]} {
    %c0 = arith.constant 0 : index
    %c0_0 = arith.constant 0 : index
    %0 = vector.load %arg1[%c0, %c0_0] : memref<32x576xbf16, #tpu.memory_space<vmem>>, vector<32x576xbf16>
    %c0_1 = arith.constant 0 : index
    %c0_2 = arith.constant 0 : index
    %1 = vector.load %arg2[%c0_1, %c0_2] : memref<576x98xbf16, #tpu.memory_space<vmem>>, vector<576x98xbf16>
    %cst = arith.constant dense<0.000000e+00> : vector<32x98xf32>
    %2 = tpu.matmul %0, %1, %cst {dimension_numbers = #tpu.dot_dimension_numbers<[1], [0], [0], [1], [0, 0, 1, 1], [], []>} : vector<32x576xbf16>, vector<576x98xbf16>, vector<32x98xf32> -> vector<32x98xf32>
    %c0_3 = arith.constant 0 : index
    %c0_4 = arith.constant 0 : index
    %3 = vector.load %arg3[%c0_3, %c0_4] : memref<32x1xf32, #tpu.memory_space<vmem>>, vector<32x1xf32>
    %4 = vector.broadcast %3 : vector<32x1xf32> to vector<32x98xf32>
    %5 = arith.addf %2, %4 : vector<32x98xf32>
    %cst_5 = arith.constant 0.000000e+00 : f32
    %6 = vector.broadcast %cst_5 : f32 to vector<32x98xf32>
    %7 = arith.maximumf %5, %6 : vector<32x98xf32>
    %8 = arith.truncf %7 : vector<32x98xf32> to vector<32x98xbf16>
    %c0_6 = arith.constant 0 : index
    %c0_7 = arith.constant 0 : index
    %9 = vector.load %arg4[%c0_6, %c0_7] : memref<32x98xbf16, #tpu.memory_space<vmem>>, vector<32x98xbf16>
    tpu.vector_store %arg4[%c0_6, %c0_7], %8 {strides = array<i32>} : memref<32x98xbf16, #tpu.memory_space<vmem>>, vector<32x98xbf16>,
    return
  }
  func.func @transform_0(%arg0: i32) -> (i32, i32) {
    %c0_i32 = arith.constant 0 : i32
    %c0_i32_0 = arith.constant 0 : i32
    return %arg0, %c0_i32 : i32, i32
  }
  func.func @transform_1(%arg0: i32) -> (i32, i32) {
    %c0_i32 = arith.constant 0 : i32
    %c0_i32_0 = arith.constant 0 : i32
    %c0_i32_1 = arith.constant 0 : i32
    return %c0_i32, %c0_i32_0 : i32, i32
  }
  func.func @transform_2(%arg0: i32) -> (i32, i32) {
    %c0_i32 = arith.constant 0 : i32
    %c0_i32_0 = arith.constant 0 : i32
    return %arg0, %c0_i32 : i32, i32
  }
  func.func @transform_3(%arg0: i32) -> (i32, i32) {
    %c0_i32 = arith.constant 0 : i32
    %c0_i32_0 = arith.constant 0 : i32
    return %arg0, %c0_i32 : i32, i32
  }
}

module attributes {stable_mosaic.version = 11 : i64} {
  func.func @_fc_fused_kernel(%arg0: memref<2x3136xbf16, #tpu.memory_space<vmem>>, %arg1: memref<3136x512xbf16, #tpu.memory_space<vmem>>, %arg2: memref<1x512xf32, #tpu.memory_space<vmem>>, %arg3: memref<512x128xbf16, #tpu.memory_space<vmem>>, %arg4: memref<1x128xf32, #tpu.memory_space<vmem>>, %arg5: memref<2x128xf32, #tpu.memory_space<vmem>>) attributes {dimension_semantics = [], scalar_prefetch = 0 : i64, scratch_operands = 0 : i64, tpu.core_type = #tpu.core_type<tc>} {
    %c0 = arith.constant 0 : index
    %c0_0 = arith.constant 0 : index
    %0 = vector.load %arg0[%c0, %c0_0] : memref<2x3136xbf16, #tpu.memory_space<vmem>>, vector<2x3136xbf16>
    %c0_1 = arith.constant 0 : index
    %c0_2 = arith.constant 0 : index
    %1 = vector.load %arg1[%c0_1, %c0_2] : memref<3136x512xbf16, #tpu.memory_space<vmem>>, vector<3136x512xbf16>
    %cst = arith.constant dense<0.000000e+00> : vector<2x512xf32>
    %2 = tpu.matmul %0, %1, %cst {dimension_numbers = #tpu.dot_dimension_numbers<[1], [0], [0], [1], [0, 0, 1, 1], [], []>} : vector<2x3136xbf16>, vector<3136x512xbf16>, vector<2x512xf32> -> vector<2x512xf32>
    %c0_3 = arith.constant 0 : index
    %c0_4 = arith.constant 0 : index
    %3 = vector.load %arg2[%c0_3, %c0_4] : memref<1x512xf32, #tpu.memory_space<vmem>>, vector<1x512xf32>
    %4 = vector.broadcast %3 : vector<1x512xf32> to vector<2x512xf32>
    %5 = arith.addf %2, %4 : vector<2x512xf32>
    %cst_5 = arith.constant 0.000000e+00 : f32
    %6 = vector.broadcast %cst_5 : f32 to vector<2x512xf32>
    %7 = arith.maximumf %5, %6 : vector<2x512xf32>
    %8 = arith.truncf %7 : vector<2x512xf32> to vector<2x512xbf16>
    %c0_6 = arith.constant 0 : index
    %c0_7 = arith.constant 0 : index
    %9 = vector.load %arg3[%c0_6, %c0_7] : memref<512x128xbf16, #tpu.memory_space<vmem>>, vector<512x128xbf16>
    %cst_8 = arith.constant dense<0.000000e+00> : vector<2x128xf32>
    %10 = tpu.matmul %8, %9, %cst_8 {dimension_numbers = #tpu.dot_dimension_numbers<[1], [0], [0], [1], [0, 0, 1, 1], [], []>} : vector<2x512xbf16>, vector<512x128xbf16>, vector<2x128xf32> -> vector<2x128xf32>
    %c0_9 = arith.constant 0 : index
    %c0_10 = arith.constant 0 : index
    %11 = vector.load %arg4[%c0_9, %c0_10] : memref<1x128xf32, #tpu.memory_space<vmem>>, vector<1x128xf32>
    %12 = vector.broadcast %11 : vector<1x128xf32> to vector<2x128xf32>
    %13 = arith.addf %10, %12 : vector<2x128xf32>
    %c0_11 = arith.constant 0 : index
    %c0_12 = arith.constant 0 : index
    %14 = vector.load %arg5[%c0_11, %c0_12] : memref<2x128xf32, #tpu.memory_space<vmem>>, vector<2x128xf32>
    tpu.vector_store %arg5[%c0_11, %c0_12], %13 {strides = array<i32>} : memref<2x128xf32, #tpu.memory_space<vmem>>, vector<2x128xf32>,
    return
  }
}

</mosaic_0001>

<bundles_post_ra>
// kernel: dqn_forward.4
= control target key start
LH: loop header
LB: loop body
LE: loop exit
PB: predicated region body
PF: predicated region fallthrough
CT: control target
= control target key end

     0   :  { %s1607_s12 = smov 0   ;;  %s1999_s0 = inlined_call_operand.vmem [shape: bf16[32,256], index: 0, kind: input, shape index: {}]   ;;  %s2000_s1 = inlined_call_operand.vmem [shape: bf16[256,800], index: 1, kind: input, shape index: {}]   ;;  %s2001_s2 = inlined_call_operand.vmem [shape: f32[32,1], index: 2, kind: input, shape index: {}]   ;;  %s2002_s3 = inlined_call_operand.vmem [shape: bf16[32,800], index: 3, kind: output, shape index: {}]  }
   0x1 LB: > { %s1237_s13 = sadd.s32 4294967295, %s1584_s12   ;;  %p1241_p0 = scmp.ge.s32.totalorder %s1584_s12, 1  ;;  %s1584_s12 = sphi %s1607_s12, %s13_s12  }
   0x2   : > { %p150_p1 = scmp.lt.s32.totalorder %s1584_s12, 3 }
   0x4   : > { %p151_p2 = pnand %p1241_p0, %p150_p1 }
   0x5   : > { %v1415_v0 = vld [vmem:[%s2000_s1 + $0x4] ss:$28 sps:$4 sm:$0xff] (!%p151_p2)   ;;  %v1418_v2 = vld [vmem:[%s2000_s1 + $0x3c] ss:$28 sps:$4 sm:$0xff] (!%p151_p2)   ;;  %v1586_v4 = vmov (!%p151_p2), 0   ;;  %s1242_s25 = sshll.u32 (!%p151_p2), %s1237_s13, 1 }
   0x6   : > { %154 = sbr.rel (%p151_p2) target bundleno = 356 (0x164), region = 32  ;;  %v1417_v1 = vld [vmem:[%s2000_s1] ss:$28 sps:$4 sm:$0xff] (!%p151_p2)   ;;  %930 = vmatprep.subr.bf16.mxu0 (!%p151_p2), %v1415_v0  ;;  %v1420_v3 = vld [vmem:[%s2000_s1 + $0x38] ss:$28 sps:$4 sm:$0xff] (!%p151_p2)   ;;  %1414 = vset.pattern.permute.xlu0 (!%p151_p2), %v1586_v4  ;;  %p182_p3 = scmp.lt.s32.totalorder (!%p151_p2), %s1242_s25, 3 }
   0x7   : > { %931 = vmatpush1.bf16.msra.mxu0 (!%p151_p2), %v1417_v1  ;;  %v1421_v5 = vld [vmem:[%s2000_s1 + $0x74] ss:$28 sps:$4 sm:$0xff] (!%p151_p2)   ;;  %v1424_v7 = vld [vmem:[%s2000_s1 + $0xac] ss:$28 sps:$4 sm:$0xff] (!%p151_p2)   ;;  %v1427_v11 = vld [vmem:[%s2000_s1 + $0xe4] ss:$28 sps:$4 sm:$0xff] (!%p151_p2)  }
   0x8   : > { %932 = vmatprep.subr.bf16.mxu0 (!%p151_p2), %v1418_v2  ;;  %v1423_v6 = vld [vmem:[%s2000_s1 + $0x70] ss:$28 sps:$4 sm:$0xff] (!%p151_p2)   ;;  %v1438_v9 = vld [vmem:[%s2000_s1 + $0x8] ss:$28 sps:$4 sm:$0xff] (!%p151_p2)   ;;  %v1444_v13 = vld [vmem:[%s2000_s1 + $0x40] ss:$28 sps:$4 sm:$0xff] (!%p151_p2)  }
   0x9   : > { %v1436_v8 = vld [vmem:[%s2000_s1 + $0xc] ss:$28 sps:$4 sm:$0xff] (!%p151_p2)   ;;  %v1442_v12 = vld [vmem:[%s2000_s1 + $0x44] ss:$28 sps:$4 sm:$0xff] (!%p151_p2)   ;;  %v1448_v15 = vld [vmem:[%s2000_s1 + $0x7c] ss:$28 sps:$4 sm:$0xff] (!%p151_p2)  }
   0xa   : > { %v1426_v10 = vld [vmem:[%s2000_s1 + $0xa8] ss:$28 sps:$4 sm:$0xff] (!%p151_p2)   ;;  %973 = vmatprep.subr.bf16.mxu1 (!%p151_p2), %v1436_v8  ;;  %v1429_v14 = vld [vmem:[%s2000_s1 + $0xe0] ss:$28 sps:$4 sm:$0xff] (!%p151_p2)   ;;  %v1450_v17 = vld [vmem:[%s2000_s1 + $0x78] ss:$28 sps:$4 sm:$0xff] (!%p151_p2)  }
   0xb   : > { %933 = vmatpush1.bf16.msra.mxu0 (!%p151_p2), %v1420_v3  ;;  %974 = vmatpush1.bf16.msra.mxu1 (!%p151_p2), %v1438_v9  ;;  %v1430_v16 = vld [vmem:[%s2000_s1 + $0x11c] ss:$28 sps:$4 sm:$0xff] (!%p151_p2)   ;;  %v1454_v18 = vld [vmem:[%s2000_s1 + $0xb4] ss:$28 sps:$4 sm:$0xff] (!%p151_p2)   ;;  %v1460_v22 = vld [vmem:[%s2000_s1 + $0xec] ss:$28 sps:$4 sm:$0xff] (!%p151_p2)  }
   0xc   : > { %934 = vmatprep.subr.bf16.mxu0 (!%p151_p2), %v1421_v5  ;;  %975 = vmatprep.subr.bf16.mxu1 (!%p151_p2), %v1442_v12  ;;  %v1432_v19 = vld [vmem:[%s2000_s1 + $0x118] ss:$28 sps:$4 sm:$0xff] (!%p151_p2)   ;;  %v1456_v21 = vld [vmem:[%s2000_s1 + $0xb0] ss:$28 sps:$4 sm:$0xff] (!%p151_p2)   ;;  %v1462_v25 = vld [vmem:[%s2000_s1 + $0xe8] ss:$28 sps:$4 sm:$0xff] (!%p151_p2)  }
   0xd   : > { %v1433_v20 = vld [vmem:[%s2000_s1 + $0x154] ss:$28 sps:$4 sm:$0xff]   ;;  %v1439_v24 = vld [vmem:[%s2000_s1 + $0x18c] ss:$28 sps:$4 sm:$0xff]   ;;  %s2004_s25 = smov (!%p182_p3, %s1242_s25), 3  ;;  %vm1161_vm0 = vcmask 257024  }
   0xe   : > { %v1435_v23 = vld [vmem:[%s2000_s1 + $0x150] ss:$28 sps:$4 sm:$0xff]   ;;  %v1466_v26 = vld [vmem:[%s2000_s1 + $0x124] ss:$28 sps:$4 sm:$0xff]   ;;  %s1373_s22 = sshll.u32 %s2004_s25, 3  ;;  %s1404_s26 = smul.u32 28, %s2004_s25 }
   0xf   : > { %935 = vmatpush1.bf16.msra.mxu0 %v1423_v6  ;;  %976 = vmatpush1.bf16.msra.mxu1 %v1444_v13  ;;  %v1441_v27 = vld [vmem:[%s2000_s1 + $0x188] ss:$28 sps:$4 sm:$0xff]   ;;  %v1468_v29 = vld [vmem:[%s2000_s1 + $0x120] ss:$28 sps:$4 sm:$0xff]   ;;  %s1721_s5 = scalar_lea.vmem %s1999_s0, %s1373_s22  ;;  %v1474_v33 = vld [vmem:[%s2000_s1 + $0x158] ss:$28 sps:$4 sm:$0xff]   ;;  %s192_s6 = scalar_lea.vmem %s2001_s2, %s1373_s22 }
  0x10   : > { %936 = vmatprep.subr.bf16.mxu0 %v1424_v7  ;;  %977 = vmatprep.subr.bf16.mxu1 %v1448_v15  ;;  %v1445_v28 = vld [vmem:[%s2000_s1 + $0x1c4] ss:$28 sps:$4 sm:$0xff]   ;;  %v1472_v30 = vld [vmem:[%s2000_s1 + $0x15c] ss:$28 sps:$4 sm:$0xff]   ;;  %v1478_v34 = vld [vmem:[%s2000_s1 + $0x194] ss:$28 sps:$4 sm:$0xff]   ;;  %s1986_s29 = scalar_lea.vmem %s2002_s3, %s1404_s26 }
  0x11   : > { %v1447_v31 = vld [vmem:[%s2000_s1 + $0x1c0] ss:$28 sps:$4 sm:$0xff]   ;;  %v1453_v35 = vld [vmem:[%s2000_s1 + $0x1f8] ss:$28 sps:$4 sm:$0xff]   ;;  %v1733_v36 = vld [vmem:[%s1721_s5 + $0x4] ss:$8 sps:$4 sm:$0xff]  }
  0x12   : > { %v1451_v32 = vld [vmem:[%s2000_s1 + $0x1fc] ss:$28 sps:$4 sm:$0xff]   ;;  %v1457_v37 = vld [vmem:[%s2000_s1 + $0x234] ss:$28 sps:$4 sm:$0xff]   ;;  %962 = vmatprep.mubr.bf16.mxu0 %v1733_v36  ;;  %v1484_v39 = vld [vmem:[%s2000_s1 + $0x1cc] ss:$28 sps:$4 sm:$0xff]   ;;  %1005 = vmatprep.mubr.bf16.mxu1 %v1733_v36 }
  0x13   : > { %937 = vmatpush1.bf16.msra.mxu0 %v1426_v10  ;;  %978 = vmatpush1.bf16.msra.mxu1 %v1450_v17  ;;  %v1480_v38 = vld [vmem:[%s2000_s1 + $0x190] ss:$28 sps:$4 sm:$0xff]   ;;  %v1486_v42 = vld [vmem:[%s2000_s1 + $0x1c8] ss:$28 sps:$4 sm:$0xff]   ;;  %v1494_v46 = vld [vmem:[%s2000_s1 + $0x200] ss:$28 sps:$4 sm:$0xff]  }
  0x14   : > { %938 = vmatprep.subr.bf16.mxu0 %v1427_v11  ;;  %979 = vmatprep.subr.bf16.mxu1 %v1454_v18  ;;  %v1459_v40 = vld [vmem:[%s2000_s1 + $0x230] ss:$28 sps:$4 sm:$0xff]   ;;  %v1490_v43 = vld [vmem:[%s2000_s1 + $0x204] ss:$28 sps:$4 sm:$0xff]   ;;  %v1499_v47 = vld [vmem:[%s2000_s1 + $0x23c] ss:$28 sps:$4 sm:$0xff]  }
  0x15   : > { %v1463_v41 = vld [vmem:[%s2000_s1 + $0x26c] ss:$28 sps:$4 sm:$0xff]   ;;  %v1469_v45 = vld [vmem:[%s2000_s1 + $0x2a4] ss:$28 sps:$4 sm:$0xff]   ;;  %v1475_v49 = vld [vmem:[%s2000_s1 + $0x2dc] ss:$28 sps:$4 sm:$0xff]  }
  0x16   : > { %v1465_v44 = vld [vmem:[%s2000_s1 + $0x268] ss:$28 sps:$4 sm:$0xff]   ;;  %v1471_v48 = vld [vmem:[%s2000_s1 + $0x2a0] ss:$28 sps:$4 sm:$0xff]   ;;  %v1501_v50 = vld [vmem:[%s2000_s1 + $0x238] ss:$28 sps:$4 sm:$0xff]  }
  0x17   : > { %939 = vmatpush1.bf16.msra.mxu0 %v1429_v14  ;;  %980 = vmatpush1.bf16.msra.mxu1 %v1456_v21  ;;  %v1505_v51 = vld [vmem:[%s2000_s1 + $0x274] ss:$28 sps:$4 sm:$0xff]   ;;  %v1511_v55 = vld [vmem:[%s2000_s1 + $0x2ac] ss:$28 sps:$4 sm:$0xff]   ;;  %v1517_v59 = vld [vmem:[%s2000_s1 + $0x2e4] ss:$28 sps:$4 sm:$0xff]  }
  0x18   : > { %940 = vmatprep.subr.bf16.mxu0 %v1430_v16  ;;  %981 = vmatprep.subr.bf16.mxu1 %v1460_v22  ;;  %v1477_v52 = vld [vmem:[%s2000_s1 + $0x2d8] ss:$28 sps:$4 sm:$0xff]   ;;  %v1507_v54 = vld [vmem:[%s2000_s1 + $0x270] ss:$28 sps:$4 sm:$0xff]   ;;  %v1513_v58 = vld [vmem:[%s2000_s1 + $0x2a8] ss:$28 sps:$4 sm:$0xff]  }
  0x19   : > { %v1481_v53 = vld [vmem:[%s2000_s1 + $0x314] ss:$28 sps:$4 sm:$0xff]   ;;  %v1487_v57 = vld [vmem:[%s2000_s1 + $0x34c] ss:$28 sps:$4 sm:$0xff]   ;;  %v1519_v63 = vld [vmem:[%s2000_s1 + $0x2e0] ss:$28 sps:$4 sm:$0xff]  }
  0x1a   : > { %v1483_v56 = vld [vmem:[%s2000_s1 + $0x310] ss:$28 sps:$4 sm:$0xff]   ;;  %v1489_v60 = vld [vmem:[%s2000_s1 + $0x348] ss:$28 sps:$4 sm:$0xff]   ;;  %v1523_v0 = vld [vmem:[%s2000_s1 + $0x31c] ss:$28 sps:$4 sm:$0xff]  }
  0x1b   : > { %941 = vmatpush1.bf16.msra.mxu0 %v1432_v19  ;;  %982 = vmatpush1.bf16.msra.mxu1 %v1462_v25  ;;  %v1810_v61 = vld [vmem:[%s1721_s5] ss:$8 sps:$4 sm:$0xff]   ;;  %v1498_v62 = vld [vmem:[%s2000_s1 + $0x14] ss:$28 sps:$4 sm:$0xff]   ;;  %v1516_v10 = vld [vmem:[%s2000_s1 + $0xbc] ss:$28 sps:$4 sm:$0xff]  }
  0x1c   : > { %942 = vmatprep.subr.bf16.mxu0 %v1433_v20  ;;  %983 = vmatprep.subr.bf16.mxu1 %v1466_v26  ;;  %v1496_v1 = vld [vmem:[%s2000_s1 + $0x10] ss:$28 sps:$4 sm:$0xff]   ;;  %v1525_v3 = vld [vmem:[%s2000_s1 + $0x318] ss:$28 sps:$4 sm:$0xff]   ;;  %v1502_v5 = vld [vmem:[%s2000_s1 + $0x48] ss:$28 sps:$4 sm:$0xff]  }
  0x1d   : > { %v1504_v2 = vld [vmem:[%s2000_s1 + $0x4c] ss:$28 sps:$4 sm:$0xff]   ;;  %v1529_v4 = vld [vmem:[%s2000_s1 + $0x354] ss:$28 sps:$4 sm:$0xff]   ;;  %v1510_v6 = vld [vmem:[%s2000_s1 + $0x84] ss:$28 sps:$4 sm:$0xff]  }
  0x1e   : > { %v1531_v7 = vld [vmem:[%s2000_s1 + $0x350] ss:$28 sps:$4 sm:$0xff]   ;;  %v1535_v8 = vld [vmem:[%s2000_s1 + $0x1d8] ss:$28 sps:$4 sm:$0xff]   ;;  %v1508_v9 = vld [vmem:[%s2000_s1 + $0x80] ss:$28 sps:$4 sm:$0xff]  }
  0x1f   : > { %943 = vmatpush1.bf16.msra.mxu0 %v1435_v23  ;;  %984 = vmatpush1.bf16.msra.mxu1 %v1468_v29  ;;  %v1536_v11 = vld [vmem:[%s2000_s1 + $0x18] ss:$28 sps:$4 sm:$0xff]   ;;  %v1540_v12 = vld [vmem:[%s2000_s1 + $0x210] ss:$28 sps:$4 sm:$0xff]   ;;  %v1545_v16 = vld [vmem:[%s2000_s1 + $0x248] ss:$28 sps:$4 sm:$0xff]  }
  0x20   : > { %944 = vmatprep.subr.bf16.mxu0 %v1439_v24  ;;  %985 = vmatprep.subr.bf16.mxu1 %v1472_v30  ;;  %v1514_v13 = vld [vmem:[%s2000_s1 + $0xb8] ss:$28 sps:$4 sm:$0xff]   ;;  %v1541_v15 = vld [vmem:[%s2000_s1 + $0x50] ss:$28 sps:$4 sm:$0xff]   ;;  %v1546_v19 = vld [vmem:[%s2000_s1 + $0x88] ss:$28 sps:$4 sm:$0xff]  }
  0x21   : > { %v1522_v14 = vld [vmem:[%s2000_s1 + $0xf4] ss:$28 sps:$4 sm:$0xff]   ;;  %v1528_v18 = vld [vmem:[%s2000_s1 + $0x12c] ss:$28 sps:$4 sm:$0xff]   ;;  %v332_v20 = vld [vmem:[%s192_s6] sm:$0xff] }
  0x22   : > { %v1520_v17 = vld [vmem:[%s2000_s1 + $0xf0] ss:$28 sps:$4 sm:$0xff]   ;;  %v1550_v21 = vld [vmem:[%s2000_s1 + $0x280] ss:$28 sps:$4 sm:$0xff]   ;;  %336 = vperm.xlu0 %1414, %v332_v20   ;;  %v1526_v22 = vld [vmem:[%s2000_s1 + $0x128] ss:$28 sps:$4 sm:$0xff]  }
  0x23   : > { %945 = vmatpush1.bf16.msra.mxu0 %v1441_v27  ;;  %986 = vmatpush1.bf16.msra.mxu1 %v1474_v33  ;;  %v333_v23 = vld [vmem:[%s192_s6 + $0x8] sm:$0xff]  ;;  %v1534_v24 = vld [vmem:[%s2000_s1 + $0x164] ss:$28 sps:$4 sm:$0xff]   ;;  %v1555_v26 = vld [vmem:[%s2000_s1 + $0x2b8] ss:$28 sps:$4 sm:$0xff]  }
  0x24   : > { %946 = vmatprep.subr.bf16.mxu0 %v1445_v28  ;;  %987 = vmatprep.subr.bf16.mxu1 %v1478_v34  ;;  %v1551_v25 = vld [vmem:[%s2000_s1 + $0xc0] ss:$28 sps:$4 sm:$0xff]   ;;  %v1556_v29 = vld [vmem:[%s2000_s1 + $0xf8] ss:$28 sps:$4 sm:$0xff]   ;;  %v1560_v30 = vld [vmem:[%s2000_s1 + $0x2f0] ss:$28 sps:$4 sm:$0xff]  }
  0x25   : > { %v1532_v27 = vld [vmem:[%s2000_s1 + $0x160] ss:$28 sps:$4 sm:$0xff]   ;;  %v1561_v33 = vld [vmem:[%s2000_s1 + $0x130] ss:$28 sps:$4 sm:$0xff]   ;;  %v1565_v34 = vld [vmem:[%s2000_s1 + $0x328] ss:$28 sps:$4 sm:$0xff]  }
  0x26   : > { %341 = vperm.xlu0 %1414, %v333_v23   ;;  %v1539_v28 = vld [vmem:[%s2000_s1 + $0x19c] ss:$28 sps:$4 sm:$0xff]  }
  0x27   : > { %947 = vmatpush1.bf16.msra.mxu0 %v1447_v31  ;;  %988 = vmatpush1.bf16.msra.mxu1 %v1480_v38  ;;  %v1537_v31 = vld [vmem:[%s2000_s1 + $0x198] ss:$28 sps:$4 sm:$0xff]   ;;  %v1570_v38 = vld [vmem:[%s2000_s1 + $0x360] ss:$28 sps:$4 sm:$0xff]  }
  0x28   : > { %948 = vmatprep.subr.bf16.mxu0 %v1451_v32  ;;  %989 = vmatprep.subr.bf16.mxu1 %v1484_v39  ;;  %v1544_v32 = vld [vmem:[%s2000_s1 + $0x1d4] ss:$28 sps:$4 sm:$0xff]   ;;  %v1547_v39 = vld [vmem:[%s2000_s1 + $0x208] ss:$28 sps:$4 sm:$0xff]  }
  0x2b   : > { %949 = vmatpush1.bf16.msra.mxu0 %v1453_v35  ;;  %990 = vmatpush1.bf16.msra.mxu1 %v1486_v42  ;;  %v1542_v35 = vld [vmem:[%s2000_s1 + $0x1d0] ss:$28 sps:$4 sm:$0xff]   ;;  %v1552_v42 = vld [vmem:[%s2000_s1 + $0x240] ss:$28 sps:$4 sm:$0xff]  }
  0x2c   : > { %950 = vmatprep.subr.bf16.mxu0 %v1457_v37  ;;  %991 = vmatprep.subr.bf16.mxu1 %v1490_v43  ;;  %v1566_v37 = vld [vmem:[%s2000_s1 + $0x168] ss:$28 sps:$4 sm:$0xff]   ;;  %v1559_v43 = vld [vmem:[%s2000_s1 + $0x27c] ss:$28 sps:$4 sm:$0xff]  }
  0x2f   : > { %951 = vmatpush1.bf16.msra.mxu0 %v1459_v40  ;;  %992 = vmatpush1.bf16.msra.mxu1 %v1494_v46  ;;  %v1554_v40 = vld [vmem:[%s2000_s1 + $0x244] ss:$28 sps:$4 sm:$0xff]   ;;  %v1562_v46 = vld [vmem:[%s2000_s1 + $0x2b0] ss:$28 sps:$4 sm:$0xff]  }
  0x30   : > { %952 = vmatprep.subr.bf16.mxu0 %v1463_v41  ;;  %993 = vmatprep.subr.bf16.mxu1 %v1499_v47  ;;  %v1571_v41 = vld [vmem:[%s2000_s1 + $0x1a0] ss:$28 sps:$4 sm:$0xff]   ;;  %v1569_v47 = vld [vmem:[%s2000_s1 + $0x2ec] ss:$28 sps:$4 sm:$0xff]  }
  0x33   : > { %953 = vmatpush1.bf16.msra.mxu0 %v1465_v44  ;;  %994 = vmatpush1.bf16.msra.mxu1 %v1501_v50  ;;  %v1557_v44 = vld [vmem:[%s2000_s1 + $0x278] ss:$28 sps:$4 sm:$0xff]   ;;  %v1572_v50 = vld [vmem:[%s2000_s1 + $0x320] ss:$28 sps:$4 sm:$0xff]  }
  0x34   : > { %954 = vmatprep.subr.bf16.mxu0 %v1469_v45  ;;  %995 = vmatprep.subr.bf16.mxu1 %v1505_v51  ;;  %v1564_v45 = vld [vmem:[%s2000_s1 + $0x2b4] ss:$28 sps:$4 sm:$0xff]   ;;  %v1577_v51 = vld [vmem:[%s2000_s1 + $0x35c] ss:$28 sps:$4 sm:$0xff]  }
  0x37   : > { %955 = vmatpush1.bf16.msra.mxu0 %v1471_v48  ;;  %996 = vmatpush1.bf16.msra.mxu1 %v1507_v54  ;;  %v1567_v48 = vld [vmem:[%s2000_s1 + $0x2e8] ss:$28 sps:$4 sm:$0xff]  }
  0x38   : > { %956 = vmatprep.subr.bf16.mxu0 %v1475_v49  ;;  %997 = vmatprep.subr.bf16.mxu1 %v1511_v55  ;;  %v1574_v49 = vld [vmem:[%s2000_s1 + $0x324] ss:$28 sps:$4 sm:$0xff]  }
  0x3b   : > { %957 = vmatpush1.bf16.msra.mxu0 %v1477_v52  ;;  %998 = vmatpush1.bf16.msra.mxu1 %v1513_v58  ;;  %v1575_v52 = vld [vmem:[%s2000_s1 + $0x358] ss:$28 sps:$4 sm:$0xff]  }
  0x3c   : > { %958 = vmatprep.subr.bf16.mxu0 %v1481_v53  ;;  %999 = vmatprep.subr.bf16.mxu1 %v1517_v59 }
  0x3f   : > { %959 = vmatpush1.bf16.msra.mxu0 %v1483_v56  ;;  %1000 = vmatpush1.bf16.msra.mxu1 %v1519_v63 }
  0x40   : > { %960 = vmatprep.subr.bf16.mxu0 %v1487_v57  ;;  %1001 = vmatprep.subr.bf16.mxu1 %v1523_v0 }
  0x43   : > { %961 = vmatpush1.bf16.msra.mxu0 %v1489_v60  ;;  %1002 = vmatpush1.bf16.msra.mxu1 %v1525_v3 }
  0x44   : > { %1016 = vmatprep.subr.bf16.mxu0 %v1498_v62  ;;  %1003 = vmatprep.subr.bf16.mxu1 %v1529_v4 }
  0x46   : > { %963 = vmatmul.mubr.bf16.vlgmr.msra.gmra.mrb[0].mxu0 %v1810_v61 }
  0x47   : > { %1017 = vmatpush1.bf16.msra.mxu0 %v1496_v1  ;;  %1048 = vmatprep.mubr.bf16.mxu0 %v1733_v36 }
  0x48   : > { %1018 = vmatprep.subr.bf16.mxu0 %v1504_v2  ;;  %1004 = vmatpush1.bf16.msra.mxu1 %v1531_v7 }
  0x49   : > { %1382 = vmatprep.subr.bf16.mxu1 %v1535_v8 }
  0x4b   : > { %1019 = vmatpush1.bf16.msra.mxu0 %v1502_v5  ;;  %1006 = vmatmul.mubr.bf16.vlgmr.msra.gmra.mrb[0].mxu1 %v1810_v61 }
  0x4c   : > { %1020 = vmatprep.subr.bf16.mxu0 %v1510_v6  ;;  %1383 = vmatpush3.bf16.msra.mxu1 %v1536_v11 }
  0x4d   : > { %1091 = vmatprep.mubr.bf16.mxu1 %v1733_v36  ;;  %1384 = vmatprep.subr.bf16.mxu1 %v1540_v12  ;;  %v1549_v36 = vld [vmem:[%s2000_s1 + $0x20c] ss:$28 sps:$4 sm:$0xff]  }
  0x4f   : > { %1021 = vmatpush1.bf16.msra.mxu0 %v1508_v9 }
  0x50   : > { %1022 = vmatprep.subr.bf16.mxu0 %v1516_v10  ;;  %1385 = vmatpush3.bf16.msra.mxu1 %v1541_v15 }
  0x51   : > { %1386 = vmatprep.subr.bf16.mxu1 %v1545_v16 }
  0x53   : > { %1023 = vmatpush1.bf16.msra.mxu0 %v1514_v13 }
  0x54   : > { %1024 = vmatprep.subr.bf16.mxu0 %v1522_v14  ;;  %1387 = vmatpush3.bf16.msra.mxu1 %v1546_v19 }
  0x55   : > { %1388 = vmatprep.subr.bf16.mxu1 %v1550_v21 }
  0x57   : > { %1025 = vmatpush1.bf16.msra.mxu0 %v1520_v17 }
  0x58   : > { %1026 = vmatprep.subr.bf16.mxu0 %v1528_v18  ;;  %1389 = vmatpush3.bf16.msra.mxu1 %v1551_v25 }
  0x59   : > { %1390 = vmatprep.subr.bf16.mxu1 %v1555_v26 }
  0x5b   : > { %1027 = vmatpush1.bf16.msra.mxu0 %v1526_v22 }
  0x5c   : > { %1028 = vmatprep.subr.bf16.mxu0 %v1534_v24  ;;  %1391 = vmatpush3.bf16.msra.mxu1 %v1556_v29 }
  0x5d   : > { %1392 = vmatprep.subr.bf16.mxu1 %v1560_v30 }
  0x5f   : > { %1029 = vmatpush1.bf16.msra.mxu0 %v1532_v27 }
  0x60   : > { %1030 = vmatprep.subr.bf16.mxu0 %v1539_v28  ;;  %1393 = vmatpush3.bf16.msra.mxu1 %v1561_v33 }
  0x61   : > { %1394 = vmatprep.subr.bf16.mxu1 %v1565_v34 }
  0x63   : > { %1031 = vmatpush1.bf16.msra.mxu0 %v1537_v31 }
  0x64   : > { %1032 = vmatprep.subr.bf16.mxu0 %v1544_v32  ;;  %1395 = vmatpush3.bf16.msra.mxu1 %v1566_v37 }
  0x65   : > { %1396 = vmatprep.subr.bf16.mxu1 %v1570_v38 }
  0x67   : > { %1033 = vmatpush1.bf16.msra.mxu0 %v1542_v35 }
  0x68   : > { %1034 = vmatprep.subr.bf16.mxu0 %v1549_v36  ;;  %1397 = vmatpush3.bf16.msra.mxu1 %v1571_v41 }
  0x6b   : > { %1035 = vmatpush1.bf16.msra.mxu0 %v1547_v39  ;;  %1092 = vmatmul.mubr.bf16.vlgmr.msra.gmra.mrb[4].mxu1 %v1810_v61 }
  0x6c   : > { %1036 = vmatprep.subr.bf16.mxu0 %v1554_v40 }
  0x6f   : > { %1037 = vmatpush1.bf16.msra.mxu0 %v1552_v42 }
  0x70   : > { %1038 = vmatprep.subr.bf16.mxu0 %v1559_v43 }
  0x73   : > { %1039 = vmatpush1.bf16.msra.mxu0 %v1557_v44 }
  0x74   : > { %1040 = vmatprep.subr.bf16.mxu0 %v1564_v45 }
  0x77   : > { %1041 = vmatpush1.bf16.msra.mxu0 %v1562_v46 }
  0x78   : > { %1042 = vmatprep.subr.bf16.mxu0 %v1569_v47 }
  0x7b   : > { %1043 = vmatpush1.bf16.msra.mxu0 %v1567_v48 }
  0x7c   : > { %1044 = vmatprep.subr.bf16.mxu0 %v1574_v49 }
  0x7f   : > { %1045 = vmatpush1.bf16.msra.mxu0 %v1572_v50 }
  0x80   : > { %1046 = vmatprep.subr.bf16.mxu0 %v1577_v51 }
  0x83   : > { %1047 = vmatpush1.bf16.msra.mxu0 %v1575_v52 }
  0x86   : > { %1049 = vmatmul.mubr.bf16.vlgmr.msra.gmra.mrb[4].mxu0 %v1810_v61 }
  0xa1   : > { %v337_v53 = vpop.permute.xlu0 %336 }
  0xa5   : > { %v342_v55 = vpop.permute.xlu0 %341 }
 0x119   : > { %v964_v54 = vpop.f32.mrb[0].mxu0 }
 0x11a   : > { %v965_v56 = vadd.f32 %v964_v54, %v337_v53  ;;  %v966_v57 = vpop.f32.mrb[1].mxu0 }
 0x11b   : > { %v967_v58 = vadd.f32 %v966_v57, %v337_v53  ;;  %v968_v59 = vpop.f32.mrb[2].mxu0 }
 0x11c   : > { %v1100_v60 = vmax.f32 %v965_v56, 0.0  ;;  %v969_v62 = vadd.f32 %v968_v59, %v342_v55  ;;  %v970_v63 = vpop.f32.mrb[3].mxu0 }
 0x11d   : > { %v1101_v0 = vmax.f32 %v967_v58, 0.0  ;;  %v971_v1 = vadd.f32 %v970_v63, %v342_v55 }
 0x11e   : > { %v1107_v61 = vmax.f32 %v969_v62, 0.0  ;;  %v1007_v5 = vpop.f32.mrb[0].mxu1 }
 0x11f   : > { %v1374_v2 = vpack.c.bf16 %v1101_v0, %v1100_v60  ;;  %v1108_v3 = vmax.f32 %v971_v1, 0.0  ;;  %v1008_v6 = vadd.f32 %v1007_v5, %v337_v53  ;;  %v1009_v7 = vpop.f32.mrb[1].mxu1 }
 0x120   : > { %v1010_v8 = vadd.f32 %v1009_v7, %v337_v53  ;;  %v1011_v9 = vpop.f32.mrb[2].mxu1 }
 0x121   : > { %1158 = vst [vmem:[%s1986_s29] sm:$0xff] %v1374_v2  ;;  %v1378_v4 = vpack.c.bf16 %v1108_v3, %v1107_v61  ;;  %v1102_v10 = vmax.f32 %v1008_v6, 0.0  ;;  %v1012_v11 = vadd.f32 %v1011_v9, %v342_v55  ;;  %v1013_v12 = vpop.f32.mrb[3].mxu1 }
 0x122   : > { %v1103_v13 = vmax.f32 %v1010_v8, 0.0  ;;  %v1014_v14 = vadd.f32 %v1013_v12, %v342_v55 }
 0x123   : > { %1163 = vst [vmem:[%s1986_s29 + $0x1c] sm:$0xff] %v1378_v4  ;;  %v1109_v15 = vmax.f32 %v1012_v11, 0.0 }
 0x124   : > { %v1375_v16 = vpack.c.bf16 %v1103_v13, %v1102_v10  ;;  %v1110_v17 = vmax.f32 %v1014_v14, 0.0 }
 0x126   : > { %1159 = vst [vmem:[%s1986_s29 + $0x8] sm:$0xff] %v1375_v16  ;;  %v1379_v18 = vpack.c.bf16 %v1110_v17, %v1109_v15 }
 0x128   : > { %1164 = vst [vmem:[%s1986_s29 + $0x24] sm:$0xff] %v1379_v18 }
 0x13e   : > { %v1398_v19 = vpop.f32.mrb[4].mxu1 }
 0x13f   : > { %v1399_v20 = vpop.f32.mrb[5].mxu1 }
 0x140   : > { %v1400_v21 = vadd.f32 %v1399_v20, %v1398_v19  ;;  %v1401_v22 = vpop.f32.mrb[6].mxu1 }
 0x141   : > { %v1402_v23 = vpop.f32.mrb[7].mxu1 }
 0x142   : > { %v1094_v24 = vadd.f32 %v1400_v21, %v337_v53  ;;  %v1403_v25 = vadd.f32 %v1402_v23, %v1401_v22 }
 0x144   : > { %v1106_v26 = vmax.f32 %v1094_v24, 0.0  ;;  %v1097_v27 = vadd.f32 %v1403_v25, %v342_v55 }
 0x146   : > { %v1377_v28 = vpack.c.bf16 %v1106_v26, %v1106_v26  ;;  %v1113_v29 = vmax.f32 %v1097_v27, 0.0 }
 0x148   : > { %1162 = vst.msk [vmem:[%s1986_s29 + $0x18] sm:$0xf] %vm1161_vm0, %v1377_v28  ;;  %v1381_v30 = vpack.c.bf16 %v1113_v29, %v1113_v29 }
 0x14a   : > { %1166 = vst.msk [vmem:[%s1986_s29 + $0x34] sm:$0xf] %vm1161_vm0, %v1381_v30 }
 0x159   : > { %v1050_v31 = vpop.f32.mrb[4].mxu0 }
 0x15a   : > { %v1051_v32 = vadd.f32 %v1050_v31, %v337_v53  ;;  %v1052_v33 = vpop.f32.mrb[5].mxu0 }
 0x15b   : > { %v1053_v34 = vadd.f32 %v1052_v33, %v337_v53  ;;  %v1054_v35 = vpop.f32.mrb[6].mxu0 }
 0x15c   : > { %v1104_v36 = vmax.f32 %v1051_v32, 0.0  ;;  %v1055_v37 = vadd.f32 %v1054_v35, %v342_v55  ;;  %v1056_v38 = vpop.f32.mrb[7].mxu0 }
 0x15d   : > { %v1105_v39 = vmax.f32 %v1053_v34, 0.0  ;;  %v1057_v40 = vadd.f32 %v1056_v38, %v342_v55 }
 0x15e   : > { %v1111_v41 = vmax.f32 %v1055_v37, 0.0 }
 0x15f   : > { %v1376_v42 = vpack.c.bf16 %v1105_v39, %v1104_v36  ;;  %v1112_v43 = vmax.f32 %v1057_v40, 0.0 }
 0x161   : > { %1160 = vst [vmem:[%s1986_s29 + $0x10] sm:$0xff] %v1376_v42  ;;  %v1380_v44 = vpack.c.bf16 %v1112_v43, %v1111_v41 }
 0x163   : > { %1165 = vst [vmem:[%s1986_s29 + $0x2c] sm:$0xff] %v1380_v44 }
 0x164 PF: > { %s13_s12 = sadd.s32 1, %s1584_s12  }
 0x165   : > { %p10_p4 = scmp.ge.s32.totalorder %s13_s12, 4  }
 0x167   :  { %12 = sbr.rel (!%p10_p4) target bundleno = 1 (0x1), region = 65 }

// kernel: dqn_forward.5
= control target key start
LH: loop header
LB: loop body
LE: loop exit
PB: predicated region body
PF: predicated region fallthrough
CT: control target
= control target key end

     0   :  { %s1133_s12 = smov 0   ;;  %s1383_s0 = inlined_call_operand.vmem [shape: bf16[64,512], index: 0, kind: input, shape index: {}]   ;;  %s1384_s1 = inlined_call_operand.vmem [shape: bf16[512,162], index: 1, kind: input, shape index: {}]   ;;  %s1385_s2 = inlined_call_operand.vmem [shape: f32[64,1], index: 2, kind: input, shape index: {}]   ;;  %s1386_s3 = inlined_call_operand.vmem [shape: bf16[64,162], index: 3, kind: output, shape index: {}]  }
   0x1 LB: > { %s872_s13 = sadd.s32 4294967295, %s1110_s12   ;;  %p876_p0 = scmp.ge.s32.totalorder %s1110_s12, 1  ;;  %s1110_s12 = sphi %s1133_s12, %s13_s12  }
   0x2   : > { %p150_p1 = scmp.lt.s32.totalorder %s1110_s12, 3 }
   0x4   : > { %p151_p2 = pnand %p876_p0, %p150_p1 }
   0x5   : > { %v996_v0 = vld [vmem:[%s1384_s1 + $0x4] ss:$8 sps:$4 sm:$0xff] (!%p151_p2)   ;;  %v1112_v2 = vmov (!%p151_p2), 0   ;;  %v1000_v3 = vld [vmem:[%s1384_s1] ss:$8 sps:$4 sm:$0xff] (!%p151_p2)   ;;  %s877_s24 = sshll.u32 (!%p151_p2), %s872_s13, 2 }
   0x6   : > { %154 = sbr.rel (%p151_p2) target bundleno = 303 (0x12f), region = 32  ;;  %v998_v1 = vld [vmem:[%s1384_s1 + $0x104] ss:$8 sps:$4 sm:$0xff] (!%p151_p2)   ;;  %994 = vset.pattern.permute.xlu0 (!%p151_p2), %v1112_v2  ;;  %995 = vset.pattern.permute.xlu1 (!%p151_p2), %v1112_v2  ;;  %v1001_v4 = vld [vmem:[%s1384_s1 + $0x100] ss:$8 sps:$4 sm:$0xff] (!%p151_p2)   ;;  %p182_p3 = scmp.lt.s32.totalorder (!%p151_p2), %s877_s24, 7 }
   0x7   : > { %657 = vmatprep.subr.bf16.mxu1 (!%p151_p2), %v996_v0  ;;  %710 = vmatprep.subr.bf16.mxu0 (!%p151_p2), %v998_v1  ;;  %v1002_v5 = vld [vmem:[%s1384_s1 + $0x14] ss:$8 sps:$4 sm:$0xff] (!%p151_p2)   ;;  %v1006_v7 = vld [vmem:[%s1384_s1 + $0x10] ss:$8 sps:$4 sm:$0xff] (!%p151_p2)   ;;  %v1008_v9 = vld [vmem:[%s1384_s1 + $0x24] ss:$8 sps:$4 sm:$0xff] (!%p151_p2)  }
   0x8   : > { %658 = vmatpush1.bf16.msra.mxu1 (!%p151_p2), %v1000_v3  ;;  %711 = vmatpush1.bf16.msra.mxu0 (!%p151_p2), %v1001_v4  ;;  %v1004_v6 = vld [vmem:[%s1384_s1 + $0x114] ss:$8 sps:$4 sm:$0xff] (!%p151_p2)   ;;  %v1007_v8 = vld [vmem:[%s1384_s1 + $0x110] ss:$8 sps:$4 sm:$0xff] (!%p151_p2)   ;;  %v1010_v10 = vld [vmem:[%s1384_s1 + $0x124] ss:$8 sps:$4 sm:$0xff] (!%p151_p2)  }
   0x9   : > { %659 = vmatprep.subr.bf16.mxu1 (!%p151_p2), %v1002_v5  ;;  %712 = vmatprep.subr.bf16.mxu0 (!%p151_p2), %v1004_v6  ;;  %v1012_v11 = vld [vmem:[%s1384_s1 + $0x20] ss:$8 sps:$4 sm:$0xff] (!%p151_p2)   ;;  %v1014_v13 = vld [vmem:[%s1384_s1 + $0x34] ss:$8 sps:$4 sm:$0xff] (!%p151_p2)   ;;  %v1018_v15 = vld [vmem:[%s1384_s1 + $0x30] ss:$8 sps:$4 sm:$0xff] (!%p151_p2)  }
   0xa   : > { %v1013_v12 = vld [vmem:[%s1384_s1 + $0x120] ss:$8 sps:$4 sm:$0xff] (!%p151_p2)   ;;  %v1016_v14 = vld [vmem:[%s1384_s1 + $0x134] ss:$8 sps:$4 sm:$0xff] (!%p151_p2)   ;;  %v1019_v16 = vld [vmem:[%s1384_s1 + $0x130] ss:$8 sps:$4 sm:$0xff] (!%p151_p2)  }
   0xb   : > { %v1020_v17 = vld [vmem:[%s1384_s1 + $0x44] ss:$8 sps:$4 sm:$0xff] (!%p151_p2)   ;;  %v1024_v19 = vld [vmem:[%s1384_s1 + $0x40] ss:$8 sps:$4 sm:$0xff] (!%p151_p2)   ;;  %v1026_v21 = vld [vmem:[%s1384_s1 + $0x54] ss:$8 sps:$4 sm:$0xff] (!%p151_p2)  }
   0xc   : > { %660 = vmatpush1.bf16.msra.mxu1 (!%p151_p2), %v1006_v7  ;;  %713 = vmatpush1.bf16.msra.mxu0 (!%p151_p2), %v1007_v8  ;;  %v1022_v18 = vld [vmem:[%s1384_s1 + $0x144] ss:$8 sps:$4 sm:$0xff] (!%p151_p2)   ;;  %v1025_v20 = vld [vmem:[%s1384_s1 + $0x140] ss:$8 sps:$4 sm:$0xff] (!%p151_p2)   ;;  %v1028_v22 = vld [vmem:[%s1384_s1 + $0x154] ss:$8 sps:$4 sm:$0xff] (!%p151_p2)  }
   0xd   : > { %661 = vmatprep.subr.bf16.mxu1 %v1008_v9  ;;  %714 = vmatprep.subr.bf16.mxu0 %v1010_v10  ;;  %v1030_v23 = vld [vmem:[%s1384_s1 + $0x50] ss:$8 sps:$4 sm:$0xff]   ;;  %v1032_v25 = vld [vmem:[%s1384_s1 + $0x64] ss:$8 sps:$4 sm:$0xff]   ;;  %v1036_v27 = vld [vmem:[%s1384_s1 + $0x60] ss:$8 sps:$4 sm:$0xff]  }
   0xe   : > { %v1031_v24 = vld [vmem:[%s1384_s1 + $0x150] ss:$8 sps:$4 sm:$0xff]   ;;  %v1034_v26 = vld [vmem:[%s1384_s1 + $0x164] ss:$8 sps:$4 sm:$0xff]   ;;  %v1037_v28 = vld [vmem:[%s1384_s1 + $0x160] ss:$8 sps:$4 sm:$0xff]  }
   0xf   : > { %v1038_v29 = vld [vmem:[%s1384_s1 + $0x74] ss:$8 sps:$4 sm:$0xff]   ;;  %v1042_v31 = vld [vmem:[%s1384_s1 + $0x70] ss:$8 sps:$4 sm:$0xff]   ;;  %v1044_v33 = vld [vmem:[%s1384_s1 + $0x84] ss:$8 sps:$4 sm:$0xff]  }
  0x10   : > { %662 = vmatpush1.bf16.msra.mxu1 %v1012_v11  ;;  %715 = vmatpush1.bf16.msra.mxu0 %v1013_v12  ;;  %v1040_v30 = vld [vmem:[%s1384_s1 + $0x174] ss:$8 sps:$4 sm:$0xff]   ;;  %v1043_v32 = vld [vmem:[%s1384_s1 + $0x170] ss:$8 sps:$4 sm:$0xff]   ;;  %v1046_v34 = vld [vmem:[%s1384_s1 + $0x184] ss:$8 sps:$4 sm:$0xff]  }
  0x11   : > { %663 = vmatprep.subr.bf16.mxu1 %v1014_v13  ;;  %716 = vmatprep.subr.bf16.mxu0 %v1016_v14  ;;  %v1048_v35 = vld [vmem:[%s1384_s1 + $0x80] ss:$8 sps:$4 sm:$0xff]   ;;  %v1050_v37 = vld [vmem:[%s1384_s1 + $0x94] ss:$8 sps:$4 sm:$0xff]   ;;  %s1390_s24 = smov (!%p182_p3, %s877_s24), 7  ;;  %vm795_vm0 = vcmask 1043456  }
  0x12   : > { %v1049_v36 = vld [vmem:[%s1384_s1 + $0x180] ss:$8 sps:$4 sm:$0xff]   ;;  %v1052_v38 = vld [vmem:[%s1384_s1 + $0x194] ss:$8 sps:$4 sm:$0xff]   ;;  %v1054_v39 = vld [vmem:[%s1384_s1 + $0x90] ss:$8 sps:$4 sm:$0xff]  }
  0x13   : > { %v1055_v40 = vld [vmem:[%s1384_s1 + $0x190] ss:$8 sps:$4 sm:$0xff]   ;;  %v1056_v41 = vld [vmem:[%s1384_s1 + $0xa4] ss:$8 sps:$4 sm:$0xff]   ;;  %s963_s23 = sshll.u32 %s1390_s24, 4  ;;  %s881_s14 = sshll.u32 %s1390_s24, 3 }
  0x14   : > { %664 = vmatpush1.bf16.msra.mxu1 %v1018_v15  ;;  %717 = vmatpush1.bf16.msra.mxu0 %v1019_v16  ;;  %v1058_v42 = vld [vmem:[%s1384_s1 + $0x1a4] ss:$8 sps:$4 sm:$0xff]   ;;  %v1060_v43 = vld [vmem:[%s1384_s1 + $0xa0] ss:$8 sps:$4 sm:$0xff]   ;;  %v1062_v45 = vld [vmem:[%s1384_s1 + $0xb4] ss:$8 sps:$4 sm:$0xff]   ;;  %s1284_s13 = scalar_lea.vmem %s1383_s0, %s963_s23  ;;  %s192_s21 = scalar_lea.vmem %s1385_s2, %s881_s14 }
  0x15   : > { %665 = vmatprep.subr.bf16.mxu1 %v1020_v17  ;;  %718 = vmatprep.subr.bf16.mxu0 %v1022_v18  ;;  %v1061_v44 = vld [vmem:[%s1384_s1 + $0x1a0] ss:$8 sps:$4 sm:$0xff]   ;;  %v1064_v46 = vld [vmem:[%s1384_s1 + $0x1b4] ss:$8 sps:$4 sm:$0xff]   ;;  %v1066_v47 = vld [vmem:[%s1384_s1 + $0xb0] ss:$8 sps:$4 sm:$0xff]   ;;  %s1362_s29 = scalar_lea.vmem %s1386_s3, %s881_s14 }
  0x16   : > { %v1067_v48 = vld [vmem:[%s1384_s1 + $0x1b0] ss:$8 sps:$4 sm:$0xff]   ;;  %v1068_v49 = vld [vmem:[%s1384_s1 + $0xc4] ss:$8 sps:$4 sm:$0xff]   ;;  %v1072_v53 = vld [vmem:[%s1384_s1 + $0xc0] ss:$8 sps:$4 sm:$0xff]  }
  0x17   : > { %v1094_v50 = vld [vmem:[%s1284_s13 + $0x4] ss:$16 sps:$4 sm:$0xff]   ;;  %v1097_v52 = vld [vmem:[%s1284_s13 + $0xc] ss:$16 sps:$4 sm:$0xff]   ;;  %v1073_v54 = vld [vmem:[%s1384_s1 + $0x1c0] ss:$8 sps:$4 sm:$0xff]  }
  0x18   : > { %666 = vmatpush1.bf16.msra.mxu1 %v1024_v19  ;;  %719 = vmatpush1.bf16.msra.mxu0 %v1025_v20  ;;  %v1070_v51 = vld [vmem:[%s1384_s1 + $0x1c4] ss:$8 sps:$4 sm:$0xff]   ;;  %v275_v56 = vld [vmem:[%s192_s21 + $0x10] sm:$0xff]  ;;  %v276_v60 = vld [vmem:[%s192_s21 + $0x18] sm:$0xff]  ;;  %vm796_vm1 = vcmask 277508  }
  0x19   : > { %667 = vmatprep.subr.bf16.mxu1 %v1026_v21  ;;  %720 = vmatprep.subr.bf16.mxu0 %v1028_v22  ;;  %v273_v55 = vld [vmem:[%s192_s21] sm:$0xff]  ;;  %v1074_v57 = vld [vmem:[%s1384_s1 + $0xd4] ss:$8 sps:$4 sm:$0xff]   ;;  %v274_v59 = vld [vmem:[%s192_s21 + $0x8] sm:$0xff] }
  0x1a   : > { %689 = vmatprep.mubr.bf16.mxu1 %v1094_v50  ;;  %742 = vmatprep.mubr.bf16.mxu0 %v1097_v52  ;;  %v1076_v58 = vld [vmem:[%s1384_s1 + $0x1d4] ss:$8 sps:$4 sm:$0xff]   ;;  %v1078_v61 = vld [vmem:[%s1384_s1 + $0xd0] ss:$8 sps:$4 sm:$0xff]   ;;  %v1080_v63 = vld [vmem:[%s1384_s1 + $0xe4] ss:$8 sps:$4 sm:$0xff]  }
  0x1b   : > { %279 = vperm.xlu0 %994, %v273_v55   ;;  %289 = vperm.xlu1 %995, %v275_v56   ;;  %v1079_v62 = vld [vmem:[%s1384_s1 + $0x1d0] ss:$8 sps:$4 sm:$0xff]   ;;  %v1082_v0 = vld [vmem:[%s1384_s1 + $0x1e4] ss:$8 sps:$4 sm:$0xff]   ;;  %v1084_v1 = vld [vmem:[%s1384_s1 + $0xe0] ss:$8 sps:$4 sm:$0xff]  }
  0x1c   : > { %668 = vmatpush1.bf16.msra.mxu1 %v1030_v23  ;;  %721 = vmatpush1.bf16.msra.mxu0 %v1031_v24  ;;  %v1085_v2 = vld [vmem:[%s1384_s1 + $0x1e0] ss:$8 sps:$4 sm:$0xff]   ;;  %v1086_v3 = vld [vmem:[%s1384_s1 + $0xf4] ss:$8 sps:$4 sm:$0xff]   ;;  %v1090_v5 = vld [vmem:[%s1384_s1 + $0xf0] ss:$8 sps:$4 sm:$0xff]  }
  0x1d   : > { %669 = vmatprep.subr.bf16.mxu1 %v1032_v25  ;;  %722 = vmatprep.subr.bf16.mxu0 %v1034_v26  ;;  %v1088_v4 = vld [vmem:[%s1384_s1 + $0x1f4] ss:$8 sps:$4 sm:$0xff]   ;;  %v1091_v6 = vld [vmem:[%s1384_s1 + $0x1f0] ss:$8 sps:$4 sm:$0xff]   ;;  %vm1364_vm2 = vmor %vm796_vm1, %vm795_vm0 }
  0x1e   : > { %v1092_v7 = vld [vmem:[%s1284_s13] ss:$16 sps:$4 sm:$0xff]   ;;  %v1095_v8 = vld [vmem:[%s1284_s13 + $0x8] ss:$16 sps:$4 sm:$0xff]   ;;  %v1098_v9 = vld [vmem:[%s1284_s13 + $0x24] ss:$16 sps:$4 sm:$0xff]  }
  0x1f   : > { %284 = vperm.xlu0 %994, %v274_v59   ;;  %294 = vperm.xlu1 %995, %v276_v60   ;;  %v1100_v10 = vld [vmem:[%s1284_s13 + $0x2c] ss:$16 sps:$4 sm:$0xff]   ;;  %v1102_v11 = vld [vmem:[%s1284_s13 + $0x20] ss:$16 sps:$4 sm:$0xff]   ;;  %v1103_v12 = vld [vmem:[%s1284_s13 + $0x28] ss:$16 sps:$4 sm:$0xff]  }
  0x20   : > { %670 = vmatpush1.bf16.msra.mxu1 %v1036_v27  ;;  %723 = vmatpush1.bf16.msra.mxu0 %v1037_v28 }
  0x21   : > { %671 = vmatprep.subr.bf16.mxu1 %v1038_v29  ;;  %724 = vmatprep.subr.bf16.mxu0 %v1040_v30 }
  0x24   : > { %672 = vmatpush1.bf16.msra.mxu1 %v1042_v31  ;;  %725 = vmatpush1.bf16.msra.mxu0 %v1043_v32 }
  0x25   : > { %673 = vmatprep.subr.bf16.mxu1 %v1044_v33  ;;  %726 = vmatprep.subr.bf16.mxu0 %v1046_v34 }
  0x28   : > { %674 = vmatpush1.bf16.msra.mxu1 %v1048_v35  ;;  %727 = vmatpush1.bf16.msra.mxu0 %v1049_v36 }
  0x29   : > { %675 = vmatprep.subr.bf16.mxu1 %v1050_v37  ;;  %728 = vmatprep.subr.bf16.mxu0 %v1052_v38 }
  0x2c   : > { %676 = vmatpush1.bf16.msra.mxu1 %v1054_v39  ;;  %729 = vmatpush1.bf16.msra.mxu0 %v1055_v40 }
  0x2d   : > { %677 = vmatprep.subr.bf16.mxu1 %v1056_v41  ;;  %730 = vmatprep.subr.bf16.mxu0 %v1058_v42 }
  0x30   : > { %678 = vmatpush1.bf16.msra.mxu1 %v1060_v43  ;;  %731 = vmatpush1.bf16.msra.mxu0 %v1061_v44 }
  0x31   : > { %679 = vmatprep.subr.bf16.mxu1 %v1062_v45  ;;  %732 = vmatprep.subr.bf16.mxu0 %v1064_v46 }
  0x34   : > { %680 = vmatpush1.bf16.msra.mxu1 %v1066_v47  ;;  %733 = vmatpush1.bf16.msra.mxu0 %v1067_v48 }
  0x35   : > { %681 = vmatprep.subr.bf16.mxu1 %v1068_v49  ;;  %734 = vmatprep.subr.bf16.mxu0 %v1070_v51 }
  0x38   : > { %682 = vmatpush1.bf16.msra.mxu1 %v1072_v53  ;;  %735 = vmatpush1.bf16.msra.mxu0 %v1073_v54 }
  0x39   : > { %683 = vmatprep.subr.bf16.mxu1 %v1074_v57  ;;  %736 = vmatprep.subr.bf16.mxu0 %v1076_v58 }
  0x3c   : > { %684 = vmatpush1.bf16.msra.mxu1 %v1078_v61  ;;  %737 = vmatpush1.bf16.msra.mxu0 %v1079_v62 }
  0x3d   : > { %685 = vmatprep.subr.bf16.mxu1 %v1080_v63  ;;  %738 = vmatprep.subr.bf16.mxu0 %v1082_v0 }
  0x40   : > { %686 = vmatpush1.bf16.msra.mxu1 %v1084_v1  ;;  %739 = vmatpush1.bf16.msra.mxu0 %v1085_v2 }
  0x41   : > { %687 = vmatprep.subr.bf16.mxu1 %v1086_v3  ;;  %740 = vmatprep.subr.bf16.mxu0 %v1088_v4 }
  0x44   : > { %688 = vmatpush1.bf16.msra.mxu1 %v1090_v5  ;;  %741 = vmatpush1.bf16.msra.mxu0 %v1091_v6 }
  0x47   : > { %690 = vmatmul.mubr.bf16.vlgmr.msra.gmra.mrb[0].mxu1 %v1092_v7  ;;  %743 = vmatmul.mubr.bf16.vlgmr.msra.gmra.mrb[0].mxu0 %v1095_v8 }
  0x48   : > { %699 = vmatprep.mubr.bf16.mxu1 %v1098_v9  ;;  %752 = vmatprep.mubr.bf16.mxu0 %v1100_v10 }
  0x4f   : > { %700 = vmatmul.mubr.bf16.gmra.mrb[4].mxu1 %v1102_v11  ;;  %753 = vmatmul.mubr.bf16.gmra.mrb[4].mxu0 %v1103_v12 }
  0x9a   : > { %v280_v13 = vpop.permute.xlu0 %279  ;;  %v290_v15 = vpop.permute.xlu1 %289 }
  0x9e   : > { %v285_v14 = vpop.permute.xlu0 %284  ;;  %v295_v36 = vpop.permute.xlu1 %294 }
 0x11a   : > { %v691_v16 = vpop.f32.mrb[0].mxu1  ;;  %v744_v17 = vpop.f32.mrb[0].mxu0 }
 0x11b   : > { %v692_v18 = vadd.f32 %v691_v16, %v280_v13  ;;  %v693_v19 = vpop.f32.mrb[1].mxu1  ;;  %v746_v20 = vpop.f32.mrb[1].mxu0 }
 0x11c   : > { %v694_v21 = vadd.f32 %v693_v19, %v280_v13  ;;  %v695_v22 = vpop.f32.mrb[2].mxu1  ;;  %v748_v23 = vpop.f32.mrb[2].mxu0 }
 0x11d   : > { %v745_v24 = vadd.f32 %v744_v17, %v692_v18  ;;  %v696_v25 = vadd.f32 %v695_v22, %v285_v14  ;;  %v697_v26 = vpop.f32.mrb[3].mxu1  ;;  %v750_v27 = vpop.f32.mrb[3].mxu0 }
 0x11e   : > { %v747_v28 = vadd.f32 %v746_v20, %v694_v21  ;;  %v698_v29 = vadd.f32 %v697_v26, %v285_v14 }
 0x11f   : > { %v763_v30 = vmax.f32 %v745_v24, 0.0  ;;  %v749_v31 = vadd.f32 %v748_v23, %v696_v25 }
 0x120   : > { %v764_v32 = vmax.f32 %v747_v28, 0.0  ;;  %v751_v33 = vadd.f32 %v750_v27, %v698_v29 }
 0x121   : > { %v765_v35 = vmax.f32 %v749_v31, 0.0 }
 0x122   : > { %v965_v37 = vpack.c.bf16 %v764_v32, %v763_v30  ;;  %v766_v38 = vmax.f32 %v751_v33, 0.0  ;;  %v701_v39 = vpop.f32.mrb[4].mxu1  ;;  %v754_v40 = vpop.f32.mrb[4].mxu0 }
 0x123   : > { %v702_v41 = vadd.f32 %v701_v39, %v290_v15  ;;  %v703_v42 = vpop.f32.mrb[5].mxu1  ;;  %v756_v43 = vpop.f32.mrb[5].mxu0 }
 0x124   : > { %798 = vst.msk [vmem:[%s1362_s29] sm:$0xff] %vm1364_vm2, %v965_v37  ;;  %v966_v44 = vpack.c.bf16 %v766_v38, %v765_v35  ;;  %v704_v45 = vadd.f32 %v703_v42, %v290_v15  ;;  %v705_v46 = vpop.f32.mrb[6].mxu1  ;;  %v758_v47 = vpop.f32.mrb[6].mxu0 }
 0x125   : > { %v755_v48 = vadd.f32 %v754_v40, %v702_v41  ;;  %v706_v49 = vadd.f32 %v705_v46, %v295_v36  ;;  %v707_v50 = vpop.f32.mrb[7].mxu1  ;;  %v760_v51 = vpop.f32.mrb[7].mxu0 }
 0x126   : > { %799 = vst.msk [vmem:[%s1362_s29 + $0x8] sm:$0xff] %vm1364_vm2, %v966_v44  ;;  %v757_v52 = vadd.f32 %v756_v43, %v704_v45  ;;  %v708_v53 = vadd.f32 %v707_v50, %v295_v36 }
 0x127   : > { %v767_v54 = vmax.f32 %v755_v48, 0.0  ;;  %v759_v55 = vadd.f32 %v758_v47, %v706_v49 }
 0x128   : > { %v768_v56 = vmax.f32 %v757_v52, 0.0  ;;  %v761_v57 = vadd.f32 %v760_v51, %v708_v53 }
 0x129   : > { %v769_v58 = vmax.f32 %v759_v55, 0.0 }
 0x12a   : > { %v967_v59 = vpack.c.bf16 %v768_v56, %v767_v54  ;;  %v770_v60 = vmax.f32 %v761_v57, 0.0 }
 0x12c   : > { %800 = vst.msk [vmem:[%s1362_s29 + $0x10] sm:$0xff] %vm1364_vm2, %v967_v59  ;;  %v968_v61 = vpack.c.bf16 %v770_v60, %v769_v58 }
 0x12e   : > { %801 = vst.msk [vmem:[%s1362_s29 + $0x18] sm:$0xff] %vm1364_vm2, %v968_v61 }
 0x12f PF: > { %s13_s12 = sadd.s32 1, %s1110_s12  }
 0x130   : > { %p10_p4 = scmp.ge.s32.totalorder %s13_s12, 4  }
 0x132   :  { %12 = sbr.rel (!%p10_p4) target bundleno = 1 (0x1), region = 65 }

// kernel: dqn_forward.6
= control target key start
LH: loop header
LB: loop body
LE: loop exit
PB: predicated region body
PF: predicated region fallthrough
CT: control target
= control target key end

     0   :  { %s1055_s12 = smov 0   ;;  %s1204_s0 = inlined_call_operand.vmem [shape: bf16[64,576], index: 0, kind: input, shape index: {}]   ;;  %s1205_s1 = inlined_call_operand.vmem [shape: bf16[576,98], index: 1, kind: input, shape index: {}]   ;;  %s1206_s2 = inlined_call_operand.vmem [shape: f32[64,1], index: 2, kind: input, shape index: {}]   ;;  %s1207_s3 = inlined_call_operand.vmem [shape: bf16[64,98], index: 3, kind: output, shape index: {}]  }
   0x1 LB: > { %s821_s13 = sadd.s32 4294967295, %s1032_s12   ;;  %p825_p0 = scmp.ge.s32.totalorder %s1032_s12, 1  ;;  %s1032_s12 = sphi %s1055_s12, %s13_s12  }
   0x2   : > { %p150_p1 = scmp.lt.s32.totalorder %s1032_s12, 3 }
   0x4   : > { %p151_p2 = pnand %p825_p0, %p150_p1 }
   0x5   : > { %v976_v0 = vld [vmem:[%s1205_s1 + $0x40] sm:$0xff] (!%p151_p2)   ;;  %v980_v4 = vld [vmem:[%s1205_s1 + $0x48] sm:$0xff] (!%p151_p2)   ;;  %v1034_v6 = vmov (!%p151_p2), 0   ;;  %v984_v9 = vld [vmem:[%s1205_s1 + $0x50] sm:$0xff] (!%p151_p2)   ;;  %s826_s17 = sshll.u32 (!%p151_p2), %s821_s13, 2  ;;  %vm574_vm0 = vcmask (!%p151_p2), 523264  }
   0x6   : > { %154 = sbr.rel (%p151_p2) target bundleno = 276 (0x114), region = 32  ;;  %v977_v1 = vld [vmem:[%s1205_s1] sm:$0xff] (!%p151_p2)   ;;  %890 = vmatprep.subr.bf16.mxu0 (!%p151_p2), %v976_v0  ;;  %v981_v5 = vld [vmem:[%s1205_s1 + $0x8] sm:$0xff] (!%p151_p2)   ;;  %974 = vset.pattern.permute.xlu0 (!%p151_p2), %v1034_v6  ;;  %v985_v10 = vld [vmem:[%s1205_s1 + $0x10] sm:$0xff] (!%p151_p2)   ;;  %p181_p3 = scmp.lt.s32.totalorder (!%p151_p2), %s826_s17, 7  ;;  %vm748_vm1 = vcmask (!%p151_p2), 797696  }
   0x7   : > { %v978_v2 = vld [vmem:[%s1205_s1 + $0xc0] sm:$0xff] (!%p151_p2)   ;;  %891 = vmatpush3.bf16.msra.mxu0 (!%p151_p2), %v977_v1  ;;  %v982_v7 = vld [vmem:[%s1205_s1 + $0xc8] sm:$0xff] (!%p151_p2)   ;;  %975 = vset.pattern.permute.xlu1 (!%p151_p2), %v1034_v6  ;;  %v986_v11 = vld [vmem:[%s1205_s1 + $0xd0] sm:$0xff] (!%p151_p2)  }
   0x8   : > { %v979_v3 = vld [vmem:[%s1205_s1 + $0x80] sm:$0xff] (!%p151_p2)   ;;  %918 = vmatprep.subr.bf16.mxu1 (!%p151_p2), %v978_v2  ;;  %892 = vmatprep.subr.bf16.mxu0 (!%p151_p2), %v980_v4  ;;  %v983_v8 = vld [vmem:[%s1205_s1 + $0x88] sm:$0xff] (!%p151_p2)   ;;  %v987_v12 = vld [vmem:[%s1205_s1 + $0x90] sm:$0xff] (!%p151_p2)  }
   0x9   : > { %919 = vmatpush3.bf16.msra.mxu1 (!%p151_p2), %v979_v3  ;;  %v988_v13 = vld [vmem:[%s1205_s1 + $0x58] sm:$0xff] (!%p151_p2)   ;;  %v992_v17 = vld [vmem:[%s1205_s1 + $0x60] sm:$0xff] (!%p151_p2)   ;;  %v996_v21 = vld [vmem:[%s1205_s1 + $0x68] sm:$0xff] (!%p151_p2)  }
   0xa   : > { %920 = vmatprep.subr.bf16.mxu1 (!%p151_p2), %v982_v7  ;;  %v989_v14 = vld [vmem:[%s1205_s1 + $0x18] sm:$0xff] (!%p151_p2)   ;;  %v993_v18 = vld [vmem:[%s1205_s1 + $0x20] sm:$0xff] (!%p151_p2)   ;;  %v997_v22 = vld [vmem:[%s1205_s1 + $0x28] sm:$0xff] (!%p151_p2)  }
   0xb   : > { %893 = vmatpush3.bf16.msra.mxu0 (!%p151_p2), %v981_v5  ;;  %v990_v15 = vld [vmem:[%s1205_s1 + $0xd8] sm:$0xff] (!%p151_p2)   ;;  %v994_v19 = vld [vmem:[%s1205_s1 + $0xe0] sm:$0xff] (!%p151_p2)   ;;  %v998_v23 = vld [vmem:[%s1205_s1 + $0xe8] sm:$0xff] (!%p151_p2)  }
   0xc   : > { %894 = vmatprep.subr.bf16.mxu0 (!%p151_p2), %v984_v9  ;;  %v991_v16 = vld [vmem:[%s1205_s1 + $0x98] sm:$0xff] (!%p151_p2)   ;;  %v995_v20 = vld [vmem:[%s1205_s1 + $0xa0] sm:$0xff] (!%p151_p2)   ;;  %v999_v24 = vld [vmem:[%s1205_s1 + $0xa8] sm:$0xff] (!%p151_p2)  }
   0xd   : > { %921 = vmatpush3.bf16.msra.mxu1 %v983_v8  ;;  %s1209_s17 = smov (!%p181_p3, %s826_s17), 7  ;;  %v1000_v25 = vld [vmem:[%s1205_s1 + $0x70] sm:$0xff]   ;;  %v1004_v29 = vld [vmem:[%s1205_s1 + $0x78] sm:$0xff]   ;;  %v1011_v35 = vld [vmem:[%s1205_s1 + $0x100] sm:$0xff]  }
   0xe   : > { %922 = vmatprep.subr.bf16.mxu1 %v986_v11  ;;  %s964_s14 = smul.u32 20, %s1209_s17  ;;  %v1001_v26 = vld [vmem:[%s1205_s1 + $0x30] sm:$0xff]   ;;  %v1005_v30 = vld [vmem:[%s1205_s1 + $0x38] sm:$0xff]   ;;  %v1015_v38 = vld [vmem:[%s1205_s1 + $0x108] sm:$0xff]   ;;  %s829_s9 = sshll.u32 %s1209_s17, 3 }
   0xf   : > { %895 = vmatpush3.bf16.msra.mxu0 %v985_v10  ;;  %v1002_v27 = vld [vmem:[%s1205_s1 + $0xf0] sm:$0xff]   ;;  %v1006_v31 = vld [vmem:[%s1205_s1 + $0xf8] sm:$0xff]   ;;  %s191_s16 = scalar_lea.vmem %s1206_s2, %s829_s9  ;;  %s831_s20 = sshll.u32 %s1209_s17, 2 }
  0x10   : > { %896 = vmatprep.subr.bf16.mxu0 %v988_v13  ;;  %v1003_v28 = vld [vmem:[%s1205_s1 + $0xb0] sm:$0xff]   ;;  %s1158_s13 = scalar_lea.vmem %s1204_s0, %s964_s14  ;;  %v1010_v34 = vld [vmem:[%s1205_s1 + $0xb8] sm:$0xff]   ;;  %v284_v46 = vld [vmem:[%s191_s16] sm:$0xff]  ;;  %s197_s23 = scalar_lea.vmem %s1207_s3, %s831_s20 }
  0x11   : > { %923 = vmatpush3.bf16.msra.mxu1 %v987_v12  ;;  %v1007_v32 = vld [vmem:[%s1158_s13] ss:$20 sps:$4 sm:$0xff]   ;;  %v1009_v33 = vld [vmem:[%s1158_s13 + $0x4] ss:$20 sps:$4 sm:$0xff]   ;;  %v1012_v36 = vld [vmem:[%s1158_s13 + $0x8] ss:$20 sps:$4 sm:$0xff]   ;;  %290 = vperm.xlu0 %974, %v284_v46  }
  0x12   : > { %924 = vmatprep.subr.bf16.mxu1 %v990_v15  ;;  %613 = vmatprep.mubr.bf16.mxu0 %v1009_v33  ;;  %v1014_v37 = vld [vmem:[%s1158_s13 + $0xc] ss:$20 sps:$4 sm:$0xff]   ;;  %v1018_v40 = vld [vmem:[%s1158_s13 + $0x28] ss:$20 sps:$4 sm:$0xff]   ;;  %v1019_v41 = vld [vmem:[%s1205_s1 + $0x110] sm:$0xff]  }
  0x13   : > { %897 = vmatpush3.bf16.msra.mxu0 %v989_v14  ;;  %662 = vmatprep.mubr.bf16.mxu1 %v1014_v37  ;;  %v1016_v39 = vld [vmem:[%s1158_s13 + $0x2c] ss:$20 sps:$4 sm:$0xff]   ;;  %v1020_v42 = vld [vmem:[%s1158_s13 + $0x34] ss:$20 sps:$4 sm:$0xff]   ;;  %v1022_v43 = vld [vmem:[%s1158_s13 + $0x30] ss:$20 sps:$4 sm:$0xff]  }
  0x14   : > { %898 = vmatprep.subr.bf16.mxu0 %v992_v17  ;;  %v1023_v44 = vld [vmem:[%s1205_s1 + $0x118] sm:$0xff]   ;;  %v1024_v45 = vld [vmem:[%s1158_s13 + $0x10] ss:$20 sps:$4 sm:$0xff]   ;;  %v285_v48 = vld [vmem:[%s191_s16 + $0x8] sm:$0xff] }
  0x15   : > { %925 = vmatpush3.bf16.msra.mxu1 %v991_v16  ;;  %v286_v47 = vld [vmem:[%s191_s16 + $0x10] sm:$0xff]  ;;  %v287_v49 = vld [vmem:[%s191_s16 + $0x18] sm:$0xff]  ;;  %295 = vperm.xlu0 %974, %v285_v48  }
  0x16   : > { %926 = vmatprep.subr.bf16.mxu1 %v994_v19  ;;  %300 = vperm.xlu1 %975, %v286_v47   ;;  %v1025_v50 = vld [vmem:[%s1158_s13 + $0x38] ss:$20 sps:$4 sm:$0xff]  }
  0x17   : > { %899 = vmatpush3.bf16.msra.mxu0 %v993_v18 }
  0x18   : > { %900 = vmatprep.subr.bf16.mxu0 %v996_v21 }
  0x19   : > { %927 = vmatpush3.bf16.msra.mxu1 %v995_v20 }
  0x1a   : > { %928 = vmatprep.subr.bf16.mxu1 %v998_v23  ;;  %305 = vperm.xlu1 %975, %v287_v49  }
  0x1b   : > { %901 = vmatpush3.bf16.msra.mxu0 %v997_v22 }
  0x1c   : > { %902 = vmatprep.subr.bf16.mxu0 %v1000_v25 }
  0x1d   : > { %929 = vmatpush3.bf16.msra.mxu1 %v999_v24 }
  0x1e   : > { %930 = vmatprep.subr.bf16.mxu1 %v1002_v27 }
  0x1f   : > { %903 = vmatpush3.bf16.msra.mxu0 %v1001_v26 }
  0x20   : > { %904 = vmatprep.subr.bf16.mxu0 %v1004_v29 }
  0x21   : > { %931 = vmatpush3.bf16.msra.mxu1 %v1003_v28 }
  0x22   : > { %932 = vmatprep.subr.bf16.mxu1 %v1006_v31 }
  0x23   : > { %905 = vmatpush3.bf16.msra.mxu0 %v1005_v30 }
  0x24   : > { %952 = vmatprep.subr.bf16.mxu0 %v1011_v35 }
  0x25   : > { %933 = vmatpush3.bf16.msra.mxu1 %v1010_v34 }
  0x26   : > { %614 = vmatmul.mubr.bf16.vlgmr.msra.gmra.mrb[0].mxu0 %v1007_v32 }
  0x27   : > { %953 = vmatpush3.bf16.msra.mxu0 %v1011_v35  ;;  %621 = vmatprep.mubr.bf16.mxu0 %v1016_v39 }
  0x28   : > { %663 = vmatmul.mubr.bf16.vlgmr.msra.gmra.mrb[0].mxu1 %v1012_v36  ;;  %954 = vmatprep.subr.bf16.mxu0 %v1015_v38 }
  0x29   : > { %670 = vmatprep.mubr.bf16.mxu1 %v1020_v42 }
  0x2b   : > { %955 = vmatpush3.bf16.msra.mxu0 %v1015_v38 }
  0x2c   : > { %956 = vmatprep.subr.bf16.mxu0 %v1019_v41 }
  0x2e   : > { %622 = vmatmul.mubr.bf16.gmra.mrb[4].mxu0 %v1018_v40 }
  0x2f   : > { %960 = vmatprep.mubr.msk.bf16.mxu0 %vm574_vm0, %v1024_v45  ;;  %957 = vmatpush3.bf16.msra.mxu0 %v1019_v41 }
  0x30   : > { %671 = vmatmul.mubr.bf16.gmra.mrb[4].mxu1 %v1022_v43  ;;  %958 = vmatprep.subr.bf16.mxu0 %v1023_v44 }
  0x33   : > { %959 = vmatpush3.bf16.msra.mxu0 %v1023_v44 }
  0x36   : > { %961 = vmatmul.mubr.msk.bf16.vlgmr.msra.gmra.mrb[8].mxu0 %vm574_vm0, %v1025_v50 }
  0x90   : > { %v291_v51 = vpop.permute.xlu0 %290 }
  0x94   : > { %v296_v56 = vpop.permute.xlu0 %295 }
  0x95   : > { %v301_v62 = vpop.permute.xlu1 %300 }
  0x99   : > { %v306_v10 = vpop.permute.xlu1 %305 }
  0xf9   : > { %v906_v52 = vpop.f32.mrb[0].mxu0 }
  0xfa   : > { %v907_v53 = vpop.f32.mrb[1].mxu0 }
  0xfb   : > { %v908_v54 = vadd.f32 %v907_v53, %v906_v52  ;;  %v909_v55 = vpop.f32.mrb[2].mxu0  ;;  %v934_v57 = vpop.f32.mrb[0].mxu1 }
  0xfc   : > { %v910_v58 = vpop.f32.mrb[3].mxu0  ;;  %v935_v61 = vpop.f32.mrb[1].mxu1 }
  0xfd   : > { %v616_v59 = vadd.f32 %v908_v54, %v291_v51  ;;  %v911_v60 = vadd.f32 %v910_v58, %v909_v55  ;;  %v936_v63 = vadd.f32 %v935_v61, %v934_v57  ;;  %v937_v0 = vpop.f32.mrb[2].mxu1 }
  0xfe   : > { %v938_v2 = vpop.f32.mrb[3].mxu1 }
  0xff   : > { %v619_v1 = vadd.f32 %v911_v60, %v296_v56  ;;  %v939_v3 = vadd.f32 %v938_v2, %v937_v0  ;;  %v665_v4 = vadd.f32 %v936_v63, %v616_v59 }
 0x101   : > { %v912_v5 = vpop.f32.mrb[4].mxu0  ;;  %v668_v7 = vadd.f32 %v939_v3, %v619_v1 }
 0x102   : > { %v913_v6 = vpop.f32.mrb[5].mxu0 }
 0x103   : > { %v914_v8 = vadd.f32 %v913_v6, %v912_v5  ;;  %v915_v9 = vpop.f32.mrb[6].mxu0  ;;  %v940_v11 = vpop.f32.mrb[4].mxu1 }
 0x104   : > { %v916_v12 = vpop.f32.mrb[7].mxu0  ;;  %v941_v15 = vpop.f32.mrb[5].mxu1 }
 0x105   : > { %v624_v13 = vadd.f32 %v914_v8, %v301_v62  ;;  %v917_v14 = vadd.f32 %v916_v12, %v915_v9  ;;  %v942_v16 = vadd.f32 %v941_v15, %v940_v11  ;;  %v943_v17 = vpop.f32.mrb[6].mxu1 }
 0x106   : > { %v944_v19 = vpop.f32.mrb[7].mxu1 }
 0x107   : > { %v627_v18 = vadd.f32 %v917_v14, %v306_v10  ;;  %v945_v20 = vadd.f32 %v944_v19, %v943_v17  ;;  %v673_v21 = vadd.f32 %v942_v16, %v624_v13 }
 0x109   : > { %v962_v22 = vpop.f32.mrb[8].mxu0  ;;  %v676_v23 = vadd.f32 %v945_v20, %v627_v18 }
 0x10a   : > { %v722_v24 = vadd.f32 %v962_v22, %v673_v21  ;;  %v713_v25 = vpop.f32.mrb[9].mxu0 }
 0x10b   : > { %v714_v26 = vadd.f32 %v713_v25, %v665_v4  ;;  %v963_v27 = vpop.f32.mrb[10].mxu0 }
 0x10c   : > { %v725_v28 = vadd.f32 %v963_v27, %v676_v23  ;;  %v716_v29 = vpop.f32.mrb[11].mxu0  ;;  %v730_v32 = vmax.f32 %v722_v24, 0.0 }
 0x10d   : > { %v728_v30 = vmax.f32 %v714_v26, 0.0  ;;  %v717_v31 = vadd.f32 %v716_v29, %v668_v7 }
 0x10e   : > { %v731_v34 = vmax.f32 %v725_v28, 0.0  ;;  %v888_v37 = vpack.c.bf16 %v730_v32, %v730_v32 }
 0x10f   : > { %v886_v33 = vpack.c.bf16 %v728_v30, %v728_v30  ;;  %v729_v35 = vmax.f32 %v717_v31, 0.0 }
 0x110   : > { %v889_v38 = vpack.c.bf16 %v731_v34, %v731_v34  ;;  %751 = vst.msk [vmem:[%s197_s23 + $0x8] sm:$0xf] %vm748_vm1, %v888_v37 }
 0x111   : > { %749 = vst.msk [vmem:[%s197_s23] sm:$0xf] %vm748_vm1, %v886_v33  ;;  %v887_v36 = vpack.c.bf16 %v729_v35, %v729_v35 }
 0x112   : > { %752 = vst.msk [vmem:[%s197_s23 + $0xc] sm:$0xf] %vm748_vm1, %v889_v38 }
 0x113   : > { %750 = vst.msk [vmem:[%s197_s23 + $0x4] sm:$0xf] %vm748_vm1, %v887_v36 }
 0x114 PF: > { %s13_s12 = sadd.s32 1, %s1032_s12  }
 0x115   : > { %p10_p4 = scmp.ge.s32.totalorder %s13_s12, 4  }
 0x117   :  { %12 = sbr.rel (!%p10_p4) target bundleno = 1 (0x1), region = 65 }

// kernel: dqn_forward.7
= control target key start
LH: loop header
LB: loop body
LE: loop exit
PB: predicated region body
PF: predicated region fallthrough
CT: control target
= control target key end

     0   :  { %v812_v36 = vlaneseq  ;;  %v8581_v37 = vmov 1966171168   ;;  %s11223_s0 = inlined_call_operand.vmem [shape: bf16[2,3136], index: 0, kind: input, shape index: {}]   ;;  %s11224_s1 = inlined_call_operand.vmem [shape: bf16[3136,512], index: 1, kind: input, shape index: {}]   ;;  %s11225_s2 = inlined_call_operand.vmem [shape: f32[1,512], index: 2, kind: input, shape index: {}]   ;;  %s11226_s3 = inlined_call_operand.vmem [shape: bf16[512,128], index: 3, kind: input, shape index: {}]   ;;  %s11227_s4 = inlined_call_operand.vmem [shape: f32[1,128], index: 4, kind: input, shape index: {}]   ;;  %s11228_s5 = inlined_call_operand.hbm [shape: f32[2,128], index: 5, kind: output, shape index: {}]  }
   0x1   :  { %v7344_v0 = vld [vmem:[%s11224_s1 + $0x4] ss:$16 sps:$4 sm:$0xff]   ;;  %v7346_v1 = vld [vmem:[%s11224_s1 + $0xc] ss:$16 sps:$4 sm:$0xff]   ;;  %v7348_v2 = vld [vmem:[%s11224_s1] ss:$16 sps:$4 sm:$0xff]   ;;  %v838_v38 = vunpack.c.l.s4 %v8581_v37 }
   0x2   :  { %4945 = vmatprep.subr.bf16.mxu0 %v7344_v0  ;;  %v7349_v3 = vld [vmem:[%s11224_s1 + $0x8] ss:$16 sps:$4 sm:$0xff]   ;;  %5478 = vmatprep.subr.bf16.mxu1 %v7346_v1  ;;  %v7350_v4 = vld [vmem:[%s11224_s1 + $0x24] ss:$16 sps:$4 sm:$0xff]   ;;  %v7352_v5 = vld [vmem:[%s11224_s1 + $0x2c] ss:$16 sps:$4 sm:$0xff]  }
   0x3   :  { %4946 = vmatpush1.bf16.msra.mxu0 %v7348_v2  ;;  %5479 = vmatpush1.bf16.msra.mxu1 %v7349_v3  ;;  %v7354_v6 = vld [vmem:[%s11224_s1 + $0x20] ss:$16 sps:$4 sm:$0xff]   ;;  %v7355_v7 = vld [vmem:[%s11224_s1 + $0x28] ss:$16 sps:$4 sm:$0xff]   ;;  %v7356_v8 = vld [vmem:[%s11224_s1 + $0x44] ss:$16 sps:$4 sm:$0xff]   ;;  %v839_v43 = vunpack.c.0.s8 %v838_v38 }
   0x4   :  { %4947 = vmatprep.subr.bf16.mxu0 %v7350_v4  ;;  %5480 = vmatprep.subr.bf16.mxu1 %v7352_v5  ;;  %v7358_v9 = vld [vmem:[%s11224_s1 + $0x4c] ss:$16 sps:$4 sm:$0xff]   ;;  %v7360_v10 = vld [vmem:[%s11224_s1 + $0x40] ss:$16 sps:$4 sm:$0xff]   ;;  %v7361_v11 = vld [vmem:[%s11224_s1 + $0x48] ss:$16 sps:$4 sm:$0xff]  }
   0x5   :  { %v7362_v12 = vld [vmem:[%s11224_s1 + $0x64] ss:$16 sps:$4 sm:$0xff]   ;;  %v7364_v13 = vld [vmem:[%s11224_s1 + $0x6c] ss:$16 sps:$4 sm:$0xff]   ;;  %v7366_v14 = vld [vmem:[%s11224_s1 + $0x60] ss:$16 sps:$4 sm:$0xff]  }
   0x6   :  { %v7367_v15 = vld [vmem:[%s11224_s1 + $0x68] ss:$16 sps:$4 sm:$0xff]   ;;  %v7368_v16 = vld [vmem:[%s11224_s1 + $0x84] ss:$16 sps:$4 sm:$0xff]   ;;  %v7370_v17 = vld [vmem:[%s11224_s1 + $0x8c] ss:$16 sps:$4 sm:$0xff]  }
   0x7   :  { %4948 = vmatpush1.bf16.msra.mxu0 %v7354_v6  ;;  %5481 = vmatpush1.bf16.msra.mxu1 %v7355_v7  ;;  %v7372_v18 = vld [vmem:[%s11224_s1 + $0x80] ss:$16 sps:$4 sm:$0xff]   ;;  %v7373_v19 = vld [vmem:[%s11224_s1 + $0x88] ss:$16 sps:$4 sm:$0xff]   ;;  %v7374_v20 = vld [vmem:[%s11224_s1 + $0xa4] ss:$16 sps:$4 sm:$0xff]  }
   0x8   :  { %4949 = vmatprep.subr.bf16.mxu0 %v7356_v8  ;;  %5482 = vmatprep.subr.bf16.mxu1 %v7358_v9  ;;  %v7376_v21 = vld [vmem:[%s11224_s1 + $0xac] ss:$16 sps:$4 sm:$0xff]   ;;  %v7378_v22 = vld [vmem:[%s11224_s1 + $0xa0] ss:$16 sps:$4 sm:$0xff]   ;;  %v7379_v23 = vld [vmem:[%s11224_s1 + $0xa8] ss:$16 sps:$4 sm:$0xff]  }
   0x9   :  { %v7380_v24 = vld [vmem:[%s11224_s1 + $0xc4] ss:$16 sps:$4 sm:$0xff]   ;;  %v7382_v25 = vld [vmem:[%s11224_s1 + $0xcc] ss:$16 sps:$4 sm:$0xff]   ;;  %v7384_v26 = vld [vmem:[%s11224_s1 + $0xc0] ss:$16 sps:$4 sm:$0xff]  }
   0xa   :  { %v7385_v27 = vld [vmem:[%s11224_s1 + $0xc8] ss:$16 sps:$4 sm:$0xff]   ;;  %v7386_v28 = vld [vmem:[%s11224_s1 + $0xe4] ss:$16 sps:$4 sm:$0xff]   ;;  %v7388_v29 = vld [vmem:[%s11224_s1 + $0xec] ss:$16 sps:$4 sm:$0xff]  }
   0xb   :  { %4950 = vmatpush1.bf16.msra.mxu0 %v7360_v10  ;;  %5483 = vmatpush1.bf16.msra.mxu1 %v7361_v11  ;;  %v7390_v30 = vld [vmem:[%s11224_s1 + $0xe0] ss:$16 sps:$4 sm:$0xff]   ;;  %v7391_v31 = vld [vmem:[%s11224_s1 + $0xe8] ss:$16 sps:$4 sm:$0xff]   ;;  %v7392_v32 = vld [vmem:[%s11224_s1 + $0x104] ss:$16 sps:$4 sm:$0xff]  }
   0xc   :  { %4951 = vmatprep.subr.bf16.mxu0 %v7362_v12  ;;  %5484 = vmatprep.subr.bf16.mxu1 %v7364_v13  ;;  %v7394_v33 = vld [vmem:[%s11224_s1 + $0x10c] ss:$16 sps:$4 sm:$0xff]   ;;  %v7396_v34 = vld [vmem:[%s11224_s1 + $0x100] ss:$16 sps:$4 sm:$0xff]   ;;  %v7397_v35 = vld [vmem:[%s11224_s1 + $0x108] ss:$16 sps:$4 sm:$0xff]  }
   0xd   :  { %v7398_v39 = vld [vmem:[%s11224_s1 + $0x124] ss:$16 sps:$4 sm:$0xff]   ;;  %v7400_v40 = vld [vmem:[%s11224_s1 + $0x12c] ss:$16 sps:$4 sm:$0xff]   ;;  %v7402_v41 = vld [vmem:[%s11224_s1 + $0x120] ss:$16 sps:$4 sm:$0xff]  }
   0xe   :  { %v8731_v42 = vshrl.u32 %v812_v36, 7  ;;  %v7403_v44 = vld [vmem:[%s11224_s1 + $0x128] ss:$16 sps:$4 sm:$0xff]   ;;  %v7404_v45 = vld [vmem:[%s11224_s1 + $0x144] ss:$16 sps:$4 sm:$0xff]  }
   0xf   :  { %4952 = vmatpush1.bf16.msra.mxu0 %v7366_v14  ;;  %5485 = vmatpush1.bf16.msra.mxu1 %v7367_v15  ;;  %v7406_v46 = vld [vmem:[%s11224_s1 + $0x14c] ss:$16 sps:$4 sm:$0xff]   ;;  %v7408_v47 = vld [vmem:[%s11224_s1 + $0x140] ss:$16 sps:$4 sm:$0xff]   ;;  %v7409_v48 = vld [vmem:[%s11224_s1 + $0x148] ss:$16 sps:$4 sm:$0xff]  }
  0x10   :  { %4953 = vmatprep.subr.bf16.mxu0 %v7368_v16  ;;  %5486 = vmatprep.subr.bf16.mxu1 %v7370_v17  ;;  %v8749_v49 = vsub.s32 %v839_v43, %v8731_v42  ;;  %v7410_v50 = vld [vmem:[%s11224_s1 + $0x164] ss:$16 sps:$4 sm:$0xff]   ;;  %v7412_v51 = vld [vmem:[%s11224_s1 + $0x16c] ss:$16 sps:$4 sm:$0xff]   ;;  %v7414_v53 = vld [vmem:[%s11224_s1 + $0x160] ss:$16 sps:$4 sm:$0xff]  }
  0x11   :  { %v8760_v52 = vld [vmem:[%s11223_s0] sm:$0xff]  ;;  %v7415_v55 = vld [vmem:[%s11224_s1 + $0x168] ss:$16 sps:$4 sm:$0xff]   ;;  %v7418_v57 = vld [vmem:[%s11224_s1 + $0x18c] ss:$16 sps:$4 sm:$0xff]  }
  0x12   :  { %v843_v54 = vrot.slane %v8760_v52, %v8749_v49  ;;  %v7416_v56 = vld [vmem:[%s11224_s1 + $0x184] ss:$16 sps:$4 sm:$0xff]   ;;  %v7420_v59 = vld [vmem:[%s11224_s1 + $0x180] ss:$16 sps:$4 sm:$0xff]   ;;  %v7421_v61 = vld [vmem:[%s11224_s1 + $0x188] ss:$16 sps:$4 sm:$0xff]  }
  0x13   :  { %4954 = vmatpush1.bf16.msra.mxu0 %v7372_v18  ;;  %5487 = vmatpush1.bf16.msra.mxu1 %v7373_v19  ;;  %v7422_v62 = vld [vmem:[%s11224_s1 + $0x1a4] ss:$16 sps:$4 sm:$0xff]   ;;  %v7424_v63 = vld [vmem:[%s11224_s1 + $0x1ac] ss:$16 sps:$4 sm:$0xff]   ;;  %v7426_v0 = vld [vmem:[%s11224_s1 + $0x1a0] ss:$16 sps:$4 sm:$0xff]  }
  0x14   :  { %4955 = vmatprep.subr.bf16.mxu0 %v7374_v20  ;;  %5488 = vmatprep.subr.bf16.mxu1 %v7376_v21  ;;  %v851_v58 = vcombine.high %v843_v54, %v843_v54  ;;  %v7427_v1 = vld [vmem:[%s11224_s1 + $0x1a8] ss:$16 sps:$4 sm:$0xff]   ;;  %v7428_v2 = vld [vmem:[%s11224_s1 + $0x1c4] ss:$16 sps:$4 sm:$0xff]   ;;  %v7430_v3 = vld [vmem:[%s11224_s1 + $0x1cc] ss:$16 sps:$4 sm:$0xff]   ;;  %v8829_v13 = vrot.slane %v843_v54, %v8749_v49 }
  0x15   :  { %v7432_v4 = vld [vmem:[%s11224_s1 + $0x1c0] ss:$16 sps:$4 sm:$0xff]   ;;  %v7433_v5 = vld [vmem:[%s11224_s1 + $0x1c8] ss:$16 sps:$4 sm:$0xff]   ;;  %v7434_v6 = vld [vmem:[%s11224_s1 + $0x1e4] ss:$16 sps:$4 sm:$0xff]  }
  0x16   :  { %v873_v60 = vrot.slane %v851_v58, %v8749_v49  ;;  %v7436_v7 = vld [vmem:[%s11224_s1 + $0x1ec] ss:$16 sps:$4 sm:$0xff]   ;;  %v7438_v8 = vld [vmem:[%s11224_s1 + $0x1e0] ss:$16 sps:$4 sm:$0xff]   ;;  %v7439_v9 = vld [vmem:[%s11224_s1 + $0x1e8] ss:$16 sps:$4 sm:$0xff]  }
  0x17   :  { %4956 = vmatpush1.bf16.msra.mxu0 %v7378_v22  ;;  %5489 = vmatpush1.bf16.msra.mxu1 %v7379_v23  ;;  %v7442_v10 = vld [vmem:[%s11224_s1 + $0x204] ss:$16 sps:$4 sm:$0xff]   ;;  %v7445_v11 = vld [vmem:[%s11224_s1 + $0x20c] ss:$16 sps:$4 sm:$0xff]   ;;  %v7440_v12 = vld [vmem:[%s11224_s1 + $0x200] ss:$16 sps:$4 sm:$0xff]  }
  0x18   :  { %4957 = vmatprep.subr.bf16.mxu0 %v7380_v24  ;;  %5490 = vmatprep.subr.bf16.mxu1 %v7382_v25  ;;  %v7443_v14 = vld [vmem:[%s11224_s1 + $0x208] ss:$16 sps:$4 sm:$0xff]   ;;  %v7448_v15 = vld [vmem:[%s11224_s1 + $0x224] ss:$16 sps:$4 sm:$0xff]   ;;  %v7451_v16 = vld [vmem:[%s11224_s1 + $0x22c] ss:$16 sps:$4 sm:$0xff]   ;;  %v883_v17 = vcombine.high %v873_v60, %v873_v60 }
  0x19   :  { %4977 = vmatprep.mubr.bf16.mxu0 %v873_v60  ;;  %5510 = vmatprep.mubr.bf16.mxu1 %v873_v60  ;;  %v7446_v18 = vld [vmem:[%s11224_s1 + $0x220] ss:$16 sps:$4 sm:$0xff]   ;;  %v7449_v19 = vld [vmem:[%s11224_s1 + $0x228] ss:$16 sps:$4 sm:$0xff]   ;;  %v7454_v20 = vld [vmem:[%s11224_s1 + $0x244] ss:$16 sps:$4 sm:$0xff]  }
  0x1a   :  { %v7457_v21 = vld [vmem:[%s11224_s1 + $0x24c] ss:$16 sps:$4 sm:$0xff]   ;;  %v7452_v22 = vld [vmem:[%s11224_s1 + $0x240] ss:$16 sps:$4 sm:$0xff]   ;;  %v7455_v23 = vld [vmem:[%s11224_s1 + $0x248] ss:$16 sps:$4 sm:$0xff]  }
  0x1b   :  { %4958 = vmatpush1.bf16.msra.mxu0 %v7384_v26  ;;  %5491 = vmatpush1.bf16.msra.mxu1 %v7385_v27  ;;  %v7460_v24 = vld [vmem:[%s11224_s1 + $0x264] ss:$16 sps:$4 sm:$0xff]   ;;  %v7463_v25 = vld [vmem:[%s11224_s1 + $0x26c] ss:$16 sps:$4 sm:$0xff]   ;;  %v7458_v26 = vld [vmem:[%s11224_s1 + $0x260] ss:$16 sps:$4 sm:$0xff]  }
  0x1c   :  { %4959 = vmatprep.subr.bf16.mxu0 %v7386_v28  ;;  %5492 = vmatprep.subr.bf16.mxu1 %v7388_v29  ;;  %v7461_v27 = vld [vmem:[%s11224_s1 + $0x268] ss:$16 sps:$4 sm:$0xff]   ;;  %v7466_v28 = vld [vmem:[%s11224_s1 + $0x284] ss:$16 sps:$4 sm:$0xff]   ;;  %v7469_v29 = vld [vmem:[%s11224_s1 + $0x28c] ss:$16 sps:$4 sm:$0xff]  }
  0x1d   :  { %v7478_v36 = vld [vmem:[%s11224_s1 + $0x2c4] ss:$16 sps:$4 sm:$0xff]   ;;  %v7481_v37 = vld [vmem:[%s11224_s1 + $0x2cc] ss:$16 sps:$4 sm:$0xff]   ;;  %v7476_v38 = vld [vmem:[%s11224_s1 + $0x2c0] ss:$16 sps:$4 sm:$0xff]  }
  0x1e   :  { %v7482_v43 = vld [vmem:[%s11224_s1 + $0x2e0] ss:$16 sps:$4 sm:$0xff]   ;;  %v7497_v54 = vld [vmem:[%s11224_s1 + $0x328] ss:$16 sps:$4 sm:$0xff]   ;;  %v7511_v60 = vld [vmem:[%s11224_s1 + $0x36c] ss:$16 sps:$4 sm:$0xff]  }
  0x1f   :  { %4960 = vmatpush1.bf16.msra.mxu0 %v7390_v30  ;;  %5493 = vmatpush1.bf16.msra.mxu1 %v7391_v31  ;;  %v7464_v30 = vld [vmem:[%s11224_s1 + $0x280] ss:$16 sps:$4 sm:$0xff]   ;;  %v7467_v31 = vld [vmem:[%s11224_s1 + $0x288] ss:$16 sps:$4 sm:$0xff]  }
  0x20   :  { %4961 = vmatprep.subr.bf16.mxu0 %v7392_v32  ;;  %5494 = vmatprep.subr.bf16.mxu1 %v7394_v33  ;;  %v7472_v32 = vld [vmem:[%s11224_s1 + $0x2a4] ss:$16 sps:$4 sm:$0xff]   ;;  %v7475_v33 = vld [vmem:[%s11224_s1 + $0x2ac] ss:$16 sps:$4 sm:$0xff]   ;;  %v7503_v58 = vld [vmem:[%s11224_s1 + $0x348] ss:$16 sps:$4 sm:$0xff]  }
  0x23   :  { %4962 = vmatpush1.bf16.msra.mxu0 %v7396_v34  ;;  %5495 = vmatpush1.bf16.msra.mxu1 %v7397_v35  ;;  %v7470_v34 = vld [vmem:[%s11224_s1 + $0x2a0] ss:$16 sps:$4 sm:$0xff]   ;;  %v7473_v35 = vld [vmem:[%s11224_s1 + $0x2a8] ss:$16 sps:$4 sm:$0xff]  }
  0x24   :  { %4963 = vmatprep.subr.bf16.mxu0 %v7398_v39  ;;  %5496 = vmatprep.subr.bf16.mxu1 %v7400_v40  ;;  %v7479_v39 = vld [vmem:[%s11224_s1 + $0x2c8] ss:$16 sps:$4 sm:$0xff]   ;;  %v7484_v40 = vld [vmem:[%s11224_s1 + $0x2e4] ss:$16 sps:$4 sm:$0xff]  }
  0x27   :  { %4964 = vmatpush1.bf16.msra.mxu0 %v7402_v41  ;;  %5497 = vmatpush1.bf16.msra.mxu1 %v7403_v44  ;;  %v7487_v41 = vld [vmem:[%s11224_s1 + $0x2ec] ss:$16 sps:$4 sm:$0xff]   ;;  %v7485_v44 = vld [vmem:[%s11224_s1 + $0x2e8] ss:$16 sps:$4 sm:$0xff]  }
  0x28   :  { %4965 = vmatprep.subr.bf16.mxu0 %v7404_v45  ;;  %5498 = vmatprep.subr.bf16.mxu1 %v7406_v46  ;;  %v7490_v45 = vld [vmem:[%s11224_s1 + $0x304] ss:$16 sps:$4 sm:$0xff]   ;;  %v7493_v46 = vld [vmem:[%s11224_s1 + $0x30c] ss:$16 sps:$4 sm:$0xff]  }
  0x2b   :  { %4966 = vmatpush1.bf16.msra.mxu0 %v7408_v47  ;;  %5499 = vmatpush1.bf16.msra.mxu1 %v7409_v48  ;;  %v7488_v47 = vld [vmem:[%s11224_s1 + $0x300] ss:$16 sps:$4 sm:$0xff]   ;;  %v7491_v48 = vld [vmem:[%s11224_s1 + $0x308] ss:$16 sps:$4 sm:$0xff]  }
  0x2c   :  { %4967 = vmatprep.subr.bf16.mxu0 %v7410_v50  ;;  %5500 = vmatprep.subr.bf16.mxu1 %v7412_v51  ;;  %v7496_v50 = vld [vmem:[%s11224_s1 + $0x324] ss:$16 sps:$4 sm:$0xff]   ;;  %v7499_v51 = vld [vmem:[%s11224_s1 + $0x32c] ss:$16 sps:$4 sm:$0xff]  }
  0x2f   :  { %4968 = vmatpush1.bf16.msra.mxu0 %v7414_v53  ;;  %5501 = vmatpush1.bf16.msra.mxu1 %v7415_v55  ;;  %v7494_v53 = vld [vmem:[%s11224_s1 + $0x320] ss:$16 sps:$4 sm:$0xff]   ;;  %v7502_v55 = vld [vmem:[%s11224_s1 + $0x344] ss:$16 sps:$4 sm:$0xff]  }
  0x30   :  { %4969 = vmatprep.subr.bf16.mxu0 %v7416_v56  ;;  %5502 = vmatprep.subr.bf16.mxu1 %v7418_v57  ;;  %v7505_v56 = vld [vmem:[%s11224_s1 + $0x34c] ss:$16 sps:$4 sm:$0xff]   ;;  %v7500_v57 = vld [vmem:[%s11224_s1 + $0x340] ss:$16 sps:$4 sm:$0xff]  }
  0x33   :  { %4970 = vmatpush1.bf16.msra.mxu0 %v7420_v59  ;;  %5503 = vmatpush1.bf16.msra.mxu1 %v7421_v61  ;;  %v7508_v59 = vld [vmem:[%s11224_s1 + $0x364] ss:$16 sps:$4 sm:$0xff]   ;;  %v7506_v61 = vld [vmem:[%s11224_s1 + $0x360] ss:$16 sps:$4 sm:$0xff]  }
  0x34   :  { %4971 = vmatprep.subr.bf16.mxu0 %v7422_v62  ;;  %5504 = vmatprep.subr.bf16.mxu1 %v7424_v63  ;;  %v7509_v62 = vld [vmem:[%s11224_s1 + $0x368] ss:$16 sps:$4 sm:$0xff]   ;;  %v7514_v63 = vld [vmem:[%s11224_s1 + $0x384] ss:$16 sps:$4 sm:$0xff]  }
  0x37   :  { %4972 = vmatpush1.bf16.msra.mxu0 %v7426_v0  ;;  %5505 = vmatpush1.bf16.msra.mxu1 %v7427_v1  ;;  %v7517_v0 = vld [vmem:[%s11224_s1 + $0x38c] ss:$16 sps:$4 sm:$0xff]   ;;  %v7512_v1 = vld [vmem:[%s11224_s1 + $0x380] ss:$16 sps:$4 sm:$0xff]  }
  0x38   :  { %4973 = vmatprep.subr.bf16.mxu0 %v7428_v2  ;;  %5506 = vmatprep.subr.bf16.mxu1 %v7430_v3  ;;  %v7515_v2 = vld [vmem:[%s11224_s1 + $0x388] ss:$16 sps:$4 sm:$0xff]   ;;  %v7520_v3 = vld [vmem:[%s11224_s1 + $0x3a4] ss:$16 sps:$4 sm:$0xff]  }
  0x3b   :  { %4974 = vmatpush1.bf16.msra.mxu0 %v7432_v4  ;;  %5507 = vmatpush1.bf16.msra.mxu1 %v7433_v5  ;;  %v7523_v4 = vld [vmem:[%s11224_s1 + $0x3ac] ss:$16 sps:$4 sm:$0xff]   ;;  %v7518_v5 = vld [vmem:[%s11224_s1 + $0x3a0] ss:$16 sps:$4 sm:$0xff]  }
  0x3c   :  { %4975 = vmatprep.subr.bf16.mxu0 %v7434_v6  ;;  %5508 = vmatprep.subr.bf16.mxu1 %v7436_v7  ;;  %v7521_v6 = vld [vmem:[%s11224_s1 + $0x3a8] ss:$16 sps:$4 sm:$0xff]   ;;  %v7526_v7 = vld [vmem:[%s11224_s1 + $0x3c4] ss:$16 sps:$4 sm:$0xff]  }
  0x3f   :  { %4976 = vmatpush1.bf16.msra.mxu0 %v7438_v8  ;;  %5509 = vmatpush1.bf16.msra.mxu1 %v7439_v9  ;;  %v7529_v8 = vld [vmem:[%s11224_s1 + $0x3cc] ss:$16 sps:$4 sm:$0xff]   ;;  %v836_v9 = vcombine.high %v8760_v52, %v8760_v52 }
  0x40   :  { %4986 = vmatprep.subr.bf16.mxu0 %v7442_v10  ;;  %5519 = vmatprep.subr.bf16.mxu1 %v7445_v11  ;;  %v7524_v10 = vld [vmem:[%s11224_s1 + $0x3c0] ss:$16 sps:$4 sm:$0xff]   ;;  %v7527_v11 = vld [vmem:[%s11224_s1 + $0x3c8] ss:$16 sps:$4 sm:$0xff]   ;;  %v7535_v52 = vld [vmem:[%s11224_s1 + $0x3ec] ss:$16 sps:$4 sm:$0xff]  }
  0x42   :  { %4978 = vmatmul.mubr.bf16.vlgmr.msra.gmra.mrb[0].mxu0 %v8829_v13  ;;  %5511 = vmatmul.mubr.bf16.vlgmr.msra.gmra.mrb[0].mxu1 %v8829_v13 }
  0x43   :  { %4987 = vmatpush1.bf16.msra.mxu0 %v7440_v12  ;;  %5520 = vmatpush1.bf16.msra.mxu1 %v7443_v14  ;;  %v7532_v12 = vld [vmem:[%s11224_s1 + $0x3e4] ss:$16 sps:$4 sm:$0xff]   ;;  %v9013_v14 = vrot.slane %v836_v9, %v8749_v49  ;;  %v7611_v9 = vld [vmem:[%s11224_s1 + $0x588] ss:$16 sps:$4 sm:$0xff]  }
  0x44   :  { %4988 = vmatprep.subr.bf16.mxu0 %v7448_v15  ;;  %5521 = vmatprep.subr.bf16.mxu1 %v7451_v16  ;;  %v7530_v15 = vld [vmem:[%s11224_s1 + $0x3e0] ss:$16 sps:$4 sm:$0xff]   ;;  %v7533_v16 = vld [vmem:[%s11224_s1 + $0x3e8] ss:$16 sps:$4 sm:$0xff]  }
  0x45   :  { %5018 = vmatprep.mubr.bf16.mxu0 %v883_v17  ;;  %5551 = vmatprep.mubr.bf16.mxu1 %v883_v17  ;;  %v7538_v17 = vld [vmem:[%s11224_s1 + $0x404] ss:$16 sps:$4 sm:$0xff]  }
  0x47   :  { %4989 = vmatpush1.bf16.msra.mxu0 %v7446_v18  ;;  %5522 = vmatpush1.bf16.msra.mxu1 %v7449_v19  ;;  %v7541_v18 = vld [vmem:[%s11224_s1 + $0x40c] ss:$16 sps:$4 sm:$0xff]   ;;  %v852_v19 = vcombine.high %v9013_v14, %v9013_v14 }
  0x48   :  { %4990 = vmatprep.subr.bf16.mxu0 %v7454_v20  ;;  %5523 = vmatprep.subr.bf16.mxu1 %v7457_v21  ;;  %v7536_v20 = vld [vmem:[%s11224_s1 + $0x400] ss:$16 sps:$4 sm:$0xff]   ;;  %v881_v21 = vcombine.high %v8829_v13, %v8829_v13 }
  0x49   :  { %v7542_v13 = vld [vmem:[%s11224_s1 + $0x420] ss:$16 sps:$4 sm:$0xff]  }
  0x4b   :  { %4991 = vmatpush1.bf16.msra.mxu0 %v7452_v22  ;;  %5524 = vmatpush1.bf16.msra.mxu1 %v7455_v23  ;;  %v7539_v22 = vld [vmem:[%s11224_s1 + $0x408] ss:$16 sps:$4 sm:$0xff]   ;;  %v7544_v23 = vld [vmem:[%s11224_s1 + $0x424] ss:$16 sps:$4 sm:$0xff]  }
  0x4c   :  { %4992 = vmatprep.subr.bf16.mxu0 %v7460_v24  ;;  %5525 = vmatprep.subr.bf16.mxu1 %v7463_v25  ;;  %v7547_v24 = vld [vmem:[%s11224_s1 + $0x42c] ss:$16 sps:$4 sm:$0xff]   ;;  %v9044_v25 = vrot.slane %v852_v19, %v8749_v49  ;;  %v7628_v19 = vld [vmem:[%s11224_s1 + $0x5e4] ss:$16 sps:$4 sm:$0xff]  }
  0x4f   :  { %4993 = vmatpush1.bf16.msra.mxu0 %v7458_v26  ;;  %5526 = vmatpush1.bf16.msra.mxu1 %v7461_v27  ;;  %v7545_v26 = vld [vmem:[%s11224_s1 + $0x428] ss:$16 sps:$4 sm:$0xff]   ;;  %v7550_v27 = vld [vmem:[%s11224_s1 + $0x444] ss:$16 sps:$4 sm:$0xff]  }
  0x50   :  { %4994 = vmatprep.subr.bf16.mxu0 %v7466_v28  ;;  %5527 = vmatprep.subr.bf16.mxu1 %v7469_v29  ;;  %v7553_v28 = vld [vmem:[%s11224_s1 + $0x44c] ss:$16 sps:$4 sm:$0xff]   ;;  %v7548_v29 = vld [vmem:[%s11224_s1 + $0x440] ss:$16 sps:$4 sm:$0xff]  }
  0x53   :  { %4995 = vmatpush1.bf16.msra.mxu0 %v7464_v30  ;;  %5528 = vmatpush1.bf16.msra.mxu1 %v7467_v31  ;;  %v7551_v30 = vld [vmem:[%s11224_s1 + $0x448] ss:$16 sps:$4 sm:$0xff]   ;;  %v7556_v31 = vld [vmem:[%s11224_s1 + $0x464] ss:$16 sps:$4 sm:$0xff]  }
  0x54   :  { %4996 = vmatprep.subr.bf16.mxu0 %v7472_v32  ;;  %5529 = vmatprep.subr.bf16.mxu1 %v7475_v33  ;;  %v7559_v32 = vld [vmem:[%s11224_s1 + $0x46c] ss:$16 sps:$4 sm:$0xff]   ;;  %v7554_v33 = vld [vmem:[%s11224_s1 + $0x460] ss:$16 sps:$4 sm:$0xff]  }
  0x57   :  { %4997 = vmatpush1.bf16.msra.mxu0 %v7470_v34  ;;  %5530 = vmatpush1.bf16.msra.mxu1 %v7473_v35  ;;  %v7557_v34 = vld [vmem:[%s11224_s1 + $0x468] ss:$16 sps:$4 sm:$0xff]   ;;  %v7562_v35 = vld [vmem:[%s11224_s1 + $0x484] ss:$16 sps:$4 sm:$0xff]  }
  0x58   :  { %4998 = vmatprep.subr.bf16.mxu0 %v7478_v36  ;;  %5531 = vmatprep.subr.bf16.mxu1 %v7481_v37  ;;  %v7565_v36 = vld [vmem:[%s11224_s1 + $0x48c] ss:$16 sps:$4 sm:$0xff]   ;;  %v7560_v37 = vld [vmem:[%s11224_s1 + $0x480] ss:$16 sps:$4 sm:$0xff]  }
  0x5b   :  { %4999 = vmatpush1.bf16.msra.mxu0 %v7476_v38  ;;  %5532 = vmatpush1.bf16.msra.mxu1 %v7479_v39  ;;  %v7563_v38 = vld [vmem:[%s11224_s1 + $0x488] ss:$16 sps:$4 sm:$0xff]   ;;  %v7568_v39 = vld [vmem:[%s11224_s1 + $0x4a4] ss:$16 sps:$4 sm:$0xff]  }
  0x5c   :  { %5000 = vmatprep.subr.bf16.mxu0 %v7484_v40  ;;  %5533 = vmatprep.subr.bf16.mxu1 %v7487_v41  ;;  %v7571_v40 = vld [vmem:[%s11224_s1 + $0x4ac] ss:$16 sps:$4 sm:$0xff]   ;;  %v7566_v41 = vld [vmem:[%s11224_s1 + $0x4a0] ss:$16 sps:$4 sm:$0xff]  }
  0x5f   :  { %5001 = vmatpush1.bf16.msra.mxu0 %v7482_v43  ;;  %5534 = vmatpush1.bf16.msra.mxu1 %v7485_v44  ;;  %v7569_v43 = vld [vmem:[%s11224_s1 + $0x4a8] ss:$16 sps:$4 sm:$0xff]   ;;  %v7574_v44 = vld [vmem:[%s11224_s1 + $0x4c4] ss:$16 sps:$4 sm:$0xff]  }
  0x60   :  { %5002 = vmatprep.subr.bf16.mxu0 %v7490_v45  ;;  %5535 = vmatprep.subr.bf16.mxu1 %v7493_v46  ;;  %v7577_v45 = vld [vmem:[%s11224_s1 + $0x4cc] ss:$16 sps:$4 sm:$0xff]   ;;  %v7572_v46 = vld [vmem:[%s11224_s1 + $0x4c0] ss:$16 sps:$4 sm:$0xff]  }
  0x63   :  { %5003 = vmatpush1.bf16.msra.mxu0 %v7488_v47  ;;  %5536 = vmatpush1.bf16.msra.mxu1 %v7491_v48  ;;  %v7575_v47 = vld [vmem:[%s11224_s1 + $0x4c8] ss:$16 sps:$4 sm:$0xff]   ;;  %v7580_v48 = vld [vmem:[%s11224_s1 + $0x4e4] ss:$16 sps:$4 sm:$0xff]  }
  0x64   :  { %5004 = vmatprep.subr.bf16.mxu0 %v7496_v50  ;;  %5537 = vmatprep.subr.bf16.mxu1 %v7499_v51  ;;  %v7583_v50 = vld [vmem:[%s11224_s1 + $0x4ec] ss:$16 sps:$4 sm:$0xff]   ;;  %v7578_v51 = vld [vmem:[%s11224_s1 + $0x4e0] ss:$16 sps:$4 sm:$0xff]  }
  0x67   :  { %5005 = vmatpush1.bf16.msra.mxu0 %v7494_v53  ;;  %5538 = vmatpush1.bf16.msra.mxu1 %v7497_v54  ;;  %v7581_v53 = vld [vmem:[%s11224_s1 + $0x4e8] ss:$16 sps:$4 sm:$0xff]   ;;  %v7586_v54 = vld [vmem:[%s11224_s1 + $0x504] ss:$16 sps:$4 sm:$0xff]  }
  0x68   :  { %5006 = vmatprep.subr.bf16.mxu0 %v7502_v55  ;;  %5539 = vmatprep.subr.bf16.mxu1 %v7505_v56  ;;  %v7589_v55 = vld [vmem:[%s11224_s1 + $0x50c] ss:$16 sps:$4 sm:$0xff]   ;;  %v7584_v56 = vld [vmem:[%s11224_s1 + $0x500] ss:$16 sps:$4 sm:$0xff]  }
  0x6b   :  { %5007 = vmatpush1.bf16.msra.mxu0 %v7500_v57  ;;  %5540 = vmatpush1.bf16.msra.mxu1 %v7503_v58  ;;  %v7587_v57 = vld [vmem:[%s11224_s1 + $0x508] ss:$16 sps:$4 sm:$0xff]   ;;  %v7592_v58 = vld [vmem:[%s11224_s1 + $0x524] ss:$16 sps:$4 sm:$0xff]  }
  0x6c   :  { %5008 = vmatprep.subr.bf16.mxu0 %v7508_v59  ;;  %5541 = vmatprep.subr.bf16.mxu1 %v7511_v60  ;;  %v7595_v59 = vld [vmem:[%s11224_s1 + $0x52c] ss:$16 sps:$4 sm:$0xff]   ;;  %v7590_v60 = vld [vmem:[%s11224_s1 + $0x520] ss:$16 sps:$4 sm:$0xff]  }
  0x6f   :  { %5009 = vmatpush1.bf16.msra.mxu0 %v7506_v61  ;;  %5542 = vmatpush1.bf16.msra.mxu1 %v7509_v62  ;;  %v7593_v61 = vld [vmem:[%s11224_s1 + $0x528] ss:$16 sps:$4 sm:$0xff]   ;;  %v7598_v62 = vld [vmem:[%s11224_s1 + $0x544] ss:$16 sps:$4 sm:$0xff]  }
  0x70   :  { %5010 = vmatprep.subr.bf16.mxu0 %v7514_v63  ;;  %5543 = vmatprep.subr.bf16.mxu1 %v7517_v0  ;;  %v7601_v63 = vld [vmem:[%s11224_s1 + $0x54c] ss:$16 sps:$4 sm:$0xff]   ;;  %v7596_v0 = vld [vmem:[%s11224_s1 + $0x540] ss:$16 sps:$4 sm:$0xff]  }
  0x73   :  { %5011 = vmatpush1.bf16.msra.mxu0 %v7512_v1  ;;  %5544 = vmatpush1.bf16.msra.mxu1 %v7515_v2  ;;  %v7599_v1 = vld [vmem:[%s11224_s1 + $0x548] ss:$16 sps:$4 sm:$0xff]   ;;  %v7604_v2 = vld [vmem:[%s11224_s1 + $0x564] ss:$16 sps:$4 sm:$0xff]  }
  0x74   :  { %5012 = vmatprep.subr.bf16.mxu0 %v7520_v3  ;;  %5545 = vmatprep.subr.bf16.mxu1 %v7523_v4  ;;  %v7607_v3 = vld [vmem:[%s11224_s1 + $0x56c] ss:$16 sps:$4 sm:$0xff]   ;;  %v7602_v4 = vld [vmem:[%s11224_s1 + $0x560] ss:$16 sps:$4 sm:$0xff]  }
  0x77   :  { %5013 = vmatpush1.bf16.msra.mxu0 %v7518_v5  ;;  %5546 = vmatpush1.bf16.msra.mxu1 %v7521_v6  ;;  %v7605_v5 = vld [vmem:[%s11224_s1 + $0x568] ss:$16 sps:$4 sm:$0xff]   ;;  %v7610_v6 = vld [vmem:[%s11224_s1 + $0x584] ss:$16 sps:$4 sm:$0xff]  }
  0x78   :  { %5014 = vmatprep.subr.bf16.mxu0 %v7526_v7  ;;  %5547 = vmatprep.subr.bf16.mxu1 %v7529_v8  ;;  %v7613_v7 = vld [vmem:[%s11224_s1 + $0x58c] ss:$16 sps:$4 sm:$0xff]   ;;  %v7608_v8 = vld [vmem:[%s11224_s1 + $0x580] ss:$16 sps:$4 sm:$0xff]  }
  0x7b   :  { %5015 = vmatpush1.bf16.msra.mxu0 %v7524_v10  ;;  %5548 = vmatpush1.bf16.msra.mxu1 %v7527_v11  ;;  %v7616_v10 = vld [vmem:[%s11224_s1 + $0x5a4] ss:$16 sps:$4 sm:$0xff]   ;;  %v7619_v11 = vld [vmem:[%s11224_s1 + $0x5ac] ss:$16 sps:$4 sm:$0xff]  }
  0x7c   :  { %5016 = vmatprep.subr.bf16.mxu0 %v7532_v12  ;;  %5549 = vmatprep.subr.bf16.mxu1 %v7535_v52  ;;  %v7614_v12 = vld [vmem:[%s11224_s1 + $0x5a0] ss:$16 sps:$4 sm:$0xff]   ;;  %v7617_v52 = vld [vmem:[%s11224_s1 + $0x5a8] ss:$16 sps:$4 sm:$0xff]  }
  0x7f   :  { %5017 = vmatpush1.bf16.msra.mxu0 %v7530_v15  ;;  %5550 = vmatpush1.bf16.msra.mxu1 %v7533_v16  ;;  %v7622_v15 = vld [vmem:[%s11224_s1 + $0x5c4] ss:$16 sps:$4 sm:$0xff]   ;;  %v7625_v16 = vld [vmem:[%s11224_s1 + $0x5cc] ss:$16 sps:$4 sm:$0xff]  }
  0x80   :  { %5027 = vmatprep.subr.bf16.mxu0 %v7538_v17  ;;  %5560 = vmatprep.subr.bf16.mxu1 %v7541_v18  ;;  %v7620_v17 = vld [vmem:[%s11224_s1 + $0x5c0] ss:$16 sps:$4 sm:$0xff]   ;;  %v7623_v18 = vld [vmem:[%s11224_s1 + $0x5c8] ss:$16 sps:$4 sm:$0xff]  }
  0x82   :  { %5019 = vmatmul.mubr.bf16.vlgmr.msra.gmra.mrb[0].mxu0 %v881_v21  ;;  %5552 = vmatmul.mubr.bf16.vlgmr.msra.gmra.mrb[0].mxu1 %v881_v21  ;;  %v7626_v21 = vld [vmem:[%s11224_s1 + $0x5e0] ss:$16 sps:$4 sm:$0xff]  }
  0x83   :  { %5028 = vmatpush1.bf16.msra.mxu0 %v7536_v20  ;;  %5561 = vmatpush1.bf16.msra.mxu1 %v7539_v22  ;;  %v7631_v20 = vld [vmem:[%s11224_s1 + $0x5ec] ss:$16 sps:$4 sm:$0xff]   ;;  %v7629_v22 = vld [vmem:[%s11224_s1 + $0x5e8] ss:$16 sps:$4 sm:$0xff]  }
  0x84   :  { %5029 = vmatprep.subr.bf16.mxu0 %v7544_v23  ;;  %5562 = vmatprep.subr.bf16.mxu1 %v7547_v24  ;;  %v7635_v23 = vld [vmem:[%s11224_s1 + $0x604] ss:$16 sps:$4 sm:$0xff]   ;;  %v7638_v24 = vld [vmem:[%s11224_s1 + $0x60c] ss:$16 sps:$4 sm:$0xff]  }
  0x85   :  { %5059 = vmatprep.mubr.bf16.mxu0 %v9044_v25  ;;  %5592 = vmatprep.mubr.bf16.mxu1 %v9044_v25 }
  0x87   :  { %5030 = vmatpush1.bf16.msra.mxu0 %v7542_v13  ;;  %5563 = vmatpush1.bf16.msra.mxu1 %v7545_v26  ;;  %v7633_v13 = vld [vmem:[%s11224_s1 + $0x600] ss:$16 sps:$4 sm:$0xff]   ;;  %v9233_v26 = vrot.slane %v9013_v14, %v8749_v49  ;;  %v884_v14 = vcombine.high %v9044_v25, %v9044_v25  ;;  %v7647_v25 = vld [vmem:[%s11224_s1 + $0x644] ss:$16 sps:$4 sm:$0xff]  }
  0x88   :  { %5031 = vmatprep.subr.bf16.mxu0 %v7550_v27  ;;  %5564 = vmatprep.subr.bf16.mxu1 %v7553_v28  ;;  %v7636_v27 = vld [vmem:[%s11224_s1 + $0x608] ss:$16 sps:$4 sm:$0xff]   ;;  %v7641_v28 = vld [vmem:[%s11224_s1 + $0x624] ss:$16 sps:$4 sm:$0xff]  }
  0x8b   :  { %5032 = vmatpush1.bf16.msra.mxu0 %v7548_v29  ;;  %5565 = vmatpush1.bf16.msra.mxu1 %v7551_v30  ;;  %v7644_v29 = vld [vmem:[%s11224_s1 + $0x62c] ss:$16 sps:$4 sm:$0xff]   ;;  %v7639_v30 = vld [vmem:[%s11224_s1 + $0x620] ss:$16 sps:$4 sm:$0xff]  }
  0x8c   :  { %5033 = vmatprep.subr.bf16.mxu0 %v7556_v31  ;;  %5566 = vmatprep.subr.bf16.mxu1 %v7559_v32  ;;  %v7642_v31 = vld [vmem:[%s11224_s1 + $0x628] ss:$16 sps:$4 sm:$0xff]   ;;  %v7650_v32 = vld [vmem:[%s11224_s1 + $0x64c] ss:$16 sps:$4 sm:$0xff]  }
  0x8f   :  { %5034 = vmatpush1.bf16.msra.mxu0 %v7554_v33  ;;  %5567 = vmatpush1.bf16.msra.mxu1 %v7557_v34  ;;  %v7645_v33 = vld [vmem:[%s11224_s1 + $0x640] ss:$16 sps:$4 sm:$0xff]   ;;  %v7648_v34 = vld [vmem:[%s11224_s1 + $0x648] ss:$16 sps:$4 sm:$0xff]  }
  0x90   :  { %5035 = vmatprep.subr.bf16.mxu0 %v7562_v35  ;;  %5568 = vmatprep.subr.bf16.mxu1 %v7565_v36  ;;  %v7653_v35 = vld [vmem:[%s11224_s1 + $0x664] ss:$16 sps:$4 sm:$0xff]   ;;  %v7656_v36 = vld [vmem:[%s11224_s1 + $0x66c] ss:$16 sps:$4 sm:$0xff]  }
  0x93   :  { %5036 = vmatpush1.bf16.msra.mxu0 %v7560_v37  ;;  %5569 = vmatpush1.bf16.msra.mxu1 %v7563_v38  ;;  %v7651_v37 = vld [vmem:[%s11224_s1 + $0x660] ss:$16 sps:$4 sm:$0xff]   ;;  %v7654_v38 = vld [vmem:[%s11224_s1 + $0x668] ss:$16 sps:$4 sm:$0xff]  }
  0x94   :  { %5037 = vmatprep.subr.bf16.mxu0 %v7568_v39  ;;  %5570 = vmatprep.subr.bf16.mxu1 %v7571_v40  ;;  %v7659_v39 = vld [vmem:[%s11224_s1 + $0x684] ss:$16 sps:$4 sm:$0xff]   ;;  %v7662_v40 = vld [vmem:[%s11224_s1 + $0x68c] ss:$16 sps:$4 sm:$0xff]  }
  0x97   :  { %5038 = vmatpush1.bf16.msra.mxu0 %v7566_v41  ;;  %5571 = vmatpush1.bf16.msra.mxu1 %v7569_v43  ;;  %v7657_v41 = vld [vmem:[%s11224_s1 + $0x680] ss:$16 sps:$4 sm:$0xff]   ;;  %v7660_v43 = vld [vmem:[%s11224_s1 + $0x688] ss:$16 sps:$4 sm:$0xff]  }
  0x98   :  { %5039 = vmatprep.subr.bf16.mxu0 %v7574_v44  ;;  %5572 = vmatprep.subr.bf16.mxu1 %v7577_v45  ;;  %v7665_v44 = vld [vmem:[%s11224_s1 + $0x6a4] ss:$16 sps:$4 sm:$0xff]   ;;  %v7668_v45 = vld [vmem:[%s11224_s1 + $0x6ac] ss:$16 sps:$4 sm:$0xff]  }
  0x9b   :  { %5040 = vmatpush1.bf16.msra.mxu0 %v7572_v46  ;;  %5573 = vmatpush1.bf16.msra.mxu1 %v7575_v47  ;;  %v7663_v46 = vld [vmem:[%s11224_s1 + $0x6a0] ss:$16 sps:$4 sm:$0xff]   ;;  %v7666_v47 = vld [vmem:[%s11224_s1 + $0x6a8] ss:$16 sps:$4 sm:$0xff]  }
  0x9c   :  { %5041 = vmatprep.subr.bf16.mxu0 %v7580_v48  ;;  %5574 = vmatprep.subr.bf16.mxu1 %v7583_v50  ;;  %v7671_v48 = vld [vmem:[%s11224_s1 + $0x6c4] ss:$16 sps:$4 sm:$0xff]   ;;  %v7674_v50 = vld [vmem:[%s11224_s1 + $0x6cc] ss:$16 sps:$4 sm:$0xff]  }
  0x9f   :  { %5042 = vmatpush1.bf16.msra.mxu0 %v7578_v51  ;;  %5575 = vmatpush1.bf16.msra.mxu1 %v7581_v53  ;;  %v7669_v51 = vld [vmem:[%s11224_s1 + $0x6c0] ss:$16 sps:$4 sm:$0xff]   ;;  %v7672_v53 = vld [vmem:[%s11224_s1 + $0x6c8] ss:$16 sps:$4 sm:$0xff]  }
  0xa0   :  { %5043 = vmatprep.subr.bf16.mxu0 %v7586_v54  ;;  %5576 = vmatprep.subr.bf16.mxu1 %v7589_v55  ;;  %v7677_v54 = vld [vmem:[%s11224_s1 + $0x6e4] ss:$16 sps:$4 sm:$0xff]   ;;  %v7680_v55 = vld [vmem:[%s11224_s1 + $0x6ec] ss:$16 sps:$4 sm:$0xff]  }
  0xa3   :  { %5044 = vmatpush1.bf16.msra.mxu0 %v7584_v56  ;;  %5577 = vmatpush1.bf16.msra.mxu1 %v7587_v57  ;;  %v7675_v56 = vld [vmem:[%s11224_s1 + $0x6e0] ss:$16 sps:$4 sm:$0xff]   ;;  %v7678_v57 = vld [vmem:[%s11224_s1 + $0x6e8] ss:$16 sps:$4 sm:$0xff]  }
  0xa4   :  { %5045 = vmatprep.subr.bf16.mxu0 %v7592_v58  ;;  %5578 = vmatprep.subr.bf16.mxu1 %v7595_v59  ;;  %v7683_v58 = vld [vmem:[%s11224_s1 + $0x704] ss:$16 sps:$4 sm:$0xff]   ;;  %v7686_v59 = vld [vmem:[%s11224_s1 + $0x70c] ss:$16 sps:$4 sm:$0xff]  }
  0xa7   :  { %5046 = vmatpush1.bf16.msra.mxu0 %v7590_v60  ;;  %5579 = vmatpush1.bf16.msra.mxu1 %v7593_v61  ;;  %v7681_v60 = vld [vmem:[%s11224_s1 + $0x700] ss:$16 sps:$4 sm:$0xff]   ;;  %v7684_v61 = vld [vmem:[%s11224_s1 + $0x708] ss:$16 sps:$4 sm:$0xff]  }
  0xa8   :  { %5047 = vmatprep.subr.bf16.mxu0 %v7598_v62  ;;  %5580 = vmatprep.subr.bf16.mxu1 %v7601_v63  ;;  %v7689_v62 = vld [vmem:[%s11224_s1 + $0x724] ss:$16 sps:$4 sm:$0xff]   ;;  %v7692_v63 = vld [vmem:[%s11224_s1 + $0x72c] ss:$16 sps:$4 sm:$0xff]  }
  0xab   :  { %5048 = vmatpush1.bf16.msra.mxu0 %v7596_v0  ;;  %5581 = vmatpush1.bf16.msra.mxu1 %v7599_v1  ;;  %v7687_v0 = vld [vmem:[%s11224_s1 + $0x720] ss:$16 sps:$4 sm:$0xff]   ;;  %v7690_v1 = vld [vmem:[%s11224_s1 + $0x728] ss:$16 sps:$4 sm:$0xff]  }
  0xac   :  { %5049 = vmatprep.subr.bf16.mxu0 %v7604_v2  ;;  %5582 = vmatprep.subr.bf16.mxu1 %v7607_v3  ;;  %v7695_v2 = vld [vmem:[%s11224_s1 + $0x744] ss:$16 sps:$4 sm:$0xff]   ;;  %v7698_v3 = vld [vmem:[%s11224_s1 + $0x74c] ss:$16 sps:$4 sm:$0xff]  }
  0xaf   :  { %5050 = vmatpush1.bf16.msra.mxu0 %v7602_v4  ;;  %5583 = vmatpush1.bf16.msra.mxu1 %v7605_v5  ;;  %v7693_v4 = vld [vmem:[%s11224_s1 + $0x740] ss:$16 sps:$4 sm:$0xff]   ;;  %v7696_v5 = vld [vmem:[%s11224_s1 + $0x748] ss:$16 sps:$4 sm:$0xff]  }
  0xb0   :  { %5051 = vmatprep.subr.bf16.mxu0 %v7610_v6  ;;  %5584 = vmatprep.subr.bf16.mxu1 %v7613_v7  ;;  %v7701_v6 = vld [vmem:[%s11224_s1 + $0x764] ss:$16 sps:$4 sm:$0xff]   ;;  %v7704_v7 = vld [vmem:[%s11224_s1 + $0x76c] ss:$16 sps:$4 sm:$0xff]  }
  0xb3   :  { %5052 = vmatpush1.bf16.msra.mxu0 %v7608_v8  ;;  %5585 = vmatpush1.bf16.msra.mxu1 %v7611_v9  ;;  %v7699_v8 = vld [vmem:[%s11224_s1 + $0x760] ss:$16 sps:$4 sm:$0xff]   ;;  %v7702_v9 = vld [vmem:[%s11224_s1 + $0x768] ss:$16 sps:$4 sm:$0xff]  }
  0xb4   :  { %5053 = vmatprep.subr.bf16.mxu0 %v7616_v10  ;;  %5586 = vmatprep.subr.bf16.mxu1 %v7619_v11  ;;  %v7707_v10 = vld [vmem:[%s11224_s1 + $0x784] ss:$16 sps:$4 sm:$0xff]   ;;  %v7710_v11 = vld [vmem:[%s11224_s1 + $0x78c] ss:$16 sps:$4 sm:$0xff]  }
  0xb7   :  { %5054 = vmatpush1.bf16.msra.mxu0 %v7614_v12  ;;  %5587 = vmatpush1.bf16.msra.mxu1 %v7617_v52  ;;  %v7705_v12 = vld [vmem:[%s11224_s1 + $0x780] ss:$16 sps:$4 sm:$0xff]   ;;  %v7708_v52 = vld [vmem:[%s11224_s1 + $0x788] ss:$16 sps:$4 sm:$0xff]  }
  0xb8   :  { %5055 = vmatprep.subr.bf16.mxu0 %v7622_v15  ;;  %5588 = vmatprep.subr.bf16.mxu1 %v7625_v16  ;;  %v7713_v15 = vld [vmem:[%s11224_s1 + $0x7a4] ss:$16 sps:$4 sm:$0xff]   ;;  %v7716_v16 = vld [vmem:[%s11224_s1 + $0x7ac] ss:$16 sps:$4 sm:$0xff]  }
  0xbb   :  { %5056 = vmatpush1.bf16.msra.mxu0 %v7620_v17  ;;  %5589 = vmatpush1.bf16.msra.mxu1 %v7623_v18  ;;  %v7711_v17 = vld [vmem:[%s11224_s1 + $0x7a0] ss:$16 sps:$4 sm:$0xff]   ;;  %v7714_v18 = vld [vmem:[%s11224_s1 + $0x7a8] ss:$16 sps:$4 sm:$0xff]  }
  0xbc   :  { %5057 = vmatprep.subr.bf16.mxu0 %v7628_v19  ;;  %5590 = vmatprep.subr.bf16.mxu1 %v7631_v20  ;;  %v7719_v19 = vld [vmem:[%s11224_s1 + $0x7c4] ss:$16 sps:$4 sm:$0xff]   ;;  %v7722_v20 = vld [vmem:[%s11224_s1 + $0x7cc] ss:$16 sps:$4 sm:$0xff]  }
  0xbf   :  { %5058 = vmatpush1.bf16.msra.mxu0 %v7626_v21  ;;  %5591 = vmatpush1.bf16.msra.mxu1 %v7629_v22  ;;  %v9407_v21 = vld.sshfl [vmem:[%s11223_s0 + $0x8] sm:$0xff pattern:$0x75316420]  ;;  %v7717_v22 = vld [vmem:[%s11224_s1 + $0x7c0] ss:$16 sps:$4 sm:$0xff]  }
  0xc0   :  { %5068 = vmatprep.subr.bf16.mxu0 %v7635_v23  ;;  %5601 = vmatprep.subr.bf16.mxu1 %v7638_v24  ;;  %v7720_v23 = vld [vmem:[%s11224_s1 + $0x7c8] ss:$16 sps:$4 sm:$0xff]   ;;  %v7725_v24 = vld [vmem:[%s11224_s1 + $0x7e4] ss:$16 sps:$4 sm:$0xff]  }
  0xc2   :  { %5060 = vmatmul.mubr.bf16.vlgmr.msra.gmra.mrb[0].mxu0 %v9233_v26  ;;  %5593 = vmatmul.mubr.bf16.vlgmr.msra.gmra.mrb[0].mxu1 %v9233_v26 }
  0xc3   :  { %5069 = vmatpush1.bf16.msra.mxu0 %v7633_v13  ;;  %5602 = vmatpush1.bf16.msra.mxu1 %v7636_v27  ;;  %v7728_v13 = vld [vmem:[%s11224_s1 + $0x7ec] ss:$16 sps:$4 sm:$0xff]   ;;  %v7723_v27 = vld [vmem:[%s11224_s1 + $0x7e0] ss:$16 sps:$4 sm:$0xff]  }
  0xc4   :  { %5070 = vmatprep.subr.bf16.mxu0 %v7641_v28  ;;  %5603 = vmatprep.subr.bf16.mxu1 %v7644_v29  ;;  %v7726_v28 = vld [vmem:[%s11224_s1 + $0x7e8] ss:$16 sps:$4 sm:$0xff]   ;;  %v7731_v29 = vld [vmem:[%s11224_s1 + $0x804] ss:$16 sps:$4 sm:$0xff]  }
  0xc5   :  { %5100 = vmatprep.mubr.bf16.mxu0 %v884_v14  ;;  %5633 = vmatprep.mubr.bf16.mxu1 %v884_v14  ;;  %v7734_v14 = vld [vmem:[%s11224_s1 + $0x80c] ss:$16 sps:$4 sm:$0xff]  }
  0xc7   :  { %5071 = vmatpush1.bf16.msra.mxu0 %v7639_v30  ;;  %5604 = vmatpush1.bf16.msra.mxu1 %v7642_v31  ;;  %v900_v30 = vcombine.high %v9407_v21, %v9407_v21  ;;  %v882_v31 = vcombine.high %v9233_v26, %v9233_v26  ;;  %v7740_v26 = vld [vmem:[%s11224_s1 + $0x82c] ss:$16 sps:$4 sm:$0xff]  }
  0xc8   :  { %5072 = vmatprep.subr.bf16.mxu0 %v7647_v25  ;;  %5605 = vmatprep.subr.bf16.mxu1 %v7650_v32  ;;  %v7729_v25 = vld [vmem:[%s11224_s1 + $0x800] ss:$16 sps:$4 sm:$0xff]   ;;  %v7732_v32 = vld [vmem:[%s11224_s1 + $0x808] ss:$16 sps:$4 sm:$0xff]  }
  0xcb   :  { %5073 = vmatpush1.bf16.msra.mxu0 %v7645_v33  ;;  %5606 = vmatpush1.bf16.msra.mxu1 %v7648_v34  ;;  %v7737_v33 = vld [vmem:[%s11224_s1 + $0x824] ss:$16 sps:$4 sm:$0xff]   ;;  %v9450_v34 = vrot.slane %v900_v30, %v8749_v49 }
  0xcc   :  { %5074 = vmatprep.subr.bf16.mxu0 %v7653_v35  ;;  %5607 = vmatprep.subr.bf16.mxu1 %v7656_v36  ;;  %v7735_v35 = vld [vmem:[%s11224_s1 + $0x820] ss:$16 sps:$4 sm:$0xff]   ;;  %v7738_v36 = vld [vmem:[%s11224_s1 + $0x828] ss:$16 sps:$4 sm:$0xff]   ;;  %v7821_v30 = vld [vmem:[%s11224_s1 + $0x9e4] ss:$16 sps:$4 sm:$0xff]  }
  0xcf   :  { %5075 = vmatpush1.bf16.msra.mxu0 %v7651_v37  ;;  %5608 = vmatpush1.bf16.msra.mxu1 %v7654_v38  ;;  %v7743_v37 = vld [vmem:[%s11224_s1 + $0x844] ss:$16 sps:$4 sm:$0xff]   ;;  %v7746_v38 = vld [vmem:[%s11224_s1 + $0x84c] ss:$16 sps:$4 sm:$0xff]  }
  0xd0   :  { %5076 = vmatprep.subr.bf16.mxu0 %v7659_v39  ;;  %5609 = vmatprep.subr.bf16.mxu1 %v7662_v40  ;;  %v7741_v39 = vld [vmem:[%s11224_s1 + $0x840] ss:$16 sps:$4 sm:$0xff]   ;;  %v7744_v40 = vld [vmem:[%s11224_s1 + $0x848] ss:$16 sps:$4 sm:$0xff]  }
  0xd3   :  { %5077 = vmatpush1.bf16.msra.mxu0 %v7657_v41  ;;  %5610 = vmatpush1.bf16.msra.mxu1 %v7660_v43  ;;  %v7749_v41 = vld [vmem:[%s11224_s1 + $0x864] ss:$16 sps:$4 sm:$0xff]   ;;  %v7752_v43 = vld [vmem:[%s11224_s1 + $0x86c] ss:$16 sps:$4 sm:$0xff]  }
  0xd4   :  { %5078 = vmatprep.subr.bf16.mxu0 %v7665_v44  ;;  %5611 = vmatprep.subr.bf16.mxu1 %v7668_v45  ;;  %v7747_v44 = vld [vmem:[%s11224_s1 + $0x860] ss:$16 sps:$4 sm:$0xff]   ;;  %v7750_v45 = vld [vmem:[%s11224_s1 + $0x868] ss:$16 sps:$4 sm:$0xff]  }
  0xd7   :  { %5079 = vmatpush1.bf16.msra.mxu0 %v7663_v46  ;;  %5612 = vmatpush1.bf16.msra.mxu1 %v7666_v47  ;;  %v7755_v46 = vld [vmem:[%s11224_s1 + $0x884] ss:$16 sps:$4 sm:$0xff]   ;;  %v7758_v47 = vld [vmem:[%s11224_s1 + $0x88c] ss:$16 sps:$4 sm:$0xff]  }
  0xd8   :  { %5080 = vmatprep.subr.bf16.mxu0 %v7671_v48  ;;  %5613 = vmatprep.subr.bf16.mxu1 %v7674_v50  ;;  %v7753_v48 = vld [vmem:[%s11224_s1 + $0x880] ss:$16 sps:$4 sm:$0xff]   ;;  %v7756_v50 = vld [vmem:[%s11224_s1 + $0x888] ss:$16 sps:$4 sm:$0xff]  }
  0xdb   :  { %5081 = vmatpush1.bf16.msra.mxu0 %v7669_v51  ;;  %5614 = vmatpush1.bf16.msra.mxu1 %v7672_v53  ;;  %v7761_v51 = vld [vmem:[%s11224_s1 + $0x8a4] ss:$16 sps:$4 sm:$0xff]   ;;  %v7764_v53 = vld [vmem:[%s11224_s1 + $0x8ac] ss:$16 sps:$4 sm:$0xff]  }
  0xdc   :  { %5082 = vmatprep.subr.bf16.mxu0 %v7677_v54  ;;  %5615 = vmatprep.subr.bf16.mxu1 %v7680_v55  ;;  %v7759_v54 = vld [vmem:[%s11224_s1 + $0x8a0] ss:$16 sps:$4 sm:$0xff]   ;;  %v7762_v55 = vld [vmem:[%s11224_s1 + $0x8a8] ss:$16 sps:$4 sm:$0xff]  }
  0xdf   :  { %5083 = vmatpush1.bf16.msra.mxu0 %v7675_v56  ;;  %5616 = vmatpush1.bf16.msra.mxu1 %v7678_v57  ;;  %v7767_v56 = vld [vmem:[%s11224_s1 + $0x8c4] ss:$16 sps:$4 sm:$0xff]   ;;  %v7770_v57 = vld [vmem:[%s11224_s1 + $0x8cc] ss:$16 sps:$4 sm:$0xff]  }
  0xe0   :  { %5084 = vmatprep.subr.bf16.mxu0 %v7683_v58  ;;  %5617 = vmatprep.subr.bf16.mxu1 %v7686_v59  ;;  %v7765_v58 = vld [vmem:[%s11224_s1 + $0x8c0] ss:$16 sps:$4 sm:$0xff]   ;;  %v7768_v59 = vld [vmem:[%s11224_s1 + $0x8c8] ss:$16 sps:$4 sm:$0xff]  }
  0xe3   :  { %5085 = vmatpush1.bf16.msra.mxu0 %v7681_v60  ;;  %5618 = vmatpush1.bf16.msra.mxu1 %v7684_v61  ;;  %v7773_v60 = vld [vmem:[%s11224_s1 + $0x8e4] ss:$16 sps:$4 sm:$0xff]   ;;  %v7776_v61 = vld [vmem:[%s11224_s1 + $0x8ec] ss:$16 sps:$4 sm:$0xff]  }
  0xe4   :  { %5086 = vmatprep.subr.bf16.mxu0 %v7689_v62  ;;  %5619 = vmatprep.subr.bf16.mxu1 %v7692_v63  ;;  %v7771_v62 = vld [vmem:[%s11224_s1 + $0x8e0] ss:$16 sps:$4 sm:$0xff]   ;;  %v7774_v63 = vld [vmem:[%s11224_s1 + $0x8e8] ss:$16 sps:$4 sm:$0xff]  }
  0xe7   :  { %5087 = vmatpush1.bf16.msra.mxu0 %v7687_v0  ;;  %5620 = vmatpush1.bf16.msra.mxu1 %v7690_v1  ;;  %v7779_v0 = vld [vmem:[%s11224_s1 + $0x904] ss:$16 sps:$4 sm:$0xff]   ;;  %v7782_v1 = vld [vmem:[%s11224_s1 + $0x90c] ss:$16 sps:$4 sm:$0xff]  }
  0xe8   :  { %5088 = vmatprep.subr.bf16.mxu0 %v7695_v2  ;;  %5621 = vmatprep.subr.bf16.mxu1 %v7698_v3  ;;  %v7777_v2 = vld [vmem:[%s11224_s1 + $0x900] ss:$16 sps:$4 sm:$0xff]   ;;  %v7780_v3 = vld [vmem:[%s11224_s1 + $0x908] ss:$16 sps:$4 sm:$0xff]  }
  0xeb   :  { %5089 = vmatpush1.bf16.msra.mxu0 %v7693_v4  ;;  %5622 = vmatpush1.bf16.msra.mxu1 %v7696_v5  ;;  %v7785_v4 = vld [vmem:[%s11224_s1 + $0x924] ss:$16 sps:$4 sm:$0xff]   ;;  %v7788_v5 = vld [vmem:[%s11224_s1 + $0x92c] ss:$16 sps:$4 sm:$0xff]  }
  0xec   :  { %5090 = vmatprep.subr.bf16.mxu0 %v7701_v6  ;;  %5623 = vmatprep.subr.bf16.mxu1 %v7704_v7  ;;  %v7783_v6 = vld [vmem:[%s11224_s1 + $0x920] ss:$16 sps:$4 sm:$0xff]   ;;  %v7786_v7 = vld [vmem:[%s11224_s1 + $0x928] ss:$16 sps:$4 sm:$0xff]  }
  0xef   :  { %5091 = vmatpush1.bf16.msra.mxu0 %v7699_v8  ;;  %5624 = vmatpush1.bf16.msra.mxu1 %v7702_v9  ;;  %v7791_v8 = vld [vmem:[%s11224_s1 + $0x944] ss:$16 sps:$4 sm:$0xff]   ;;  %v7794_v9 = vld [vmem:[%s11224_s1 + $0x94c] ss:$16 sps:$4 sm:$0xff]  }
  0xf0   :  { %5092 = vmatprep.subr.bf16.mxu0 %v7707_v10  ;;  %5625 = vmatprep.subr.bf16.mxu1 %v7710_v11  ;;  %v7789_v10 = vld [vmem:[%s11224_s1 + $0x940] ss:$16 sps:$4 sm:$0xff]   ;;  %v7792_v11 = vld [vmem:[%s11224_s1 + $0x948] ss:$16 sps:$4 sm:$0xff]  }
  0xf3   :  { %5093 = vmatpush1.bf16.msra.mxu0 %v7705_v12  ;;  %5626 = vmatpush1.bf16.msra.mxu1 %v7708_v52  ;;  %v7797_v12 = vld [vmem:[%s11224_s1 + $0x964] ss:$16 sps:$4 sm:$0xff]   ;;  %v7800_v52 = vld [vmem:[%s11224_s1 + $0x96c] ss:$16 sps:$4 sm:$0xff]  }
  0xf4   :  { %5094 = vmatprep.subr.bf16.mxu0 %v7713_v15  ;;  %5627 = vmatprep.subr.bf16.mxu1 %v7716_v16  ;;  %v7795_v15 = vld [vmem:[%s11224_s1 + $0x960] ss:$16 sps:$4 sm:$0xff]   ;;  %v7798_v16 = vld [vmem:[%s11224_s1 + $0x968] ss:$16 sps:$4 sm:$0xff]  }
  0xf7   :  { %5095 = vmatpush1.bf16.msra.mxu0 %v7711_v17  ;;  %5628 = vmatpush1.bf16.msra.mxu1 %v7714_v18  ;;  %v7803_v17 = vld [vmem:[%s11224_s1 + $0x984] ss:$16 sps:$4 sm:$0xff]   ;;  %v7806_v18 = vld [vmem:[%s11224_s1 + $0x98c] ss:$16 sps:$4 sm:$0xff]  }
  0xf8   :  { %5096 = vmatprep.subr.bf16.mxu0 %v7719_v19  ;;  %5629 = vmatprep.subr.bf16.mxu1 %v7722_v20  ;;  %v7801_v19 = vld [vmem:[%s11224_s1 + $0x980] ss:$16 sps:$4 sm:$0xff]   ;;  %v7804_v20 = vld [vmem:[%s11224_s1 + $0x988] ss:$16 sps:$4 sm:$0xff]  }
  0xfb   :  { %5097 = vmatpush1.bf16.msra.mxu0 %v7717_v22  ;;  %5630 = vmatpush1.bf16.msra.mxu1 %v7720_v23  ;;  %v7809_v22 = vld [vmem:[%s11224_s1 + $0x9a4] ss:$16 sps:$4 sm:$0xff]   ;;  %v7812_v23 = vld [vmem:[%s11224_s1 + $0x9ac] ss:$16 sps:$4 sm:$0xff]  }
  0xfc   :  { %5098 = vmatprep.subr.bf16.mxu0 %v7725_v24  ;;  %5631 = vmatprep.subr.bf16.mxu1 %v7728_v13  ;;  %v7807_v24 = vld [vmem:[%s11224_s1 + $0x9a0] ss:$16 sps:$4 sm:$0xff]   ;;  %v7810_v13 = vld [vmem:[%s11224_s1 + $0x9a8] ss:$16 sps:$4 sm:$0xff]  }
  0xff   :  { %5099 = vmatpush1.bf16.msra.mxu0 %v7723_v27  ;;  %5632 = vmatpush1.bf16.msra.mxu1 %v7726_v28  ;;  %v7815_v27 = vld [vmem:[%s11224_s1 + $0x9c4] ss:$16 sps:$4 sm:$0xff]   ;;  %v7818_v28 = vld [vmem:[%s11224_s1 + $0x9cc] ss:$16 sps:$4 sm:$0xff]  }
 0x100   :  { %5109 = vmatprep.subr.bf16.mxu0 %v7731_v29  ;;  %5642 = vmatprep.subr.bf16.mxu1 %v7734_v14  ;;  %v7813_v29 = vld [vmem:[%s11224_s1 + $0x9c0] ss:$16 sps:$4 sm:$0xff]   ;;  %v7816_v14 = vld [vmem:[%s11224_s1 + $0x9c8] ss:$16 sps:$4 sm:$0xff]  }
 0x102   :  { %5101 = vmatmul.mubr.bf16.vlgmr.msra.gmra.mrb[0].mxu0 %v882_v31  ;;  %5634 = vmatmul.mubr.bf16.vlgmr.msra.gmra.mrb[0].mxu1 %v882_v31  ;;  %v7824_v31 = vld [vmem:[%s11224_s1 + $0x9ec] ss:$16 sps:$4 sm:$0xff]  }
 0x103   :  { %5110 = vmatpush1.bf16.msra.mxu0 %v7729_v25  ;;  %5643 = vmatpush1.bf16.msra.mxu1 %v7732_v32  ;;  %v7819_v25 = vld [vmem:[%s11224_s1 + $0x9e0] ss:$16 sps:$4 sm:$0xff]   ;;  %v7822_v32 = vld [vmem:[%s11224_s1 + $0x9e8] ss:$16 sps:$4 sm:$0xff]  }
 0x104   :  { %5111 = vmatprep.subr.bf16.mxu0 %v7737_v33  ;;  %5644 = vmatprep.subr.bf16.mxu1 %v7740_v26  ;;  %v7827_v33 = vld [vmem:[%s11224_s1 + $0xa04] ss:$16 sps:$4 sm:$0xff]   ;;  %v7830_v26 = vld [vmem:[%s11224_s1 + $0xa0c] ss:$16 sps:$4 sm:$0xff]  }
 0x105   :  { %5141 = vmatprep.mubr.bf16.mxu0 %v9450_v34  ;;  %5674 = vmatprep.mubr.bf16.mxu1 %v9450_v34 }
 0x107   :  { %5112 = vmatpush1.bf16.msra.mxu0 %v7735_v35  ;;  %5645 = vmatpush1.bf16.msra.mxu1 %v7738_v36  ;;  %v9636_v35 = vrot.slane %v9407_v21, %v8749_v49  ;;  %v7825_v36 = vld [vmem:[%s11224_s1 + $0xa00] ss:$16 sps:$4 sm:$0xff]   ;;  %v7836_v21 = vld [vmem:[%s11224_s1 + $0xa2c] ss:$16 sps:$4 sm:$0xff]  }
 0x108   :  { %5113 = vmatprep.subr.bf16.mxu0 %v7743_v37  ;;  %5646 = vmatprep.subr.bf16.mxu1 %v7746_v38  ;;  %v7828_v37 = vld [vmem:[%s11224_s1 + $0xa08] ss:$16 sps:$4 sm:$0xff]   ;;  %v7833_v38 = vld [vmem:[%s11224_s1 + $0xa24] ss:$16 sps:$4 sm:$0xff]  }
 0x10b   :  { %5114 = vmatpush1.bf16.msra.mxu0 %v7741_v39  ;;  %5647 = vmatpush1.bf16.msra.mxu1 %v7744_v40  ;;  %v932_v39 = vcombine.high %v9450_v34, %v9450_v34  ;;  %v7831_v40 = vld [vmem:[%s11224_s1 + $0xa20] ss:$16 sps:$4 sm:$0xff]   ;;  %v7839_v34 = vld [vmem:[%s11224_s1 + $0xa44] ss:$16 sps:$4 sm:$0xff]  }
 0x10c   :  { %5115 = vmatprep.subr.bf16.mxu0 %v7749_v41  ;;  %5648 = vmatprep.subr.bf16.mxu1 %v7752_v43  ;;  %v7834_v41 = vld [vmem:[%s11224_s1 + $0xa28] ss:$16 sps:$4 sm:$0xff]   ;;  %v7842_v43 = vld [vmem:[%s11224_s1 + $0xa4c] ss:$16 sps:$4 sm:$0xff]  }
 0x10f   :  { %5116 = vmatpush1.bf16.msra.mxu0 %v7747_v44  ;;  %5649 = vmatpush1.bf16.msra.mxu1 %v7750_v45  ;;  %v7837_v44 = vld [vmem:[%s11224_s1 + $0xa40] ss:$16 sps:$4 sm:$0xff]   ;;  %v7840_v45 = vld [vmem:[%s11224_s1 + $0xa48] ss:$16 sps:$4 sm:$0xff]  }
 0x110   :  { %5117 = vmatprep.subr.bf16.mxu0 %v7755_v46  ;;  %5650 = vmatprep.subr.bf16.mxu1 %v7758_v47  ;;  %v7845_v46 = vld [vmem:[%s11224_s1 + $0xa64] ss:$16 sps:$4 sm:$0xff]   ;;  %v7848_v47 = vld [vmem:[%s11224_s1 + $0xa6c] ss:$16 sps:$4 sm:$0xff]  }
 0x113   :  { %5118 = vmatpush1.bf16.msra.mxu0 %v7753_v48  ;;  %5651 = vmatpush1.bf16.msra.mxu1 %v7756_v50  ;;  %v7843_v48 = vld [vmem:[%s11224_s1 + $0xa60] ss:$16 sps:$4 sm:$0xff]   ;;  %v7846_v50 = vld [vmem:[%s11224_s1 + $0xa68] ss:$16 sps:$4 sm:$0xff]  }
 0x114   :  { %5119 = vmatprep.subr.bf16.mxu0 %v7761_v51  ;;  %5652 = vmatprep.subr.bf16.mxu1 %v7764_v53  ;;  %v7851_v51 = vld [vmem:[%s11224_s1 + $0xa84] ss:$16 sps:$4 sm:$0xff]   ;;  %v7854_v53 = vld [vmem:[%s11224_s1 + $0xa8c] ss:$16 sps:$4 sm:$0xff]  }
 0x117   :  { %5120 = vmatpush1.bf16.msra.mxu0 %v7759_v54  ;;  %5653 = vmatpush1.bf16.msra.mxu1 %v7762_v55  ;;  %v7849_v54 = vld [vmem:[%s11224_s1 + $0xa80] ss:$16 sps:$4 sm:$0xff]   ;;  %v7852_v55 = vld [vmem:[%s11224_s1 + $0xa88] ss:$16 sps:$4 sm:$0xff]  }
 0x118   :  { %5121 = vmatprep.subr.bf16.mxu0 %v7767_v56  ;;  %5654 = vmatprep.subr.bf16.mxu1 %v7770_v57  ;;  %v7857_v56 = vld [vmem:[%s11224_s1 + $0xaa4] ss:$16 sps:$4 sm:$0xff]   ;;  %v7860_v57 = vld [vmem:[%s11224_s1 + $0xaac] ss:$16 sps:$4 sm:$0xff]  }
 0x11b   :  { %5122 = vmatpush1.bf16.msra.mxu0 %v7765_v58  ;;  %5655 = vmatpush1.bf16.msra.mxu1 %v7768_v59  ;;  %v7855_v58 = vld [vmem:[%s11224_s1 + $0xaa0] ss:$16 sps:$4 sm:$0xff]   ;;  %v7858_v59 = vld [vmem:[%s11224_s1 + $0xaa8] ss:$16 sps:$4 sm:$0xff]  }
 0x11c   :  { %5123 = vmatprep.subr.bf16.mxu0 %v7773_v60  ;;  %5656 = vmatprep.subr.bf16.mxu1 %v7776_v61  ;;  %v7863_v60 = vld [vmem:[%s11224_s1 + $0xac4] ss:$16 sps:$4 sm:$0xff]   ;;  %v7866_v61 = vld [vmem:[%s11224_s1 + $0xacc] ss:$16 sps:$4 sm:$0xff]  }
 0x11f   :  { %5124 = vmatpush1.bf16.msra.mxu0 %v7771_v62  ;;  %5657 = vmatpush1.bf16.msra.mxu1 %v7774_v63  ;;  %v7861_v62 = vld [vmem:[%s11224_s1 + $0xac0] ss:$16 sps:$4 sm:$0xff]   ;;  %v7864_v63 = vld [vmem:[%s11224_s1 + $0xac8] ss:$16 sps:$4 sm:$0xff]  }
 0x120   :  { %5125 = vmatprep.subr.bf16.mxu0 %v7779_v0  ;;  %5658 = vmatprep.subr.bf16.mxu1 %v7782_v1  ;;  %v7869_v0 = vld [vmem:[%s11224_s1 + $0xae4] ss:$16 sps:$4 sm:$0xff]   ;;  %v7872_v1 = vld [vmem:[%s11224_s1 + $0xaec] ss:$16 sps:$4 sm:$0xff]  }
 0x123   :  { %5126 = vmatpush1.bf16.msra.mxu0 %v7777_v2  ;;  %5659 = vmatpush1.bf16.msra.mxu1 %v7780_v3  ;;  %v7867_v2 = vld [vmem:[%s11224_s1 + $0xae0] ss:$16 sps:$4 sm:$0xff]   ;;  %v7870_v3 = vld [vmem:[%s11224_s1 + $0xae8] ss:$16 sps:$4 sm:$0xff]  }
 0x124   :  { %5127 = vmatprep.subr.bf16.mxu0 %v7785_v4  ;;  %5660 = vmatprep.subr.bf16.mxu1 %v7788_v5  ;;  %v7875_v4 = vld [vmem:[%s11224_s1 + $0xb04] ss:$16 sps:$4 sm:$0xff]   ;;  %v7878_v5 = vld [vmem:[%s11224_s1 + $0xb0c] ss:$16 sps:$4 sm:$0xff]  }
 0x127   :  { %5128 = vmatpush1.bf16.msra.mxu0 %v7783_v6  ;;  %5661 = vmatpush1.bf16.msra.mxu1 %v7786_v7  ;;  %v7873_v6 = vld [vmem:[%s11224_s1 + $0xb00] ss:$16 sps:$4 sm:$0xff]   ;;  %v7876_v7 = vld [vmem:[%s11224_s1 + $0xb08] ss:$16 sps:$4 sm:$0xff]  }
 0x128   :  { %5129 = vmatprep.subr.bf16.mxu0 %v7791_v8  ;;  %5662 = vmatprep.subr.bf16.mxu1 %v7794_v9  ;;  %v7881_v8 = vld [vmem:[%s11224_s1 + $0xb24] ss:$16 sps:$4 sm:$0xff]   ;;  %v7884_v9 = vld [vmem:[%s11224_s1 + $0xb2c] ss:$16 sps:$4 sm:$0xff]  }
 0x12b   :  { %5130 = vmatpush1.bf16.msra.mxu0 %v7789_v10  ;;  %5663 = vmatpush1.bf16.msra.mxu1 %v7792_v11  ;;  %v7879_v10 = vld [vmem:[%s11224_s1 + $0xb20] ss:$16 sps:$4 sm:$0xff]   ;;  %v7882_v11 = vld [vmem:[%s11224_s1 + $0xb28] ss:$16 sps:$4 sm:$0xff]  }
 0x12c   :  { %5131 = vmatprep.subr.bf16.mxu0 %v7797_v12  ;;  %5664 = vmatprep.subr.bf16.mxu1 %v7800_v52  ;;  %v7887_v12 = vld [vmem:[%s11224_s1 + $0xb44] ss:$16 sps:$4 sm:$0xff]   ;;  %v7890_v52 = vld [vmem:[%s11224_s1 + $0xb4c] ss:$16 sps:$4 sm:$0xff]  }
 0x12f   :  { %5132 = vmatpush1.bf16.msra.mxu0 %v7795_v15  ;;  %5665 = vmatpush1.bf16.msra.mxu1 %v7798_v16  ;;  %v7885_v15 = vld [vmem:[%s11224_s1 + $0xb40] ss:$16 sps:$4 sm:$0xff]   ;;  %v7888_v16 = vld [vmem:[%s11224_s1 + $0xb48] ss:$16 sps:$4 sm:$0xff]  }
 0x130   :  { %5133 = vmatprep.subr.bf16.mxu0 %v7803_v17  ;;  %5666 = vmatprep.subr.bf16.mxu1 %v7806_v18  ;;  %v7893_v17 = vld [vmem:[%s11224_s1 + $0xb64] ss:$16 sps:$4 sm:$0xff]   ;;  %v7896_v18 = vld [vmem:[%s11224_s1 + $0xb6c] ss:$16 sps:$4 sm:$0xff]  }
 0x133   :  { %5134 = vmatpush1.bf16.msra.mxu0 %v7801_v19  ;;  %5667 = vmatpush1.bf16.msra.mxu1 %v7804_v20  ;;  %v7891_v19 = vld [vmem:[%s11224_s1 + $0xb60] ss:$16 sps:$4 sm:$0xff]   ;;  %v7894_v20 = vld [vmem:[%s11224_s1 + $0xb68] ss:$16 sps:$4 sm:$0xff]  }
 0x134   :  { %5135 = vmatprep.subr.bf16.mxu0 %v7809_v22  ;;  %5668 = vmatprep.subr.bf16.mxu1 %v7812_v23  ;;  %v7899_v22 = vld [vmem:[%s11224_s1 + $0xb84] ss:$16 sps:$4 sm:$0xff]   ;;  %v7902_v23 = vld [vmem:[%s11224_s1 + $0xb8c] ss:$16 sps:$4 sm:$0xff]  }
 0x137   :  { %5136 = vmatpush1.bf16.msra.mxu0 %v7807_v24  ;;  %5669 = vmatpush1.bf16.msra.mxu1 %v7810_v13  ;;  %v7897_v24 = vld [vmem:[%s11224_s1 + $0xb80] ss:$16 sps:$4 sm:$0xff]   ;;  %v7900_v13 = vld [vmem:[%s11224_s1 + $0xb88] ss:$16 sps:$4 sm:$0xff]  }
 0x138   :  { %5137 = vmatprep.subr.bf16.mxu0 %v7815_v27  ;;  %5670 = vmatprep.subr.bf16.mxu1 %v7818_v28  ;;  %v7905_v27 = vld [vmem:[%s11224_s1 + $0xba4] ss:$16 sps:$4 sm:$0xff]   ;;  %v7908_v28 = vld [vmem:[%s11224_s1 + $0xbac] ss:$16 sps:$4 sm:$0xff]  }
 0x13b   :  { %5138 = vmatpush1.bf16.msra.mxu0 %v7813_v29  ;;  %5671 = vmatpush1.bf16.msra.mxu1 %v7816_v14  ;;  %v7903_v29 = vld [vmem:[%s11224_s1 + $0xba0] ss:$16 sps:$4 sm:$0xff]   ;;  %v7906_v14 = vld [vmem:[%s11224_s1 + $0xba8] ss:$16 sps:$4 sm:$0xff]  }
 0x13c   :  { %5139 = vmatprep.subr.bf16.mxu0 %v7821_v30  ;;  %5672 = vmatprep.subr.bf16.mxu1 %v7824_v31  ;;  %v7911_v30 = vld [vmem:[%s11224_s1 + $0xbc4] ss:$16 sps:$4 sm:$0xff]   ;;  %v7914_v31 = vld [vmem:[%s11224_s1 + $0xbcc] ss:$16 sps:$4 sm:$0xff]  }
 0x13f   :  { %5140 = vmatpush1.bf16.msra.mxu0 %v7819_v25  ;;  %5673 = vmatpush1.bf16.msra.mxu1 %v7822_v32  ;;  %v8555_v25 = vld [vmem:[%s11223_s0 + $0x8] sm:$0xff] }
 0x140   :  { %5150 = vmatprep.subr.bf16.mxu0 %v7827_v33  ;;  %5683 = vmatprep.subr.bf16.mxu1 %v7830_v26  ;;  %v885_v32 = vcombine.high %v8555_v25, %v8555_v25  ;;  %v7909_v33 = vld [vmem:[%s11224_s1 + $0xbc0] ss:$16 sps:$4 sm:$0xff]   ;;  %v7912_v26 = vld [vmem:[%s11224_s1 + $0xbc8] ss:$16 sps:$4 sm:$0xff]  }
 0x141   :  { %v7993_v25 = vld [vmem:[%s11224_s1 + $0xd80] ss:$16 sps:$4 sm:$0xff]  }
 0x142   :  { %5142 = vmatmul.mubr.bf16.vlgmr.msra.gmra.mrb[0].mxu0 %v9636_v35  ;;  %5675 = vmatmul.mubr.bf16.vlgmr.msra.gmra.mrb[0].mxu1 %v9636_v35 }
 0x143   :  { %5151 = vmatpush1.bf16.msra.mxu0 %v7825_v36  ;;  %5684 = vmatpush1.bf16.msra.mxu1 %v7828_v37  ;;  %v7917_v36 = vld [vmem:[%s11224_s1 + $0xbe4] ss:$16 sps:$4 sm:$0xff]   ;;  %v7920_v37 = vld [vmem:[%s11224_s1 + $0xbec] ss:$16 sps:$4 sm:$0xff]  }
 0x144   :  { %5152 = vmatprep.subr.bf16.mxu0 %v7833_v38  ;;  %5685 = vmatprep.subr.bf16.mxu1 %v7836_v21  ;;  %v9826_v38 = vrot.slane %v885_v32, %v8749_v49  ;;  %v7915_v21 = vld [vmem:[%s11224_s1 + $0xbe0] ss:$16 sps:$4 sm:$0xff]   ;;  %v7996_v32 = vld [vmem:[%s11224_s1 + $0xd88] ss:$16 sps:$4 sm:$0xff]  }
 0x145   :  { %5182 = vmatprep.mubr.bf16.mxu0 %v932_v39  ;;  %5715 = vmatprep.mubr.bf16.mxu1 %v932_v39  ;;  %v7918_v39 = vld [vmem:[%s11224_s1 + $0xbe8] ss:$16 sps:$4 sm:$0xff]  }
 0x147   :  { %5153 = vmatpush1.bf16.msra.mxu0 %v7831_v40  ;;  %5686 = vmatpush1.bf16.msra.mxu1 %v7834_v41  ;;  %v7923_v40 = vld [vmem:[%s11224_s1 + $0xc04] ss:$16 sps:$4 sm:$0xff]   ;;  %v7926_v41 = vld [vmem:[%s11224_s1 + $0xc0c] ss:$16 sps:$4 sm:$0xff]  }
 0x148   :  { %5154 = vmatprep.subr.bf16.mxu0 %v7839_v34  ;;  %5687 = vmatprep.subr.bf16.mxu1 %v7842_v43  ;;  %v901_v34 = vcombine.high %v9826_v38, %v9826_v38  ;;  %v930_v43 = vcombine.high %v9636_v35, %v9636_v35  ;;  %v7932_v35 = vld [vmem:[%s11224_s1 + $0xc2c] ss:$16 sps:$4 sm:$0xff]  }
 0x14b   :  { %5155 = vmatpush1.bf16.msra.mxu0 %v7837_v44  ;;  %5688 = vmatpush1.bf16.msra.mxu1 %v7840_v45  ;;  %v7921_v44 = vld [vmem:[%s11224_s1 + $0xc00] ss:$16 sps:$4 sm:$0xff]   ;;  %v7924_v45 = vld [vmem:[%s11224_s1 + $0xc08] ss:$16 sps:$4 sm:$0xff]  }
 0x14c   :  { %5156 = vmatprep.subr.bf16.mxu0 %v7845_v46  ;;  %5689 = vmatprep.subr.bf16.mxu1 %v7848_v47  ;;  %v7929_v46 = vld [vmem:[%s11224_s1 + $0xc24] ss:$16 sps:$4 sm:$0xff]   ;;  %v9857_v47 = vrot.slane %v901_v34, %v8749_v49 }
 0x14d   :  { %v8013_v34 = vld [vmem:[%s11224_s1 + $0xde4] ss:$16 sps:$4 sm:$0xff]  }
 0x14f   :  { %5157 = vmatpush1.bf16.msra.mxu0 %v7843_v48  ;;  %5690 = vmatpush1.bf16.msra.mxu1 %v7846_v50  ;;  %v7927_v48 = vld [vmem:[%s11224_s1 + $0xc20] ss:$16 sps:$4 sm:$0xff]   ;;  %v7930_v50 = vld [vmem:[%s11224_s1 + $0xc28] ss:$16 sps:$4 sm:$0xff]  }
 0x150   :  { %5158 = vmatprep.subr.bf16.mxu0 %v7851_v51  ;;  %5691 = vmatprep.subr.bf16.mxu1 %v7854_v53  ;;  %v7935_v51 = vld [vmem:[%s11224_s1 + $0xc44] ss:$16 sps:$4 sm:$0xff]   ;;  %v7938_v53 = vld [vmem:[%s11224_s1 + $0xc4c] ss:$16 sps:$4 sm:$0xff]  }
 0x153   :  { %5159 = vmatpush1.bf16.msra.mxu0 %v7849_v54  ;;  %5692 = vmatpush1.bf16.msra.mxu1 %v7852_v55  ;;  %v7933_v54 = vld [vmem:[%s11224_s1 + $0xc40] ss:$16 sps:$4 sm:$0xff]   ;;  %v7936_v55 = vld [vmem:[%s11224_s1 + $0xc48] ss:$16 sps:$4 sm:$0xff]  }
 0x154   :  { %5160 = vmatprep.subr.bf16.mxu0 %v7857_v56  ;;  %5693 = vmatprep.subr.bf16.mxu1 %v7860_v57  ;;  %v7941_v56 = vld [vmem:[%s11224_s1 + $0xc64] ss:$16 sps:$4 sm:$0xff]   ;;  %v7944_v57 = vld [vmem:[%s11224_s1 + $0xc6c] ss:$16 sps:$4 sm:$0xff]  }
 0x157   :  { %5161 = vmatpush1.bf16.msra.mxu0 %v7855_v58  ;;  %5694 = vmatpush1.bf16.msra.mxu1 %v7858_v59  ;;  %v7939_v58 = vld [vmem:[%s11224_s1 + $0xc60] ss:$16 sps:$4 sm:$0xff]   ;;  %v7942_v59 = vld [vmem:[%s11224_s1 + $0xc68] ss:$16 sps:$4 sm:$0xff]  }
 0x158   :  { %5162 = vmatprep.subr.bf16.mxu0 %v7863_v60  ;;  %5695 = vmatprep.subr.bf16.mxu1 %v7866_v61  ;;  %v7947_v60 = vld [vmem:[%s11224_s1 + $0xc84] ss:$16 sps:$4 sm:$0xff]   ;;  %v7950_v61 = vld [vmem:[%s11224_s1 + $0xc8c] ss:$16 sps:$4 sm:$0xff]  }
 0x15b   :  { %5163 = vmatpush1.bf16.msra.mxu0 %v7861_v62  ;;  %5696 = vmatpush1.bf16.msra.mxu1 %v7864_v63  ;;  %v7945_v62 = vld [vmem:[%s11224_s1 + $0xc80] ss:$16 sps:$4 sm:$0xff]   ;;  %v7948_v63 = vld [vmem:[%s11224_s1 + $0xc88] ss:$16 sps:$4 sm:$0xff]  }
 0x15c   :  { %5164 = vmatprep.subr.bf16.mxu0 %v7869_v0  ;;  %5697 = vmatprep.subr.bf16.mxu1 %v7872_v1  ;;  %v7953_v0 = vld [vmem:[%s11224_s1 + $0xca4] ss:$16 sps:$4 sm:$0xff]   ;;  %v7956_v1 = vld [vmem:[%s11224_s1 + $0xcac] ss:$16 sps:$4 sm:$0xff]  }
 0x15f   :  { %5165 = vmatpush1.bf16.msra.mxu0 %v7867_v2  ;;  %5698 = vmatpush1.bf16.msra.mxu1 %v7870_v3  ;;  %v7951_v2 = vld [vmem:[%s11224_s1 + $0xca0] ss:$16 sps:$4 sm:$0xff]   ;;  %v7954_v3 = vld [vmem:[%s11224_s1 + $0xca8] ss:$16 sps:$4 sm:$0xff]  }
 0x160   :  { %5166 = vmatprep.subr.bf16.mxu0 %v7875_v4  ;;  %5699 = vmatprep.subr.bf16.mxu1 %v7878_v5  ;;  %v7959_v4 = vld [vmem:[%s11224_s1 + $0xcc4] ss:$16 sps:$4 sm:$0xff]   ;;  %v7962_v5 = vld [vmem:[%s11224_s1 + $0xccc] ss:$16 sps:$4 sm:$0xff]  }
 0x163   :  { %5167 = vmatpush1.bf16.msra.mxu0 %v7873_v6  ;;  %5700 = vmatpush1.bf16.msra.mxu1 %v7876_v7  ;;  %v7957_v6 = vld [vmem:[%s11224_s1 + $0xcc0] ss:$16 sps:$4 sm:$0xff]   ;;  %v7960_v7 = vld [vmem:[%s11224_s1 + $0xcc8] ss:$16 sps:$4 sm:$0xff]  }
 0x164   :  { %5168 = vmatprep.subr.bf16.mxu0 %v7881_v8  ;;  %5701 = vmatprep.subr.bf16.mxu1 %v7884_v9  ;;  %v7965_v8 = vld [vmem:[%s11224_s1 + $0xce4] ss:$16 sps:$4 sm:$0xff]   ;;  %v7968_v9 = vld [vmem:[%s11224_s1 + $0xcec] ss:$16 sps:$4 sm:$0xff]  }
 0x167   :  { %5169 = vmatpush1.bf16.msra.mxu0 %v7879_v10  ;;  %5702 = vmatpush1.bf16.msra.mxu1 %v7882_v11  ;;  %v7963_v10 = vld [vmem:[%s11224_s1 + $0xce0] ss:$16 sps:$4 sm:$0xff]   ;;  %v7966_v11 = vld [vmem:[%s11224_s1 + $0xce8] ss:$16 sps:$4 sm:$0xff]  }
 0x168   :  { %5170 = vmatprep.subr.bf16.mxu0 %v7887_v12  ;;  %5703 = vmatprep.subr.bf16.mxu1 %v7890_v52  ;;  %v7971_v12 = vld [vmem:[%s11224_s1 + $0xd04] ss:$16 sps:$4 sm:$0xff]   ;;  %v7974_v52 = vld [vmem:[%s11224_s1 + $0xd0c] ss:$16 sps:$4 sm:$0xff]  }
 0x16b   :  { %5171 = vmatpush1.bf16.msra.mxu0 %v7885_v15  ;;  %5704 = vmatpush1.bf16.msra.mxu1 %v7888_v16  ;;  %v7969_v15 = vld [vmem:[%s11224_s1 + $0xd00] ss:$16 sps:$4 sm:$0xff]   ;;  %v7972_v16 = vld [vmem:[%s11224_s1 + $0xd08] ss:$16 sps:$4 sm:$0xff]  }
 0x16c   :  { %5172 = vmatprep.subr.bf16.mxu0 %v7893_v17  ;;  %5705 = vmatprep.subr.bf16.mxu1 %v7896_v18  ;;  %v7977_v17 = vld [vmem:[%s11224_s1 + $0xd24] ss:$16 sps:$4 sm:$0xff]   ;;  %v7980_v18 = vld [vmem:[%s11224_s1 + $0xd2c] ss:$16 sps:$4 sm:$0xff]  }
 0x16f   :  { %5173 = vmatpush1.bf16.msra.mxu0 %v7891_v19  ;;  %5706 = vmatpush1.bf16.msra.mxu1 %v7894_v20  ;;  %v7975_v19 = vld [vmem:[%s11224_s1 + $0xd20] ss:$16 sps:$4 sm:$0xff]   ;;  %v7978_v20 = vld [vmem:[%s11224_s1 + $0xd28] ss:$16 sps:$4 sm:$0xff]  }
 0x170   :  { %5174 = vmatprep.subr.bf16.mxu0 %v7899_v22  ;;  %5707 = vmatprep.subr.bf16.mxu1 %v7902_v23  ;;  %v7983_v22 = vld [vmem:[%s11224_s1 + $0xd44] ss:$16 sps:$4 sm:$0xff]   ;;  %v7986_v23 = vld [vmem:[%s11224_s1 + $0xd4c] ss:$16 sps:$4 sm:$0xff]  }
 0x173   :  { %5175 = vmatpush1.bf16.msra.mxu0 %v7897_v24  ;;  %5708 = vmatpush1.bf16.msra.mxu1 %v7900_v13  ;;  %v7981_v24 = vld [vmem:[%s11224_s1 + $0xd40] ss:$16 sps:$4 sm:$0xff]   ;;  %v7984_v13 = vld [vmem:[%s11224_s1 + $0xd48] ss:$16 sps:$4 sm:$0xff]  }
 0x174   :  { %5176 = vmatprep.subr.bf16.mxu0 %v7905_v27  ;;  %5709 = vmatprep.subr.bf16.mxu1 %v7908_v28  ;;  %v7989_v27 = vld [vmem:[%s11224_s1 + $0xd64] ss:$16 sps:$4 sm:$0xff]   ;;  %v7992_v28 = vld [vmem:[%s11224_s1 + $0xd6c] ss:$16 sps:$4 sm:$0xff]  }
 0x177   :  { %5177 = vmatpush1.bf16.msra.mxu0 %v7903_v29  ;;  %5710 = vmatpush1.bf16.msra.mxu1 %v7906_v14  ;;  %v7987_v29 = vld [vmem:[%s11224_s1 + $0xd60] ss:$16 sps:$4 sm:$0xff]   ;;  %v7990_v14 = vld [vmem:[%s11224_s1 + $0xd68] ss:$16 sps:$4 sm:$0xff]  }
 0x178   :  { %5178 = vmatprep.subr.bf16.mxu0 %v7911_v30  ;;  %5711 = vmatprep.subr.bf16.mxu1 %v7914_v31  ;;  %v7995_v30 = vld [vmem:[%s11224_s1 + $0xd84] ss:$16 sps:$4 sm:$0xff]   ;;  %v7998_v31 = vld [vmem:[%s11224_s1 + $0xd8c] ss:$16 sps:$4 sm:$0xff]  }
 0x17b   :  { %5179 = vmatpush1.bf16.msra.mxu0 %v7909_v33  ;;  %5712 = vmatpush1.bf16.msra.mxu1 %v7912_v26  ;;  %v8001_v33 = vld [vmem:[%s11224_s1 + $0xda4] ss:$16 sps:$4 sm:$0xff]   ;;  %v8004_v26 = vld [vmem:[%s11224_s1 + $0xdac] ss:$16 sps:$4 sm:$0xff]  }
 0x17c   :  { %5180 = vmatprep.subr.bf16.mxu0 %v7917_v36  ;;  %5713 = vmatprep.subr.bf16.mxu1 %v7920_v37  ;;  %v7999_v36 = vld [vmem:[%s11224_s1 + $0xda0] ss:$16 sps:$4 sm:$0xff]   ;;  %v8002_v37 = vld [vmem:[%s11224_s1 + $0xda8] ss:$16 sps:$4 sm:$0xff]  }
 0x17f   :  { %5181 = vmatpush1.bf16.msra.mxu0 %v7915_v21  ;;  %5714 = vmatpush1.bf16.msra.mxu1 %v7918_v39  ;;  %v8007_v21 = vld [vmem:[%s11224_s1 + $0xdc4] ss:$16 sps:$4 sm:$0xff]   ;;  %v8010_v39 = vld [vmem:[%s11224_s1 + $0xdcc] ss:$16 sps:$4 sm:$0xff]  }
 0x180   :  { %5191 = vmatprep.subr.bf16.mxu0 %v7923_v40  ;;  %5724 = vmatprep.subr.bf16.mxu1 %v7926_v41  ;;  %v8005_v40 = vld [vmem:[%s11224_s1 + $0xdc0] ss:$16 sps:$4 sm:$0xff]   ;;  %v8008_v41 = vld [vmem:[%s11224_s1 + $0xdc8] ss:$16 sps:$4 sm:$0xff]  }
 0x182   :  { %5183 = vmatmul.mubr.bf16.vlgmr.msra.gmra.mrb[0].mxu0 %v930_v43  ;;  %5716 = vmatmul.mubr.bf16.vlgmr.msra.gmra.mrb[0].mxu1 %v930_v43  ;;  %v8016_v43 = vld [vmem:[%s11224_s1 + $0xdec] ss:$16 sps:$4 sm:$0xff]  }
 0x183   :  { %5192 = vmatpush1.bf16.msra.mxu0 %v7921_v44  ;;  %5725 = vmatpush1.bf16.msra.mxu1 %v7924_v45  ;;  %v8011_v44 = vld [vmem:[%s11224_s1 + $0xde0] ss:$16 sps:$4 sm:$0xff]   ;;  %v8014_v45 = vld [vmem:[%s11224_s1 + $0xde8] ss:$16 sps:$4 sm:$0xff]  }
 0x184   :  { %5193 = vmatprep.subr.bf16.mxu0 %v7929_v46  ;;  %5726 = vmatprep.subr.bf16.mxu1 %v7932_v35  ;;  %v8020_v46 = vld [vmem:[%s11224_s1 + $0xe04] ss:$16 sps:$4 sm:$0xff]   ;;  %v8023_v35 = vld [vmem:[%s11224_s1 + $0xe0c] ss:$16 sps:$4 sm:$0xff]  }
 0x185   :  { %5223 = vmatprep.mubr.bf16.mxu0 %v9857_v47  ;;  %5756 = vmatprep.mubr.bf16.mxu1 %v9857_v47 }
 0x187   :  { %5194 = vmatpush1.bf16.msra.mxu0 %v7927_v48  ;;  %5727 = vmatpush1.bf16.msra.mxu1 %v7930_v50  ;;  %v10043_v48 = vrot.slane %v9826_v38, %v8749_v49  ;;  %v8018_v50 = vld [vmem:[%s11224_s1 + $0xe00] ss:$16 sps:$4 sm:$0xff]   ;;  %v8029_v38 = vld [vmem:[%s11224_s1 + $0xe2c] ss:$16 sps:$4 sm:$0xff]  }
 0x188   :  { %5195 = vmatprep.subr.bf16.mxu0 %v7935_v51  ;;  %5728 = vmatprep.subr.bf16.mxu1 %v7938_v53  ;;  %v8021_v51 = vld [vmem:[%s11224_s1 + $0xe08] ss:$16 sps:$4 sm:$0xff]   ;;  %v8026_v53 = vld [vmem:[%s11224_s1 + $0xe24] ss:$16 sps:$4 sm:$0xff]  }
 0x18b   :  { %5196 = vmatpush1.bf16.msra.mxu0 %v7933_v54  ;;  %5729 = vmatpush1.bf16.msra.mxu1 %v7936_v55  ;;  %v933_v54 = vcombine.high %v9857_v47, %v9857_v47  ;;  %v8024_v55 = vld [vmem:[%s11224_s1 + $0xe20] ss:$16 sps:$4 sm:$0xff]   ;;  %v8032_v47 = vld [vmem:[%s11224_s1 + $0xe44] ss:$16 sps:$4 sm:$0xff]  }
 0x18c   :  { %5197 = vmatprep.subr.bf16.mxu0 %v7941_v56  ;;  %5730 = vmatprep.subr.bf16.mxu1 %v7944_v57  ;;  %v8027_v56 = vld [vmem:[%s11224_s1 + $0xe28] ss:$16 sps:$4 sm:$0xff]   ;;  %v8035_v57 = vld [vmem:[%s11224_s1 + $0xe4c] ss:$16 sps:$4 sm:$0xff]  }
 0x18f   :  { %5198 = vmatpush1.bf16.msra.mxu0 %v7939_v58  ;;  %5731 = vmatpush1.bf16.msra.mxu1 %v7942_v59  ;;  %v8030_v58 = vld [vmem:[%s11224_s1 + $0xe40] ss:$16 sps:$4 sm:$0xff]   ;;  %v8033_v59 = vld [vmem:[%s11224_s1 + $0xe48] ss:$16 sps:$4 sm:$0xff]  }
 0x190   :  { %5199 = vmatprep.subr.bf16.mxu0 %v7947_v60  ;;  %5732 = vmatprep.subr.bf16.mxu1 %v7950_v61  ;;  %v8038_v60 = vld [vmem:[%s11224_s1 + $0xe64] ss:$16 sps:$4 sm:$0xff]   ;;  %v8041_v61 = vld [vmem:[%s11224_s1 + $0xe6c] ss:$16 sps:$4 sm:$0xff]  }
 0x193   :  { %5200 = vmatpush1.bf16.msra.mxu0 %v7945_v62  ;;  %5733 = vmatpush1.bf16.msra.mxu1 %v7948_v63  ;;  %v8036_v62 = vld [vmem:[%s11224_s1 + $0xe60] ss:$16 sps:$4 sm:$0xff]   ;;  %v8039_v63 = vld [vmem:[%s11224_s1 + $0xe68] ss:$16 sps:$4 sm:$0xff]  }
 0x194   :  { %5201 = vmatprep.subr.bf16.mxu0 %v7953_v0  ;;  %5734 = vmatprep.subr.bf16.mxu1 %v7956_v1  ;;  %v8044_v0 = vld [vmem:[%s11224_s1 + $0xe84] ss:$16 sps:$4 sm:$0xff]   ;;  %v8047_v1 = vld [vmem:[%s11224_s1 + $0xe8c] ss:$16 sps:$4 sm:$0xff]  }
 0x197   :  { %5202 = vmatpush1.bf16.msra.mxu0 %v7951_v2  ;;  %5735 = vmatpush1.bf16.msra.mxu1 %v7954_v3  ;;  %v8042_v2 = vld [vmem:[%s11224_s1 + $0xe80] ss:$16 sps:$4 sm:$0xff]   ;;  %v8045_v3 = vld [vmem:[%s11224_s1 + $0xe88] ss:$16 sps:$4 sm:$0xff]  }
 0x198   :  { %5203 = vmatprep.subr.bf16.mxu0 %v7959_v4  ;;  %5736 = vmatprep.subr.bf16.mxu1 %v7962_v5  ;;  %v8050_v4 = vld [vmem:[%s11224_s1 + $0xea4] ss:$16 sps:$4 sm:$0xff]   ;;  %v8053_v5 = vld [vmem:[%s11224_s1 + $0xeac] ss:$16 sps:$4 sm:$0xff]  }
 0x19b   :  { %5204 = vmatpush1.bf16.msra.mxu0 %v7957_v6  ;;  %5737 = vmatpush1.bf16.msra.mxu1 %v7960_v7  ;;  %v8048_v6 = vld [vmem:[%s11224_s1 + $0xea0] ss:$16 sps:$4 sm:$0xff]   ;;  %v8051_v7 = vld [vmem:[%s11224_s1 + $0xea8] ss:$16 sps:$4 sm:$0xff]  }
 0x19c   :  { %5205 = vmatprep.subr.bf16.mxu0 %v7965_v8  ;;  %5738 = vmatprep.subr.bf16.mxu1 %v7968_v9  ;;  %v8056_v8 = vld [vmem:[%s11224_s1 + $0xec4] ss:$16 sps:$4 sm:$0xff]   ;;  %v8059_v9 = vld [vmem:[%s11224_s1 + $0xecc] ss:$16 sps:$4 sm:$0xff]  }
 0x19f   :  { %5206 = vmatpush1.bf16.msra.mxu0 %v7963_v10  ;;  %5739 = vmatpush1.bf16.msra.mxu1 %v7966_v11  ;;  %v8054_v10 = vld [vmem:[%s11224_s1 + $0xec0] ss:$16 sps:$4 sm:$0xff]   ;;  %v8057_v11 = vld [vmem:[%s11224_s1 + $0xec8] ss:$16 sps:$4 sm:$0xff]  }
 0x1a0   :  { %5207 = vmatprep.subr.bf16.mxu0 %v7971_v12  ;;  %5740 = vmatprep.subr.bf16.mxu1 %v7974_v52  ;;  %v8062_v12 = vld [vmem:[%s11224_s1 + $0xee4] ss:$16 sps:$4 sm:$0xff]   ;;  %v8065_v52 = vld [vmem:[%s11224_s1 + $0xeec] ss:$16 sps:$4 sm:$0xff]  }
 0x1a3   :  { %5208 = vmatpush1.bf16.msra.mxu0 %v7969_v15  ;;  %5741 = vmatpush1.bf16.msra.mxu1 %v7972_v16  ;;  %v8060_v15 = vld [vmem:[%s11224_s1 + $0xee0] ss:$16 sps:$4 sm:$0xff]   ;;  %v8063_v16 = vld [vmem:[%s11224_s1 + $0xee8] ss:$16 sps:$4 sm:$0xff]  }
 0x1a4   :  { %5209 = vmatprep.subr.bf16.mxu0 %v7977_v17  ;;  %5742 = vmatprep.subr.bf16.mxu1 %v7980_v18  ;;  %v8068_v17 = vld [vmem:[%s11224_s1 + $0xf04] ss:$16 sps:$4 sm:$0xff]   ;;  %v8071_v18 = vld [vmem:[%s11224_s1 + $0xf0c] ss:$16 sps:$4 sm:$0xff]  }
 0x1a7   :  { %5210 = vmatpush1.bf16.msra.mxu0 %v7975_v19  ;;  %5743 = vmatpush1.bf16.msra.mxu1 %v7978_v20  ;;  %v8066_v19 = vld [vmem:[%s11224_s1 + $0xf00] ss:$16 sps:$4 sm:$0xff]   ;;  %v8069_v20 = vld [vmem:[%s11224_s1 + $0xf08] ss:$16 sps:$4 sm:$0xff]  }
 0x1a8   :  { %5211 = vmatprep.subr.bf16.mxu0 %v7983_v22  ;;  %5744 = vmatprep.subr.bf16.mxu1 %v7986_v23  ;;  %v8074_v22 = vld [vmem:[%s11224_s1 + $0xf24] ss:$16 sps:$4 sm:$0xff]   ;;  %v8077_v23 = vld [vmem:[%s11224_s1 + $0xf2c] ss:$16 sps:$4 sm:$0xff]  }
 0x1ab   :  { %5212 = vmatpush1.bf16.msra.mxu0 %v7981_v24  ;;  %5745 = vmatpush1.bf16.msra.mxu1 %v7984_v13  ;;  %v8072_v24 = vld [vmem:[%s11224_s1 + $0xf20] ss:$16 sps:$4 sm:$0xff]   ;;  %v8075_v13 = vld [vmem:[%s11224_s1 + $0xf28] ss:$16 sps:$4 sm:$0xff]  }
 0x1ac   :  { %5213 = vmatprep.subr.bf16.mxu0 %v7989_v27  ;;  %5746 = vmatprep.subr.bf16.mxu1 %v7992_v28  ;;  %v8080_v27 = vld [vmem:[%s11224_s1 + $0xf44] ss:$16 sps:$4 sm:$0xff]   ;;  %v8083_v28 = vld [vmem:[%s11224_s1 + $0xf4c] ss:$16 sps:$4 sm:$0xff]  }
 0x1af   :  { %5214 = vmatpush1.bf16.msra.mxu0 %v7987_v29  ;;  %5747 = vmatpush1.bf16.msra.mxu1 %v7990_v14  ;;  %v8078_v29 = vld [vmem:[%s11224_s1 + $0xf40] ss:$16 sps:$4 sm:$0xff]   ;;  %v8081_v14 = vld [vmem:[%s11224_s1 + $0xf48] ss:$16 sps:$4 sm:$0xff]  }
 0x1b0   :  { %5215 = vmatprep.subr.bf16.mxu0 %v7995_v30  ;;  %5748 = vmatprep.subr.bf16.mxu1 %v7998_v31  ;;  %v8086_v30 = vld [vmem:[%s11224_s1 + $0xf64] ss:$16 sps:$4 sm:$0xff]   ;;  %v8089_v31 = vld [vmem:[%s11224_s1 + $0xf6c] ss:$16 sps:$4 sm:$0xff]  }
 0x1b3   :  { %5216 = vmatpush1.bf16.msra.mxu0 %v7993_v25  ;;  %5749 = vmatpush1.bf16.msra.mxu1 %v7996_v32 }
 0x1b4   :  { %5217 = vmatprep.subr.bf16.mxu0 %v8001_v33  ;;  %5750 = vmatprep.subr.bf16.mxu1 %v8004_v26 }
 0x1b7   :  { %5218 = vmatpush1.bf16.msra.mxu0 %v7999_v36  ;;  %5751 = vmatpush1.bf16.msra.mxu1 %v8002_v37 }
 0x1b8   :  { %5219 = vmatprep.subr.bf16.mxu0 %v8007_v21  ;;  %5752 = vmatprep.subr.bf16.mxu1 %v8010_v39 }
 0x1bb   :  { %5220 = vmatpush1.bf16.msra.mxu0 %v8005_v40  ;;  %5753 = vmatpush1.bf16.msra.mxu1 %v8008_v41 }
 0x1bc   :  { %5221 = vmatprep.subr.bf16.mxu0 %v8013_v34  ;;  %5754 = vmatprep.subr.bf16.mxu1 %v8016_v43 }
 0x1bf   :  { %5222 = vmatpush1.bf16.msra.mxu0 %v8011_v44  ;;  %5755 = vmatpush1.bf16.msra.mxu1 %v8014_v45 }
 0x1c0   :  { %5232 = vmatprep.subr.bf16.mxu0 %v8020_v46  ;;  %5765 = vmatprep.subr.bf16.mxu1 %v8023_v35 }
 0x1c2   :  { %5224 = vmatmul.mubr.bf16.vlgmr.msra.gmra.mrb[0].mxu0 %v10043_v48  ;;  %5757 = vmatmul.mubr.bf16.vlgmr.msra.gmra.mrb[0].mxu1 %v10043_v48 }
 0x1c3   :  { %5233 = vmatpush1.bf16.msra.mxu0 %v8018_v50  ;;  %5766 = vmatpush1.bf16.msra.mxu1 %v8021_v51 }
 0x1c4   :  { %5234 = vmatprep.subr.bf16.mxu0 %v8026_v53  ;;  %5767 = vmatprep.subr.bf16.mxu1 %v8029_v38 }
 0x1c5   :  { %5264 = vmatprep.mubr.bf16.mxu0 %v933_v54  ;;  %5797 = vmatprep.mubr.bf16.mxu1 %v933_v54 }
 0x1c7   :  { %5235 = vmatpush1.bf16.msra.mxu0 %v8024_v55  ;;  %5768 = vmatpush1.bf16.msra.mxu1 %v8027_v56 }
 0x1c8   :  { %5236 = vmatprep.subr.bf16.mxu0 %v8032_v47  ;;  %5769 = vmatprep.subr.bf16.mxu1 %v8035_v57 }
 0x1cb   :  { %5237 = vmatpush1.bf16.msra.mxu0 %v8030_v58  ;;  %5770 = vmatpush1.bf16.msra.mxu1 %v8033_v59 }
 0x1cc   :  { %5238 = vmatprep.subr.bf16.mxu0 %v8038_v60  ;;  %5771 = vmatprep.subr.bf16.mxu1 %v8041_v61 }
 0x1cf   :  { %5239 = vmatpush1.bf16.msra.mxu0 %v8036_v62  ;;  %5772 = vmatpush1.bf16.msra.mxu1 %v8039_v63 }
 0x1d0   :  { %5240 = vmatprep.subr.bf16.mxu0 %v8044_v0  ;;  %5773 = vmatprep.subr.bf16.mxu1 %v8047_v1 }
 0x1d3   :  { %5241 = vmatpush1.bf16.msra.mxu0 %v8042_v2  ;;  %5774 = vmatpush1.bf16.msra.mxu1 %v8045_v3 }
 0x1d4   :  { %5242 = vmatprep.subr.bf16.mxu0 %v8050_v4  ;;  %5775 = vmatprep.subr.bf16.mxu1 %v8053_v5 }
 0x1d7   :  { %5243 = vmatpush1.bf16.msra.mxu0 %v8048_v6  ;;  %5776 = vmatpush1.bf16.msra.mxu1 %v8051_v7 }
 0x1d8   :  { %5244 = vmatprep.subr.bf16.mxu0 %v8056_v8  ;;  %5777 = vmatprep.subr.bf16.mxu1 %v8059_v9 }
 0x1db   :  { %5245 = vmatpush1.bf16.msra.mxu0 %v8054_v10  ;;  %5778 = vmatpush1.bf16.msra.mxu1 %v8057_v11 }
 0x1dc   :  { %5246 = vmatprep.subr.bf16.mxu0 %v8062_v12  ;;  %5779 = vmatprep.subr.bf16.mxu1 %v8065_v52 }
 0x1df   :  { %5247 = vmatpush1.bf16.msra.mxu0 %v8060_v15  ;;  %5780 = vmatpush1.bf16.msra.mxu1 %v8063_v16 }
 0x1e0   :  { %5248 = vmatprep.subr.bf16.mxu0 %v8068_v17  ;;  %5781 = vmatprep.subr.bf16.mxu1 %v8071_v18 }
 0x1e3   :  { %5249 = vmatpush1.bf16.msra.mxu0 %v8066_v19  ;;  %5782 = vmatpush1.bf16.msra.mxu1 %v8069_v20 }
 0x1e4   :  { %5250 = vmatprep.subr.bf16.mxu0 %v8074_v22  ;;  %5783 = vmatprep.subr.bf16.mxu1 %v8077_v23 }
 0x1e7   :  { %5251 = vmatpush1.bf16.msra.mxu0 %v8072_v24  ;;  %5784 = vmatpush1.bf16.msra.mxu1 %v8075_v13 }
 0x1e8   :  { %5252 = vmatprep.subr.bf16.mxu0 %v8080_v27  ;;  %5785 = vmatprep.subr.bf16.mxu1 %v8083_v28 }
 0x1e9   :  { %10 = vsyncpa [#allocation3], 0  ;;  %v8084_v25 = vld [vmem:[%s11224_s1 + $0xf60] ss:$16 sps:$4 sm:$0xff]   ;;  %v8087_v32 = vld [vmem:[%s11224_s1 + $0xf68] ss:$16 sps:$4 sm:$0xff]   ;;  %v931_v47 = vcombine.high %v10043_v48, %v10043_v48 }
 0x1ea   :  { %v8092_v33 = vld [vmem:[%s11224_s1 + $0xf84] ss:$16 sps:$4 sm:$0xff]   ;;  %v8095_v26 = vld [vmem:[%s11224_s1 + $0xf8c] ss:$16 sps:$4 sm:$0xff]   ;;  %v8090_v36 = vld [vmem:[%s11224_s1 + $0xf80] ss:$16 sps:$4 sm:$0xff]  }
 0x1eb   :  { %5253 = vmatpush1.bf16.msra.mxu0 %v8078_v29  ;;  %5786 = vmatpush1.bf16.msra.mxu1 %v8081_v14  ;;  %v8093_v37 = vld [vmem:[%s11224_s1 + $0xf88] ss:$16 sps:$4 sm:$0xff]   ;;  %v8098_v21 = vld [vmem:[%s11224_s1 + $0xfa4] ss:$16 sps:$4 sm:$0xff]   ;;  %v8101_v39 = vld [vmem:[%s11224_s1 + $0xfac] ss:$16 sps:$4 sm:$0xff]  }
 0x1ec   :  { %5254 = vmatprep.subr.bf16.mxu0 %v8086_v30  ;;  %5787 = vmatprep.subr.bf16.mxu1 %v8089_v31  ;;  %v8096_v40 = vld [vmem:[%s11224_s1 + $0xfa0] ss:$16 sps:$4 sm:$0xff]   ;;  %v8099_v41 = vld [vmem:[%s11224_s1 + $0xfa8] ss:$16 sps:$4 sm:$0xff]   ;;  %v8104_v34 = vld [vmem:[%s11224_s1 + $0xfc4] ss:$16 sps:$4 sm:$0xff]  }
 0x1ed   :  { %v8107_v43 = vld [vmem:[%s11224_s1 + $0xfcc] ss:$16 sps:$4 sm:$0xff]   ;;  %v10220_v44 = vld [vmem:[%s11223_s0 + $0x10] sm:$0xff]  ;;  %v8105_v46 = vld [vmem:[%s11224_s1 + $0xfc8] ss:$16 sps:$4 sm:$0xff]   ;;  %vm4941_vm0 = vcmask 523264  }
 0x1ee   :  { %v8102_v45 = vld [vmem:[%s11224_s1 + $0xfc0] ss:$16 sps:$4 sm:$0xff]   ;;  %v8110_v35 = vld [vmem:[%s11224_s1 + $0xfe4] ss:$16 sps:$4 sm:$0xff]   ;;  %v8113_v50 = vld [vmem:[%s11224_s1 + $0xfec] ss:$16 sps:$4 sm:$0xff]   ;;  %v10236_v51 = vrot.slane %v10220_v44, %v8749_v49 }
 0x1ef   :  { %5255 = vmatpush1.bf16.msra.mxu0 %v8084_v25  ;;  %5788 = vmatpush1.bf16.msra.mxu1 %v8087_v32  ;;  %v8108_v53 = vld [vmem:[%s11224_s1 + $0xfe0] ss:$16 sps:$4 sm:$0xff]   ;;  %v8111_v38 = vld [vmem:[%s11224_s1 + $0xfe8] ss:$16 sps:$4 sm:$0xff]   ;;  %v8116_v54 = vld [vmem:[%s11224_s1 + $0x1004] ss:$16 sps:$4 sm:$0xff]  }
 0x1f0   :  { %5256 = vmatprep.subr.bf16.mxu0 %v8092_v33  ;;  %5789 = vmatprep.subr.bf16.mxu1 %v8095_v26  ;;  %v8119_v55 = vld [vmem:[%s11224_s1 + $0x100c] ss:$16 sps:$4 sm:$0xff]   ;;  %v949_v56 = vcombine.high %v10236_v51, %v10236_v51  ;;  %v8114_v57 = vld [vmem:[%s11224_s1 + $0x1000] ss:$16 sps:$4 sm:$0xff]   ;;  %v8117_v58 = vld [vmem:[%s11224_s1 + $0x1008] ss:$16 sps:$4 sm:$0xff]  }
 0x1f1   :  { %v8122_v59 = vld [vmem:[%s11224_s1 + $0x1024] ss:$16 sps:$4 sm:$0xff]   ;;  %v8125_v48 = vld [vmem:[%s11224_s1 + $0x102c] ss:$16 sps:$4 sm:$0xff]   ;;  %v8120_v61 = vld [vmem:[%s11224_s1 + $0x1020] ss:$16 sps:$4 sm:$0xff]  }
 0x1f2   :  { %v10267_v60 = vrot.slane %v949_v56, %v8749_v49  ;;  %v8123_v62 = vld [vmem:[%s11224_s1 + $0x1028] ss:$16 sps:$4 sm:$0xff]   ;;  %v8128_v63 = vld [vmem:[%s11224_s1 + $0x1044] ss:$16 sps:$4 sm:$0xff]   ;;  %v8131_v0 = vld [vmem:[%s11224_s1 + $0x104c] ss:$16 sps:$4 sm:$0xff]  }
 0x1f3   :  { %5257 = vmatpush1.bf16.msra.mxu0 %v8090_v36  ;;  %5790 = vmatpush1.bf16.msra.mxu1 %v8093_v37  ;;  %v8126_v1 = vld [vmem:[%s11224_s1 + $0x1040] ss:$16 sps:$4 sm:$0xff]   ;;  %v8129_v2 = vld [vmem:[%s11224_s1 + $0x1048] ss:$16 sps:$4 sm:$0xff]   ;;  %v8134_v3 = vld [vmem:[%s11224_s1 + $0x1064] ss:$16 sps:$4 sm:$0xff]  }
 0x1f4   :  { %5258 = vmatprep.subr.bf16.mxu0 %v8098_v21  ;;  %5791 = vmatprep.subr.bf16.mxu1 %v8101_v39  ;;  %v8137_v4 = vld [vmem:[%s11224_s1 + $0x106c] ss:$16 sps:$4 sm:$0xff]   ;;  %v8132_v5 = vld [vmem:[%s11224_s1 + $0x1060] ss:$16 sps:$4 sm:$0xff]   ;;  %v8135_v6 = vld [vmem:[%s11224_s1 + $0x1068] ss:$16 sps:$4 sm:$0xff]  }
 0x1f5   :  { %v8140_v7 = vld [vmem:[%s11224_s1 + $0x1084] ss:$16 sps:$4 sm:$0xff]   ;;  %v8143_v8 = vld [vmem:[%s11224_s1 + $0x108c] ss:$16 sps:$4 sm:$0xff]   ;;  %v8138_v9 = vld [vmem:[%s11224_s1 + $0x1080] ss:$16 sps:$4 sm:$0xff]  }
 0x1f6   :  { %v8141_v10 = vld [vmem:[%s11224_s1 + $0x1088] ss:$16 sps:$4 sm:$0xff]   ;;  %v8146_v11 = vld [vmem:[%s11224_s1 + $0x10a4] ss:$16 sps:$4 sm:$0xff]   ;;  %v8149_v12 = vld [vmem:[%s11224_s1 + $0x10ac] ss:$16 sps:$4 sm:$0xff]  }
 0x1f7   :  { %5259 = vmatpush1.bf16.msra.mxu0 %v8096_v40  ;;  %5792 = vmatpush1.bf16.msra.mxu1 %v8099_v41  ;;  %v8144_v52 = vld [vmem:[%s11224_s1 + $0x10a0] ss:$16 sps:$4 sm:$0xff]   ;;  %v8147_v15 = vld [vmem:[%s11224_s1 + $0x10a8] ss:$16 sps:$4 sm:$0xff]   ;;  %v8152_v16 = vld [vmem:[%s11224_s1 + $0x10c4] ss:$16 sps:$4 sm:$0xff]  }
 0x1f8   :  { %5260 = vmatprep.subr.bf16.mxu0 %v8104_v34  ;;  %5793 = vmatprep.subr.bf16.mxu1 %v8107_v43  ;;  %v8155_v17 = vld [vmem:[%s11224_s1 + $0x10cc] ss:$16 sps:$4 sm:$0xff]   ;;  %v8150_v18 = vld [vmem:[%s11224_s1 + $0x10c0] ss:$16 sps:$4 sm:$0xff]   ;;  %v8153_v19 = vld [vmem:[%s11224_s1 + $0x10c8] ss:$16 sps:$4 sm:$0xff]  }
 0x1f9   :  { %v8158_v20 = vld [vmem:[%s11224_s1 + $0x10e4] ss:$16 sps:$4 sm:$0xff]   ;;  %v8161_v22 = vld [vmem:[%s11224_s1 + $0x10ec] ss:$16 sps:$4 sm:$0xff]   ;;  %v8156_v23 = vld [vmem:[%s11224_s1 + $0x10e0] ss:$16 sps:$4 sm:$0xff]  }
 0x1fa   :  { %v8159_v24 = vld [vmem:[%s11224_s1 + $0x10e8] ss:$16 sps:$4 sm:$0xff]   ;;  %v8164_v13 = vld [vmem:[%s11224_s1 + $0x1104] ss:$16 sps:$4 sm:$0xff]   ;;  %v8167_v27 = vld [vmem:[%s11224_s1 + $0x110c] ss:$16 sps:$4 sm:$0xff]  }
 0x1fb   :  { %5261 = vmatpush1.bf16.msra.mxu0 %v8102_v45  ;;  %5794 = vmatpush1.bf16.msra.mxu1 %v8105_v46  ;;  %v8162_v28 = vld [vmem:[%s11224_s1 + $0x1100] ss:$16 sps:$4 sm:$0xff]   ;;  %v8165_v29 = vld [vmem:[%s11224_s1 + $0x1108] ss:$16 sps:$4 sm:$0xff]   ;;  %v8170_v14 = vld [vmem:[%s11224_s1 + $0x1124] ss:$16 sps:$4 sm:$0xff]  }
 0x1fc   :  { %5262 = vmatprep.subr.bf16.mxu0 %v8110_v35  ;;  %5795 = vmatprep.subr.bf16.mxu1 %v8113_v50  ;;  %v8173_v30 = vld [vmem:[%s11224_s1 + $0x112c] ss:$16 sps:$4 sm:$0xff]   ;;  %v8168_v31 = vld [vmem:[%s11224_s1 + $0x1120] ss:$16 sps:$4 sm:$0xff]   ;;  %v8171_v25 = vld [vmem:[%s11224_s1 + $0x1128] ss:$16 sps:$4 sm:$0xff]  }
 0x1fd   :  { %v8176_v32 = vld [vmem:[%s11224_s1 + $0x1144] ss:$16 sps:$4 sm:$0xff]   ;;  %v8179_v33 = vld [vmem:[%s11224_s1 + $0x114c] ss:$16 sps:$4 sm:$0xff]   ;;  %v8174_v26 = vld [vmem:[%s11224_s1 + $0x1140] ss:$16 sps:$4 sm:$0xff]  }
 0x1fe   :  { %v8177_v36 = vld [vmem:[%s11224_s1 + $0x1148] ss:$16 sps:$4 sm:$0xff]   ;;  %v8182_v37 = vld [vmem:[%s11224_s1 + $0x1164] ss:$16 sps:$4 sm:$0xff]   ;;  %v8185_v21 = vld [vmem:[%s11224_s1 + $0x116c] ss:$16 sps:$4 sm:$0xff]  }
 0x1ff   :  { %5263 = vmatpush1.bf16.msra.mxu0 %v8108_v53  ;;  %5796 = vmatpush1.bf16.msra.mxu1 %v8111_v38  ;;  %v8180_v39 = vld [vmem:[%s11224_s1 + $0x1160] ss:$16 sps:$4 sm:$0xff]   ;;  %v8183_v40 = vld [vmem:[%s11224_s1 + $0x1168] ss:$16 sps:$4 sm:$0xff]   ;;  %v8188_v41 = vld [vmem:[%s11224_s1 + $0x1184] ss:$16 sps:$4 sm:$0xff]  }
 0x200   :  { %5273 = vmatprep.subr.bf16.mxu0 %v8116_v54  ;;  %5806 = vmatprep.subr.bf16.mxu1 %v8119_v55  ;;  %v8191_v34 = vld [vmem:[%s11224_s1 + $0x118c] ss:$16 sps:$4 sm:$0xff]   ;;  %v8186_v43 = vld [vmem:[%s11224_s1 + $0x1180] ss:$16 sps:$4 sm:$0xff]   ;;  %v8189_v45 = vld [vmem:[%s11224_s1 + $0x1188] ss:$16 sps:$4 sm:$0xff]  }
 0x201   :  { %v8194_v46 = vld [vmem:[%s11224_s1 + $0x11a4] ss:$16 sps:$4 sm:$0xff]   ;;  %v8197_v35 = vld [vmem:[%s11224_s1 + $0x11ac] ss:$16 sps:$4 sm:$0xff]   ;;  %v8192_v50 = vld [vmem:[%s11224_s1 + $0x11a0] ss:$16 sps:$4 sm:$0xff]  }
 0x202   :  { %5265 = vmatmul.mubr.bf16.vlgmr.msra.gmra.mrb[0].mxu0 %v931_v47  ;;  %5798 = vmatmul.mubr.bf16.vlgmr.msra.gmra.mrb[0].mxu1 %v931_v47  ;;  %v8195_v53 = vld [vmem:[%s11224_s1 + $0x11a8] ss:$16 sps:$4 sm:$0xff]   ;;  %v8200_v38 = vld [vmem:[%s11224_s1 + $0x11c4] ss:$16 sps:$4 sm:$0xff]   ;;  %v8203_v54 = vld [vmem:[%s11224_s1 + $0x11cc] ss:$16 sps:$4 sm:$0xff]  }
 0x203   :  { %5274 = vmatpush1.bf16.msra.mxu0 %v8114_v57  ;;  %5807 = vmatpush1.bf16.msra.mxu1 %v8117_v58  ;;  %v8198_v55 = vld [vmem:[%s11224_s1 + $0x11c0] ss:$16 sps:$4 sm:$0xff]   ;;  %v8201_v56 = vld [vmem:[%s11224_s1 + $0x11c8] ss:$16 sps:$4 sm:$0xff]   ;;  %v8206_v47 = vld [vmem:[%s11224_s1 + $0x11e4] ss:$16 sps:$4 sm:$0xff]  }
 0x204   :  { %5275 = vmatprep.subr.bf16.mxu0 %v8122_v59  ;;  %5808 = vmatprep.subr.bf16.mxu1 %v8125_v48  ;;  %v8209_v57 = vld [vmem:[%s11224_s1 + $0x11ec] ss:$16 sps:$4 sm:$0xff]   ;;  %v8204_v58 = vld [vmem:[%s11224_s1 + $0x11e0] ss:$16 sps:$4 sm:$0xff]   ;;  %v8207_v59 = vld [vmem:[%s11224_s1 + $0x11e8] ss:$16 sps:$4 sm:$0xff]  }
 0x205   :  { %5305 = vmatprep.mubr.bf16.mxu0 %v10267_v60  ;;  %5838 = vmatprep.mubr.bf16.mxu1 %v10267_v60  ;;  %v8212_v48 = vld [vmem:[%s11224_s1 + $0x1204] ss:$16 sps:$4 sm:$0xff]   ;;  %s8583_s6 = smov [#allocation2]  }
 0x206   :  { %s6369_s7 = sshll.u32 %s8583_s6, 4  ;;  %s6370_s7 = int_to_ptr.vmem [resolvable:$true] %s6369_s7 }
 0x207   :  { %5276 = vmatpush1.bf16.msra.mxu0 %v8120_v61  ;;  %5809 = vmatpush1.bf16.msra.mxu1 %v8123_v62  ;;  %v8215_v61 = vld [vmem:[%s11224_s1 + $0x120c] ss:$16 sps:$4 sm:$0xff]   ;;  %v10453_v62 = vrot.slane %v10236_v51, %v8749_v49  ;;  %s8557_s8 = scalar_lea.vmem %s6370_s7, 32  ;;  %p8562_p1 = scmp.lt.s32.totalorder %s6370_s7, %s6370_s7 }
 0x208   :  { %5277 = vmatprep.subr.bf16.mxu0 %v8128_v63  ;;  %5810 = vmatprep.subr.bf16.mxu1 %v8131_v0  ;;  %v8210_v63 = vld [vmem:[%s11224_s1 + $0x1200] ss:$16 sps:$4 sm:$0xff]   ;;  %v8213_v0 = vld [vmem:[%s11224_s1 + $0x1208] ss:$16 sps:$4 sm:$0xff]   ;;  %v8221_v51 = vld [vmem:[%s11224_s1 + $0x122c] ss:$16 sps:$4 sm:$0xff]   ;;  %p8558_p0 = scmp.ne.s32.totalorder %s6370_s7, %s8557_s8  ;;  %p8563_p2 = scmp.lt.s32.totalorder %s8557_s8, %s8557_s8 }
 0x20a   :  { %p8564_p3 = por %p8563_p2, %p8562_p1 }
 0x20b   :  { %5278 = vmatpush1.bf16.msra.mxu0 %v8126_v1  ;;  %5811 = vmatpush1.bf16.msra.mxu1 %v8129_v2  ;;  %v8218_v1 = vld [vmem:[%s11224_s1 + $0x1224] ss:$16 sps:$4 sm:$0xff]   ;;  %v981_v2 = vcombine.high %v10267_v60, %v10267_v60 }
 0x20c   :  { %5279 = vmatprep.subr.bf16.mxu0 %v8134_v3  ;;  %5812 = vmatprep.subr.bf16.mxu1 %v8137_v4  ;;  %v8216_v3 = vld [vmem:[%s11224_s1 + $0x1220] ss:$16 sps:$4 sm:$0xff]   ;;  %v8219_v4 = vld [vmem:[%s11224_s1 + $0x1228] ss:$16 sps:$4 sm:$0xff]   ;;  %v8224_v60 = vld [vmem:[%s11224_s1 + $0x1244] ss:$16 sps:$4 sm:$0xff]   ;;  %p8565_p4 = pnand %p8564_p3, %p8558_p0 }
 0x20f   :  { %5280 = vmatpush1.bf16.msra.mxu0 %v8132_v5  ;;  %5813 = vmatpush1.bf16.msra.mxu1 %v8135_v6  ;;  %v8227_v5 = vld [vmem:[%s11224_s1 + $0x124c] ss:$16 sps:$4 sm:$0xff]   ;;  %v8222_v6 = vld [vmem:[%s11224_s1 + $0x1240] ss:$16 sps:$4 sm:$0xff]  }
 0x210   :  { %5281 = vmatprep.subr.bf16.mxu0 %v8140_v7  ;;  %5814 = vmatprep.subr.bf16.mxu1 %v8143_v8  ;;  %v8225_v7 = vld [vmem:[%s11224_s1 + $0x1248] ss:$16 sps:$4 sm:$0xff]   ;;  %v8230_v8 = vld [vmem:[%s11224_s1 + $0x1264] ss:$16 sps:$4 sm:$0xff]  }
 0x213   :  { %5282 = vmatpush1.bf16.msra.mxu0 %v8138_v9  ;;  %5815 = vmatpush1.bf16.msra.mxu1 %v8141_v10  ;;  %v8233_v9 = vld [vmem:[%s11224_s1 + $0x126c] ss:$16 sps:$4 sm:$0xff]   ;;  %v8228_v10 = vld [vmem:[%s11224_s1 + $0x1260] ss:$16 sps:$4 sm:$0xff]  }
 0x214   :  { %5283 = vmatprep.subr.bf16.mxu0 %v8146_v11  ;;  %5816 = vmatprep.subr.bf16.mxu1 %v8149_v12  ;;  %v8231_v11 = vld [vmem:[%s11224_s1 + $0x1268] ss:$16 sps:$4 sm:$0xff]   ;;  %v8236_v12 = vld [vmem:[%s11224_s1 + $0x1284] ss:$16 sps:$4 sm:$0xff]  }
 0x217   :  { %5284 = vmatpush1.bf16.msra.mxu0 %v8144_v52  ;;  %5817 = vmatpush1.bf16.msra.mxu1 %v8147_v15  ;;  %v8239_v52 = vld [vmem:[%s11224_s1 + $0x128c] ss:$16 sps:$4 sm:$0xff]   ;;  %v8234_v15 = vld [vmem:[%s11224_s1 + $0x1280] ss:$16 sps:$4 sm:$0xff]  }
 0x218   :  { %5285 = vmatprep.subr.bf16.mxu0 %v8152_v16  ;;  %5818 = vmatprep.subr.bf16.mxu1 %v8155_v17  ;;  %v8237_v16 = vld [vmem:[%s11224_s1 + $0x1288] ss:$16 sps:$4 sm:$0xff]   ;;  %v8242_v17 = vld [vmem:[%s11224_s1 + $0x12a4] ss:$16 sps:$4 sm:$0xff]  }
 0x21b   :  { %5286 = vmatpush1.bf16.msra.mxu0 %v8150_v18  ;;  %5819 = vmatpush1.bf16.msra.mxu1 %v8153_v19  ;;  %v8245_v18 = vld [vmem:[%s11224_s1 + $0x12ac] ss:$16 sps:$4 sm:$0xff]   ;;  %v8240_v19 = vld [vmem:[%s11224_s1 + $0x12a0] ss:$16 sps:$4 sm:$0xff]  }
 0x21c   :  { %5287 = vmatprep.subr.bf16.mxu0 %v8158_v20  ;;  %5820 = vmatprep.subr.bf16.mxu1 %v8161_v22  ;;  %v8243_v20 = vld [vmem:[%s11224_s1 + $0x12a8] ss:$16 sps:$4 sm:$0xff]   ;;  %v8248_v22 = vld [vmem:[%s11224_s1 + $0x12c4] ss:$16 sps:$4 sm:$0xff]  }
 0x21f   :  { %5288 = vmatpush1.bf16.msra.mxu0 %v8156_v23  ;;  %5821 = vmatpush1.bf16.msra.mxu1 %v8159_v24  ;;  %v8251_v23 = vld [vmem:[%s11224_s1 + $0x12cc] ss:$16 sps:$4 sm:$0xff]   ;;  %v8246_v24 = vld [vmem:[%s11224_s1 + $0x12c0] ss:$16 sps:$4 sm:$0xff]  }
 0x220   :  { %5289 = vmatprep.subr.bf16.mxu0 %v8164_v13  ;;  %5822 = vmatprep.subr.bf16.mxu1 %v8167_v27  ;;  %v8249_v13 = vld [vmem:[%s11224_s1 + $0x12c8] ss:$16 sps:$4 sm:$0xff]   ;;  %v8254_v27 = vld [vmem:[%s11224_s1 + $0x12e4] ss:$16 sps:$4 sm:$0xff]  }
 0x223   :  { %5290 = vmatpush1.bf16.msra.mxu0 %v8162_v28  ;;  %5823 = vmatpush1.bf16.msra.mxu1 %v8165_v29  ;;  %v8257_v28 = vld [vmem:[%s11224_s1 + $0x12ec] ss:$16 sps:$4 sm:$0xff]   ;;  %v8252_v29 = vld [vmem:[%s11224_s1 + $0x12e0] ss:$16 sps:$4 sm:$0xff]  }
 0x224   :  { %5291 = vmatprep.subr.bf16.mxu0 %v8170_v14  ;;  %5824 = vmatprep.subr.bf16.mxu1 %v8173_v30  ;;  %v8255_v14 = vld [vmem:[%s11224_s1 + $0x12e8] ss:$16 sps:$4 sm:$0xff]   ;;  %v8260_v30 = vld [vmem:[%s11224_s1 + $0x1304] ss:$16 sps:$4 sm:$0xff]  }
 0x227   :  { %5292 = vmatpush1.bf16.msra.mxu0 %v8168_v31  ;;  %5825 = vmatpush1.bf16.msra.mxu1 %v8171_v25  ;;  %v8263_v31 = vld [vmem:[%s11224_s1 + $0x130c] ss:$16 sps:$4 sm:$0xff]   ;;  %v8258_v25 = vld [vmem:[%s11224_s1 + $0x1300] ss:$16 sps:$4 sm:$0xff]  }
 0x228   :  { %5293 = vmatprep.subr.bf16.mxu0 %v8176_v32  ;;  %5826 = vmatprep.subr.bf16.mxu1 %v8179_v33  ;;  %v8261_v32 = vld [vmem:[%s11224_s1 + $0x1308] ss:$16 sps:$4 sm:$0xff]   ;;  %v8266_v33 = vld [vmem:[%s11224_s1 + $0x1324] ss:$16 sps:$4 sm:$0xff]  }
 0x22b   :  { %5294 = vmatpush1.bf16.msra.mxu0 %v8174_v26  ;;  %5827 = vmatpush1.bf16.msra.mxu1 %v8177_v36  ;;  %v8269_v26 = vld [vmem:[%s11224_s1 + $0x132c] ss:$16 sps:$4 sm:$0xff]   ;;  %v8264_v36 = vld [vmem:[%s11224_s1 + $0x1320] ss:$16 sps:$4 sm:$0xff]  }
 0x22c   :  { %5295 = vmatprep.subr.bf16.mxu0 %v8182_v37  ;;  %5828 = vmatprep.subr.bf16.mxu1 %v8185_v21  ;;  %v8267_v37 = vld [vmem:[%s11224_s1 + $0x1328] ss:$16 sps:$4 sm:$0xff]   ;;  %v8272_v21 = vld [vmem:[%s11224_s1 + $0x1344] ss:$16 sps:$4 sm:$0xff]  }
 0x22f   :  { %5296 = vmatpush1.bf16.msra.mxu0 %v8180_v39  ;;  %5829 = vmatpush1.bf16.msra.mxu1 %v8183_v40  ;;  %v8275_v39 = vld [vmem:[%s11224_s1 + $0x134c] ss:$16 sps:$4 sm:$0xff]   ;;  %v8270_v40 = vld [vmem:[%s11224_s1 + $0x1340] ss:$16 sps:$4 sm:$0xff]  }
 0x230   :  { %5297 = vmatprep.subr.bf16.mxu0 %v8188_v41  ;;  %5830 = vmatprep.subr.bf16.mxu1 %v8191_v34  ;;  %v8273_v41 = vld [vmem:[%s11224_s1 + $0x1348] ss:$16 sps:$4 sm:$0xff]   ;;  %v8278_v34 = vld [vmem:[%s11224_s1 + $0x1364] ss:$16 sps:$4 sm:$0xff]  }
 0x233   :  { %5298 = vmatpush1.bf16.msra.mxu0 %v8186_v43  ;;  %5831 = vmatpush1.bf16.msra.mxu1 %v8189_v45  ;;  %v8281_v43 = vld [vmem:[%s11224_s1 + $0x136c] ss:$16 sps:$4 sm:$0xff]   ;;  %v8276_v45 = vld [vmem:[%s11224_s1 + $0x1360] ss:$16 sps:$4 sm:$0xff]  }
 0x234   :  { %5299 = vmatprep.subr.bf16.mxu0 %v8194_v46  ;;  %5832 = vmatprep.subr.bf16.mxu1 %v8197_v35  ;;  %v8279_v46 = vld [vmem:[%s11224_s1 + $0x1368] ss:$16 sps:$4 sm:$0xff]   ;;  %v8284_v35 = vld [vmem:[%s11224_s1 + $0x1384] ss:$16 sps:$4 sm:$0xff]  }
 0x237   :  { %5300 = vmatpush1.bf16.msra.mxu0 %v8192_v50  ;;  %5833 = vmatpush1.bf16.msra.mxu1 %v8195_v53  ;;  %v8287_v50 = vld [vmem:[%s11224_s1 + $0x138c] ss:$16 sps:$4 sm:$0xff]   ;;  %v8282_v53 = vld [vmem:[%s11224_s1 + $0x1380] ss:$16 sps:$4 sm:$0xff]  }
 0x238   :  { %5301 = vmatprep.subr.bf16.mxu0 %v8200_v38  ;;  %5834 = vmatprep.subr.bf16.mxu1 %v8203_v54  ;;  %v8285_v38 = vld [vmem:[%s11224_s1 + $0x1388] ss:$16 sps:$4 sm:$0xff]   ;;  %v8290_v54 = vld [vmem:[%s11224_s1 + $0x13a4] ss:$16 sps:$4 sm:$0xff]  }
 0x23b   :  { %5302 = vmatpush1.bf16.msra.mxu0 %v8198_v55  ;;  %5835 = vmatpush1.bf16.msra.mxu1 %v8201_v56  ;;  %v8293_v55 = vld [vmem:[%s11224_s1 + $0x13ac] ss:$16 sps:$4 sm:$0xff]   ;;  %v8288_v56 = vld [vmem:[%s11224_s1 + $0x13a0] ss:$16 sps:$4 sm:$0xff]  }
 0x23c   :  { %5303 = vmatprep.subr.bf16.mxu0 %v8206_v47  ;;  %5836 = vmatprep.subr.bf16.mxu1 %v8209_v57  ;;  %v8291_v47 = vld [vmem:[%s11224_s1 + $0x13a8] ss:$16 sps:$4 sm:$0xff]   ;;  %v8296_v57 = vld [vmem:[%s11224_s1 + $0x13c4] ss:$16 sps:$4 sm:$0xff]  }
 0x23f   :  { %5304 = vmatpush1.bf16.msra.mxu0 %v8204_v58  ;;  %5837 = vmatpush1.bf16.msra.mxu1 %v8207_v59  ;;  %v8299_v58 = vld [vmem:[%s11224_s1 + $0x13cc] ss:$16 sps:$4 sm:$0xff]   ;;  %v934_v59 = vcombine.high %v10220_v44, %v10220_v44 }
 0x240   :  { %5314 = vmatprep.subr.bf16.mxu0 %v8212_v48  ;;  %5847 = vmatprep.subr.bf16.mxu1 %v8215_v61  ;;  %v8294_v48 = vld [vmem:[%s11224_s1 + $0x13c0] ss:$16 sps:$4 sm:$0xff]   ;;  %v8297_v61 = vld [vmem:[%s11224_s1 + $0x13c8] ss:$16 sps:$4 sm:$0xff]   ;;  %v8305_v44 = vld [vmem:[%s11224_s1 + $0x13ec] ss:$16 sps:$4 sm:$0xff]  }
 0x242   :  { %5306 = vmatmul.mubr.bf16.vlgmr.msra.gmra.mrb[0].mxu0 %v10453_v62  ;;  %5839 = vmatmul.mubr.bf16.vlgmr.msra.gmra.mrb[0].mxu1 %v10453_v62 }
 0x243   :  { %5315 = vmatpush1.bf16.msra.mxu0 %v8210_v63  ;;  %5848 = vmatpush1.bf16.msra.mxu1 %v8213_v0  ;;  %v8302_v63 = vld [vmem:[%s11224_s1 + $0x13e4] ss:$16 sps:$4 sm:$0xff]   ;;  %v10642_v0 = vrot.slane %v934_v59, %v8749_v49  ;;  %v8381_v59 = vld [vmem:[%s11224_s1 + $0x1588] ss:$16 sps:$4 sm:$0xff]  }
 0x244   :  { %5316 = vmatprep.subr.bf16.mxu0 %v8218_v1  ;;  %5849 = vmatprep.subr.bf16.mxu1 %v8221_v51  ;;  %v8300_v1 = vld [vmem:[%s11224_s1 + $0x13e0] ss:$16 sps:$4 sm:$0xff]   ;;  %v8303_v51 = vld [vmem:[%s11224_s1 + $0x13e8] ss:$16 sps:$4 sm:$0xff]  }
 0x245   :  { %5346 = vmatprep.mubr.bf16.mxu0 %v981_v2  ;;  %5879 = vmatprep.mubr.bf16.mxu1 %v981_v2  ;;  %v8308_v2 = vld [vmem:[%s11224_s1 + $0x1404] ss:$16 sps:$4 sm:$0xff]  }
 0x247   :  { %5317 = vmatpush1.bf16.msra.mxu0 %v8216_v3  ;;  %5850 = vmatpush1.bf16.msra.mxu1 %v8219_v4  ;;  %v8311_v3 = vld [vmem:[%s11224_s1 + $0x140c] ss:$16 sps:$4 sm:$0xff]   ;;  %v950_v4 = vcombine.high %v10642_v0, %v10642_v0 }
 0x248   :  { %5318 = vmatprep.subr.bf16.mxu0 %v8224_v60  ;;  %5851 = vmatprep.subr.bf16.mxu1 %v8227_v5  ;;  %v979_v60 = vcombine.high %v10453_v62, %v10453_v62  ;;  %v8306_v5 = vld [vmem:[%s11224_s1 + $0x1400] ss:$16 sps:$4 sm:$0xff]   ;;  %v8317_v62 = vld [vmem:[%s11224_s1 + $0x142c] ss:$16 sps:$4 sm:$0xff]  }
 0x24b   :  { %5319 = vmatpush1.bf16.msra.mxu0 %v8222_v6  ;;  %5852 = vmatpush1.bf16.msra.mxu1 %v8225_v7  ;;  %v8309_v6 = vld [vmem:[%s11224_s1 + $0x1408] ss:$16 sps:$4 sm:$0xff]   ;;  %v8314_v7 = vld [vmem:[%s11224_s1 + $0x1424] ss:$16 sps:$4 sm:$0xff]  }
 0x24c   :  { %5320 = vmatprep.subr.bf16.mxu0 %v8230_v8  ;;  %5853 = vmatprep.subr.bf16.mxu1 %v8233_v9  ;;  %v10673_v8 = vrot.slane %v950_v4, %v8749_v49  ;;  %v8312_v9 = vld [vmem:[%s11224_s1 + $0x1420] ss:$16 sps:$4 sm:$0xff]   ;;  %v8398_v4 = vld [vmem:[%s11224_s1 + $0x15e4] ss:$16 sps:$4 sm:$0xff]  }
 0x24f   :  { %5321 = vmatpush1.bf16.msra.mxu0 %v8228_v10  ;;  %5854 = vmatpush1.bf16.msra.mxu1 %v8231_v11  ;;  %v8315_v10 = vld [vmem:[%s11224_s1 + $0x1428] ss:$16 sps:$4 sm:$0xff]   ;;  %v8320_v11 = vld [vmem:[%s11224_s1 + $0x1444] ss:$16 sps:$4 sm:$0xff]  }
 0x250   :  { %5322 = vmatprep.subr.bf16.mxu0 %v8236_v12  ;;  %5855 = vmatprep.subr.bf16.mxu1 %v8239_v52  ;;  %v8323_v12 = vld [vmem:[%s11224_s1 + $0x144c] ss:$16 sps:$4 sm:$0xff]   ;;  %v8318_v52 = vld [vmem:[%s11224_s1 + $0x1440] ss:$16 sps:$4 sm:$0xff]  }
 0x253   :  { %5323 = vmatpush1.bf16.msra.mxu0 %v8234_v15  ;;  %5856 = vmatpush1.bf16.msra.mxu1 %v8237_v16  ;;  %v8321_v15 = vld [vmem:[%s11224_s1 + $0x1448] ss:$16 sps:$4 sm:$0xff]   ;;  %v8326_v16 = vld [vmem:[%s11224_s1 + $0x1464] ss:$16 sps:$4 sm:$0xff]  }
 0x254   :  { %5324 = vmatprep.subr.bf16.mxu0 %v8242_v17  ;;  %5857 = vmatprep.subr.bf16.mxu1 %v8245_v18  ;;  %v8329_v17 = vld [vmem:[%s11224_s1 + $0x146c] ss:$16 sps:$4 sm:$0xff]   ;;  %v8324_v18 = vld [vmem:[%s11224_s1 + $0x1460] ss:$16 sps:$4 sm:$0xff]  }
 0x257   :  { %5325 = vmatpush1.bf16.msra.mxu0 %v8240_v19  ;;  %5858 = vmatpush1.bf16.msra.mxu1 %v8243_v20  ;;  %v8327_v19 = vld [vmem:[%s11224_s1 + $0x1468] ss:$16 sps:$4 sm:$0xff]   ;;  %v8332_v20 = vld [vmem:[%s11224_s1 + $0x1484] ss:$16 sps:$4 sm:$0xff]  }
 0x258   :  { %5326 = vmatprep.subr.bf16.mxu0 %v8248_v22  ;;  %5859 = vmatprep.subr.bf16.mxu1 %v8251_v23  ;;  %v8335_v22 = vld [vmem:[%s11224_s1 + $0x148c] ss:$16 sps:$4 sm:$0xff]   ;;  %v8330_v23 = vld [vmem:[%s11224_s1 + $0x1480] ss:$16 sps:$4 sm:$0xff]  }
 0x25b   :  { %5327 = vmatpush1.bf16.msra.mxu0 %v8246_v24  ;;  %5860 = vmatpush1.bf16.msra.mxu1 %v8249_v13  ;;  %v8333_v24 = vld [vmem:[%s11224_s1 + $0x1488] ss:$16 sps:$4 sm:$0xff]   ;;  %v8338_v13 = vld [vmem:[%s11224_s1 + $0x14a4] ss:$16 sps:$4 sm:$0xff]  }
 0x25c   :  { %5328 = vmatprep.subr.bf16.mxu0 %v8254_v27  ;;  %5861 = vmatprep.subr.bf16.mxu1 %v8257_v28  ;;  %v8341_v27 = vld [vmem:[%s11224_s1 + $0x14ac] ss:$16 sps:$4 sm:$0xff]   ;;  %v8336_v28 = vld [vmem:[%s11224_s1 + $0x14a0] ss:$16 sps:$4 sm:$0xff]  }
 0x25f   :  { %5329 = vmatpush1.bf16.msra.mxu0 %v8252_v29  ;;  %5862 = vmatpush1.bf16.msra.mxu1 %v8255_v14  ;;  %v8339_v29 = vld [vmem:[%s11224_s1 + $0x14a8] ss:$16 sps:$4 sm:$0xff]   ;;  %v8344_v14 = vld [vmem:[%s11224_s1 + $0x14c4] ss:$16 sps:$4 sm:$0xff]  }
 0x260   :  { %5330 = vmatprep.subr.bf16.mxu0 %v8260_v30  ;;  %5863 = vmatprep.subr.bf16.mxu1 %v8263_v31  ;;  %v8347_v30 = vld [vmem:[%s11224_s1 + $0x14cc] ss:$16 sps:$4 sm:$0xff]   ;;  %v8342_v31 = vld [vmem:[%s11224_s1 + $0x14c0] ss:$16 sps:$4 sm:$0xff]  }
 0x263   :  { %5331 = vmatpush1.bf16.msra.mxu0 %v8258_v25  ;;  %5864 = vmatpush1.bf16.msra.mxu1 %v8261_v32  ;;  %v8345_v25 = vld [vmem:[%s11224_s1 + $0x14c8] ss:$16 sps:$4 sm:$0xff]   ;;  %v8350_v32 = vld [vmem:[%s11224_s1 + $0x14e4] ss:$16 sps:$4 sm:$0xff]  }
 0x264   :  { %5332 = vmatprep.subr.bf16.mxu0 %v8266_v33  ;;  %5865 = vmatprep.subr.bf16.mxu1 %v8269_v26  ;;  %v8353_v33 = vld [vmem:[%s11224_s1 + $0x14ec] ss:$16 sps:$4 sm:$0xff]   ;;  %v8348_v26 = vld [vmem:[%s11224_s1 + $0x14e0] ss:$16 sps:$4 sm:$0xff]  }
 0x267   :  { %5333 = vmatpush1.bf16.msra.mxu0 %v8264_v36  ;;  %5866 = vmatpush1.bf16.msra.mxu1 %v8267_v37  ;;  %v8351_v36 = vld [vmem:[%s11224_s1 + $0x14e8] ss:$16 sps:$4 sm:$0xff]   ;;  %v8356_v37 = vld [vmem:[%s11224_s1 + $0x1504] ss:$16 sps:$4 sm:$0xff]  }
 0x268   :  { %5334 = vmatprep.subr.bf16.mxu0 %v8272_v21  ;;  %5867 = vmatprep.subr.bf16.mxu1 %v8275_v39  ;;  %v8359_v21 = vld [vmem:[%s11224_s1 + $0x150c] ss:$16 sps:$4 sm:$0xff]   ;;  %v8354_v39 = vld [vmem:[%s11224_s1 + $0x1500] ss:$16 sps:$4 sm:$0xff]  }
 0x26b   :  { %5335 = vmatpush1.bf16.msra.mxu0 %v8270_v40  ;;  %5868 = vmatpush1.bf16.msra.mxu1 %v8273_v41  ;;  %v8357_v40 = vld [vmem:[%s11224_s1 + $0x1508] ss:$16 sps:$4 sm:$0xff]   ;;  %v8362_v41 = vld [vmem:[%s11224_s1 + $0x1524] ss:$16 sps:$4 sm:$0xff]  }
 0x26c   :  { %5336 = vmatprep.subr.bf16.mxu0 %v8278_v34  ;;  %5869 = vmatprep.subr.bf16.mxu1 %v8281_v43  ;;  %v8365_v34 = vld [vmem:[%s11224_s1 + $0x152c] ss:$16 sps:$4 sm:$0xff]   ;;  %v8360_v43 = vld [vmem:[%s11224_s1 + $0x1520] ss:$16 sps:$4 sm:$0xff]  }
 0x26f   :  { %5337 = vmatpush1.bf16.msra.mxu0 %v8276_v45  ;;  %5870 = vmatpush1.bf16.msra.mxu1 %v8279_v46  ;;  %v8363_v45 = vld [vmem:[%s11224_s1 + $0x1528] ss:$16 sps:$4 sm:$0xff]   ;;  %v8368_v46 = vld [vmem:[%s11224_s1 + $0x1544] ss:$16 sps:$4 sm:$0xff]  }
 0x270   :  { %5338 = vmatprep.subr.bf16.mxu0 %v8284_v35  ;;  %5871 = vmatprep.subr.bf16.mxu1 %v8287_v50  ;;  %v8371_v35 = vld [vmem:[%s11224_s1 + $0x154c] ss:$16 sps:$4 sm:$0xff]   ;;  %v8366_v50 = vld [vmem:[%s11224_s1 + $0x1540] ss:$16 sps:$4 sm:$0xff]  }
 0x273   :  { %5339 = vmatpush1.bf16.msra.mxu0 %v8282_v53  ;;  %5872 = vmatpush1.bf16.msra.mxu1 %v8285_v38  ;;  %v8369_v53 = vld [vmem:[%s11224_s1 + $0x1548] ss:$16 sps:$4 sm:$0xff]   ;;  %v8374_v38 = vld [vmem:[%s11224_s1 + $0x1564] ss:$16 sps:$4 sm:$0xff]  }
 0x274   :  { %5340 = vmatprep.subr.bf16.mxu0 %v8290_v54  ;;  %5873 = vmatprep.subr.bf16.mxu1 %v8293_v55  ;;  %v8377_v54 = vld [vmem:[%s11224_s1 + $0x156c] ss:$16 sps:$4 sm:$0xff]   ;;  %v8372_v55 = vld [vmem:[%s11224_s1 + $0x1560] ss:$16 sps:$4 sm:$0xff]  }
 0x277   :  { %5341 = vmatpush1.bf16.msra.mxu0 %v8288_v56  ;;  %5874 = vmatpush1.bf16.msra.mxu1 %v8291_v47  ;;  %v8375_v56 = vld [vmem:[%s11224_s1 + $0x1568] ss:$16 sps:$4 sm:$0xff]   ;;  %v8380_v47 = vld [vmem:[%s11224_s1 + $0x1584] ss:$16 sps:$4 sm:$0xff]  }
 0x278   :  { %5342 = vmatprep.subr.bf16.mxu0 %v8296_v57  ;;  %5875 = vmatprep.subr.bf16.mxu1 %v8299_v58  ;;  %v8383_v57 = vld [vmem:[%s11224_s1 + $0x158c] ss:$16 sps:$4 sm:$0xff]   ;;  %v8378_v58 = vld [vmem:[%s11224_s1 + $0x1580] ss:$16 sps:$4 sm:$0xff]  }
 0x27b   :  { %5343 = vmatpush1.bf16.msra.mxu0 %v8294_v48  ;;  %5876 = vmatpush1.bf16.msra.mxu1 %v8297_v61  ;;  %v8386_v48 = vld [vmem:[%s11224_s1 + $0x15a4] ss:$16 sps:$4 sm:$0xff]   ;;  %v8389_v61 = vld [vmem:[%s11224_s1 + $0x15ac] ss:$16 sps:$4 sm:$0xff]  }
 0x27c   :  { %5344 = vmatprep.subr.bf16.mxu0 %v8302_v63  ;;  %5877 = vmatprep.subr.bf16.mxu1 %v8305_v44  ;;  %v8384_v63 = vld [vmem:[%s11224_s1 + $0x15a0] ss:$16 sps:$4 sm:$0xff]   ;;  %v8387_v44 = vld [vmem:[%s11224_s1 + $0x15a8] ss:$16 sps:$4 sm:$0xff]  }
 0x27f   :  { %5345 = vmatpush1.bf16.msra.mxu0 %v8300_v1  ;;  %5878 = vmatpush1.bf16.msra.mxu1 %v8303_v51  ;;  %v8392_v1 = vld [vmem:[%s11224_s1 + $0x15c4] ss:$16 sps:$4 sm:$0xff]   ;;  %v8395_v51 = vld [vmem:[%s11224_s1 + $0x15cc] ss:$16 sps:$4 sm:$0xff]  }
 0x280   :  { %5355 = vmatprep.subr.bf16.mxu0 %v8308_v2  ;;  %5888 = vmatprep.subr.bf16.mxu1 %v8311_v3  ;;  %v8390_v2 = vld [vmem:[%s11224_s1 + $0x15c0] ss:$16 sps:$4 sm:$0xff]   ;;  %v8393_v3 = vld [vmem:[%s11224_s1 + $0x15c8] ss:$16 sps:$4 sm:$0xff]  }
 0x282   :  { %5347 = vmatmul.mubr.bf16.vlgmr.msra.gmra.mrb[0].mxu0 %v979_v60  ;;  %5880 = vmatmul.mubr.bf16.vlgmr.msra.gmra.mrb[0].mxu1 %v979_v60  ;;  %v8401_v60 = vld [vmem:[%s11224_s1 + $0x15ec] ss:$16 sps:$4 sm:$0xff]  }
 0x283   :  { %5356 = vmatpush1.bf16.msra.mxu0 %v8306_v5  ;;  %5889 = vmatpush1.bf16.msra.mxu1 %v8309_v6  ;;  %v8396_v5 = vld [vmem:[%s11224_s1 + $0x15e0] ss:$16 sps:$4 sm:$0xff]   ;;  %v8399_v6 = vld [vmem:[%s11224_s1 + $0x15e8] ss:$16 sps:$4 sm:$0xff]  }
 0x284   :  { %5357 = vmatprep.subr.bf16.mxu0 %v8314_v7  ;;  %5890 = vmatprep.subr.bf16.mxu1 %v8317_v62  ;;  %v8405_v7 = vld [vmem:[%s11224_s1 + $0x1604] ss:$16 sps:$4 sm:$0xff]   ;;  %v8408_v62 = vld [vmem:[%s11224_s1 + $0x160c] ss:$16 sps:$4 sm:$0xff]  }
 0x285   :  { %5387 = vmatprep.mubr.bf16.mxu0 %v10673_v8  ;;  %5920 = vmatprep.mubr.bf16.mxu1 %v10673_v8 }
 0x287   :  { %5358 = vmatpush1.bf16.msra.mxu0 %v8312_v9  ;;  %5891 = vmatpush1.bf16.msra.mxu1 %v8315_v10  ;;  %v10859_v9 = vrot.slane %v10642_v0, %v8749_v49  ;;  %v8403_v10 = vld [vmem:[%s11224_s1 + $0x1600] ss:$16 sps:$4 sm:$0xff]   ;;  %v8414_v0 = vld [vmem:[%s11224_s1 + $0x162c] ss:$16 sps:$4 sm:$0xff]  }
 0x288   :  { %5359 = vmatprep.subr.bf16.mxu0 %v8320_v11  ;;  %5892 = vmatprep.subr.bf16.mxu1 %v8323_v12  ;;  %v8406_v11 = vld [vmem:[%s11224_s1 + $0x1608] ss:$16 sps:$4 sm:$0xff]   ;;  %v8411_v12 = vld [vmem:[%s11224_s1 + $0x1624] ss:$16 sps:$4 sm:$0xff]  }
 0x28b   :  { %5360 = vmatpush1.bf16.msra.mxu0 %v8318_v52  ;;  %5893 = vmatpush1.bf16.msra.mxu1 %v8321_v15  ;;  %v982_v52 = vcombine.high %v10673_v8, %v10673_v8  ;;  %v8409_v15 = vld [vmem:[%s11224_s1 + $0x1620] ss:$16 sps:$4 sm:$0xff]   ;;  %v8417_v8 = vld [vmem:[%s11224_s1 + $0x1644] ss:$16 sps:$4 sm:$0xff]  }
 0x28c   :  { %5361 = vmatprep.subr.bf16.mxu0 %v8326_v16  ;;  %5894 = vmatprep.subr.bf16.mxu1 %v8329_v17  ;;  %v8412_v16 = vld [vmem:[%s11224_s1 + $0x1628] ss:$16 sps:$4 sm:$0xff]   ;;  %v8420_v17 = vld [vmem:[%s11224_s1 + $0x164c] ss:$16 sps:$4 sm:$0xff]  }
 0x28f   :  { %5362 = vmatpush1.bf16.msra.mxu0 %v8324_v18  ;;  %5895 = vmatpush1.bf16.msra.mxu1 %v8327_v19  ;;  %v8415_v18 = vld [vmem:[%s11224_s1 + $0x1640] ss:$16 sps:$4 sm:$0xff]   ;;  %v8418_v19 = vld [vmem:[%s11224_s1 + $0x1648] ss:$16 sps:$4 sm:$0xff]  }
 0x290   :  { %5363 = vmatprep.subr.bf16.mxu0 %v8332_v20  ;;  %5896 = vmatprep.subr.bf16.mxu1 %v8335_v22  ;;  %v8423_v20 = vld [vmem:[%s11224_s1 + $0x1664] ss:$16 sps:$4 sm:$0xff]   ;;  %v8426_v22 = vld [vmem:[%s11224_s1 + $0x166c] ss:$16 sps:$4 sm:$0xff]  }
 0x293   :  { %5364 = vmatpush1.bf16.msra.mxu0 %v8330_v23  ;;  %5897 = vmatpush1.bf16.msra.mxu1 %v8333_v24  ;;  %v8421_v23 = vld [vmem:[%s11224_s1 + $0x1660] ss:$16 sps:$4 sm:$0xff]   ;;  %v8424_v24 = vld [vmem:[%s11224_s1 + $0x1668] ss:$16 sps:$4 sm:$0xff]  }
 0x294   :  { %5365 = vmatprep.subr.bf16.mxu0 %v8338_v13  ;;  %5898 = vmatprep.subr.bf16.mxu1 %v8341_v27  ;;  %v8429_v13 = vld [vmem:[%s11224_s1 + $0x1684] ss:$16 sps:$4 sm:$0xff]   ;;  %v8432_v27 = vld [vmem:[%s11224_s1 + $0x168c] ss:$16 sps:$4 sm:$0xff]  }
 0x297   :  { %5366 = vmatpush1.bf16.msra.mxu0 %v8336_v28  ;;  %5899 = vmatpush1.bf16.msra.mxu1 %v8339_v29  ;;  %v8427_v28 = vld [vmem:[%s11224_s1 + $0x1680] ss:$16 sps:$4 sm:$0xff]   ;;  %v8430_v29 = vld [vmem:[%s11224_s1 + $0x1688] ss:$16 sps:$4 sm:$0xff]  }
 0x298   :  { %5367 = vmatprep.subr.bf16.mxu0 %v8344_v14  ;;  %5900 = vmatprep.subr.bf16.mxu1 %v8347_v30  ;;  %v8435_v14 = vld [vmem:[%s11224_s1 + $0x16a4] ss:$16 sps:$4 sm:$0xff]   ;;  %v8438_v30 = vld [vmem:[%s11224_s1 + $0x16ac] ss:$16 sps:$4 sm:$0xff]  }
 0x29b   :  { %5368 = vmatpush1.bf16.msra.mxu0 %v8342_v31  ;;  %5901 = vmatpush1.bf16.msra.mxu1 %v8345_v25  ;;  %v8433_v31 = vld [vmem:[%s11224_s1 + $0x16a0] ss:$16 sps:$4 sm:$0xff]   ;;  %v8436_v25 = vld [vmem:[%s11224_s1 + $0x16a8] ss:$16 sps:$4 sm:$0xff]  }
 0x29c   :  { %5369 = vmatprep.subr.bf16.mxu0 %v8350_v32  ;;  %5902 = vmatprep.subr.bf16.mxu1 %v8353_v33  ;;  %v8441_v32 = vld [vmem:[%s11224_s1 + $0x16c4] ss:$16 sps:$4 sm:$0xff]   ;;  %v8444_v33 = vld [vmem:[%s11224_s1 + $0x16cc] ss:$16 sps:$4 sm:$0xff]  }
 0x29f   :  { %5370 = vmatpush1.bf16.msra.mxu0 %v8348_v26  ;;  %5903 = vmatpush1.bf16.msra.mxu1 %v8351_v36  ;;  %v8439_v26 = vld [vmem:[%s11224_s1 + $0x16c0] ss:$16 sps:$4 sm:$0xff]   ;;  %v8442_v36 = vld [vmem:[%s11224_s1 + $0x16c8] ss:$16 sps:$4 sm:$0xff]  }
 0x2a0   :  { %5371 = vmatprep.subr.bf16.mxu0 %v8356_v37  ;;  %5904 = vmatprep.subr.bf16.mxu1 %v8359_v21  ;;  %v8447_v37 = vld [vmem:[%s11224_s1 + $0x16e4] ss:$16 sps:$4 sm:$0xff]   ;;  %v8450_v21 = vld [vmem:[%s11224_s1 + $0x16ec] ss:$16 sps:$4 sm:$0xff]  }
 0x2a3   :  { %5372 = vmatpush1.bf16.msra.mxu0 %v8354_v39  ;;  %5905 = vmatpush1.bf16.msra.mxu1 %v8357_v40  ;;  %v8445_v39 = vld [vmem:[%s11224_s1 + $0x16e0] ss:$16 sps:$4 sm:$0xff]   ;;  %v8448_v40 = vld [vmem:[%s11224_s1 + $0x16e8] ss:$16 sps:$4 sm:$0xff]  }
 0x2a4   :  { %5373 = vmatprep.subr.bf16.mxu0 %v8362_v41  ;;  %5906 = vmatprep.subr.bf16.mxu1 %v8365_v34  ;;  %v8453_v41 = vld [vmem:[%s11224_s1 + $0x1704] ss:$16 sps:$4 sm:$0xff]   ;;  %v8456_v34 = vld [vmem:[%s11224_s1 + $0x170c] ss:$16 sps:$4 sm:$0xff]  }
 0x2a7   :  { %5374 = vmatpush1.bf16.msra.mxu0 %v8360_v43  ;;  %5907 = vmatpush1.bf16.msra.mxu1 %v8363_v45  ;;  %v8451_v43 = vld [vmem:[%s11224_s1 + $0x1700] ss:$16 sps:$4 sm:$0xff]   ;;  %v8454_v45 = vld [vmem:[%s11224_s1 + $0x1708] ss:$16 sps:$4 sm:$0xff]  }
 0x2a8   :  { %5375 = vmatprep.subr.bf16.mxu0 %v8368_v46  ;;  %5908 = vmatprep.subr.bf16.mxu1 %v8371_v35  ;;  %v8459_v46 = vld [vmem:[%s11224_s1 + $0x1724] ss:$16 sps:$4 sm:$0xff]   ;;  %v8462_v35 = vld [vmem:[%s11224_s1 + $0x172c] ss:$16 sps:$4 sm:$0xff]  }
 0x2ab   :  { %5376 = vmatpush1.bf16.msra.mxu0 %v8366_v50  ;;  %5909 = vmatpush1.bf16.msra.mxu1 %v8369_v53  ;;  %v8457_v50 = vld [vmem:[%s11224_s1 + $0x1720] ss:$16 sps:$4 sm:$0xff]   ;;  %v8460_v53 = vld [vmem:[%s11224_s1 + $0x1728] ss:$16 sps:$4 sm:$0xff]  }
 0x2ac   :  { %5377 = vmatprep.subr.bf16.mxu0 %v8374_v38  ;;  %5910 = vmatprep.subr.bf16.mxu1 %v8377_v54  ;;  %v8465_v38 = vld [vmem:[%s11224_s1 + $0x1744] ss:$16 sps:$4 sm:$0xff]   ;;  %v8468_v54 = vld [vmem:[%s11224_s1 + $0x174c] ss:$16 sps:$4 sm:$0xff]  }
 0x2af   :  { %5378 = vmatpush1.bf16.msra.mxu0 %v8372_v55  ;;  %5911 = vmatpush1.bf16.msra.mxu1 %v8375_v56  ;;  %v8463_v55 = vld [vmem:[%s11224_s1 + $0x1740] ss:$16 sps:$4 sm:$0xff]   ;;  %v8466_v56 = vld [vmem:[%s11224_s1 + $0x1748] ss:$16 sps:$4 sm:$0xff]  }
 0x2b0   :  { %5379 = vmatprep.subr.bf16.mxu0 %v8380_v47  ;;  %5912 = vmatprep.subr.bf16.mxu1 %v8383_v57  ;;  %v8471_v47 = vld [vmem:[%s11224_s1 + $0x1764] ss:$16 sps:$4 sm:$0xff]   ;;  %v8474_v57 = vld [vmem:[%s11224_s1 + $0x176c] ss:$16 sps:$4 sm:$0xff]  }
 0x2b3   :  { %5380 = vmatpush1.bf16.msra.mxu0 %v8378_v58  ;;  %5913 = vmatpush1.bf16.msra.mxu1 %v8381_v59  ;;  %v8469_v58 = vld [vmem:[%s11224_s1 + $0x1760] ss:$16 sps:$4 sm:$0xff]   ;;  %v8472_v59 = vld [vmem:[%s11224_s1 + $0x1768] ss:$16 sps:$4 sm:$0xff]  }
 0x2b4   :  { %5381 = vmatprep.subr.bf16.mxu0 %v8386_v48  ;;  %5914 = vmatprep.subr.bf16.mxu1 %v8389_v61  ;;  %v8477_v48 = vld [vmem:[%s11224_s1 + $0x1784] ss:$16 sps:$4 sm:$0xff]   ;;  %v8480_v61 = vld [vmem:[%s11224_s1 + $0x178c] ss:$16 sps:$4 sm:$0xff]  }
 0x2b7   :  { %5382 = vmatpush1.bf16.msra.mxu0 %v8384_v63  ;;  %5915 = vmatpush1.bf16.msra.mxu1 %v8387_v44  ;;  %v8475_v63 = vld [vmem:[%s11224_s1 + $0x1780] ss:$16 sps:$4 sm:$0xff]   ;;  %v8478_v44 = vld [vmem:[%s11224_s1 + $0x1788] ss:$16 sps:$4 sm:$0xff]  }
 0x2b8   :  { %5383 = vmatprep.subr.bf16.mxu0 %v8392_v1  ;;  %5916 = vmatprep.subr.bf16.mxu1 %v8395_v51  ;;  %v8483_v1 = vld [vmem:[%s11224_s1 + $0x17a4] ss:$16 sps:$4 sm:$0xff]   ;;  %v8486_v51 = vld [vmem:[%s11224_s1 + $0x17ac] ss:$16 sps:$4 sm:$0xff]  }
 0x2bb   :  { %5384 = vmatpush1.bf16.msra.mxu0 %v8390_v2  ;;  %5917 = vmatpush1.bf16.msra.mxu1 %v8393_v3  ;;  %v8481_v2 = vld [vmem:[%s11224_s1 + $0x17a0] ss:$16 sps:$4 sm:$0xff]   ;;  %v8484_v3 = vld [vmem:[%s11224_s1 + $0x17a8] ss:$16 sps:$4 sm:$0xff]  }
 0x2bc   :  { %5385 = vmatprep.subr.bf16.mxu0 %v8398_v4  ;;  %5918 = vmatprep.subr.bf16.mxu1 %v8401_v60  ;;  %v8489_v4 = vld [vmem:[%s11224_s1 + $0x17c4] ss:$16 sps:$4 sm:$0xff]   ;;  %v8492_v60 = vld [vmem:[%s11224_s1 + $0x17cc] ss:$16 sps:$4 sm:$0xff]  }
 0x2bf   :  { %5386 = vmatpush1.bf16.msra.mxu0 %v8396_v5  ;;  %5919 = vmatpush1.bf16.msra.mxu1 %v8399_v6  ;;  %v8487_v5 = vld [vmem:[%s11224_s1 + $0x17c0] ss:$16 sps:$4 sm:$0xff]   ;;  %v8490_v6 = vld [vmem:[%s11224_s1 + $0x17c8] ss:$16 sps:$4 sm:$0xff]  }
 0x2c0   :  { %5396 = vmatprep.subr.bf16.mxu0 %v8405_v7  ;;  %5929 = vmatprep.subr.bf16.mxu1 %v8408_v62  ;;  %v8495_v7 = vld [vmem:[%s11224_s1 + $0x17e4] ss:$16 sps:$4 sm:$0xff]   ;;  %v8498_v62 = vld [vmem:[%s11224_s1 + $0x17ec] ss:$16 sps:$4 sm:$0xff]  }
 0x2c2   :  { %5388 = vmatmul.mubr.bf16.vlgmr.msra.gmra.mrb[0].mxu0 %v10859_v9  ;;  %5921 = vmatmul.mubr.bf16.vlgmr.msra.gmra.mrb[0].mxu1 %v10859_v9 }
 0x2c3   :  { %5397 = vmatpush1.bf16.msra.mxu0 %v8403_v10  ;;  %5930 = vmatpush1.bf16.msra.mxu1 %v8406_v11  ;;  %v8493_v10 = vld [vmem:[%s11224_s1 + $0x17e0] ss:$16 sps:$4 sm:$0xff]   ;;  %v8496_v11 = vld [vmem:[%s11224_s1 + $0x17e8] ss:$16 sps:$4 sm:$0xff]  }
 0x2c4   :  { %5398 = vmatprep.subr.bf16.mxu0 %v8411_v12  ;;  %5931 = vmatprep.subr.bf16.mxu1 %v8414_v0  ;;  %v8501_v12 = vld [vmem:[%s11224_s1 + $0x1804] ss:$16 sps:$4 sm:$0xff]   ;;  %v8504_v0 = vld [vmem:[%s11224_s1 + $0x180c] ss:$16 sps:$4 sm:$0xff]  }
 0x2c5   :  { %5428 = vmatprep.mubr.bf16.mxu0 %v982_v52  ;;  %5961 = vmatprep.mubr.bf16.mxu1 %v982_v52  ;;  %v980_v52 = vcombine.high %v10859_v9, %v10859_v9  ;;  %v8510_v9 = vld [vmem:[%s11224_s1 + $0x182c] ss:$16 sps:$4 sm:$0xff]  }
 0x2c7   :  { %5399 = vmatpush1.bf16.msra.mxu0 %v8409_v15  ;;  %5932 = vmatpush1.bf16.msra.mxu1 %v8412_v16  ;;  %v8499_v15 = vld [vmem:[%s11224_s1 + $0x1800] ss:$16 sps:$4 sm:$0xff]   ;;  %v8502_v16 = vld [vmem:[%s11224_s1 + $0x1808] ss:$16 sps:$4 sm:$0xff]  }
 0x2c8   :  { %5400 = vmatprep.subr.bf16.mxu0 %v8417_v8  ;;  %5933 = vmatprep.subr.bf16.mxu1 %v8420_v17  ;;  %v8507_v8 = vld [vmem:[%s11224_s1 + $0x1824] ss:$16 sps:$4 sm:$0xff]   ;;  %v8505_v17 = vld [vmem:[%s11224_s1 + $0x1820] ss:$16 sps:$4 sm:$0xff]  }
 0x2cb   :  { %5401 = vmatpush1.bf16.msra.mxu0 %v8415_v18  ;;  %5934 = vmatpush1.bf16.msra.mxu1 %v8418_v19  ;;  %v8508_v18 = vld [vmem:[%s11224_s1 + $0x1828] ss:$16 sps:$4 sm:$0xff]   ;;  %v8513_v19 = vld [vmem:[%s11224_s1 + $0x1844] ss:$16 sps:$4 sm:$0xff]  }
 0x2cc   :  { %5402 = vmatprep.subr.bf16.mxu0 %v8423_v20  ;;  %5935 = vmatprep.subr.bf16.mxu1 %v8426_v22  ;;  %v8516_v20 = vld [vmem:[%s11224_s1 + $0x184c] ss:$16 sps:$4 sm:$0xff]   ;;  %v8582_v22 = vmov 0  }
 0x2cf   :  { %5403 = vmatpush1.bf16.msra.mxu0 %v8421_v23  ;;  %5936 = vmatpush1.bf16.msra.mxu1 %v8424_v24  ;;  %v8511_v23 = vld [vmem:[%s11224_s1 + $0x1840] ss:$16 sps:$4 sm:$0xff]   ;;  %v8514_v24 = vld [vmem:[%s11224_s1 + $0x1848] ss:$16 sps:$4 sm:$0xff]  }
 0x2d0   :  { %5404 = vmatprep.subr.bf16.mxu0 %v8429_v13  ;;  %5937 = vmatprep.subr.bf16.mxu1 %v8432_v27  ;;  %v8519_v13 = vld [vmem:[%s11224_s1 + $0x1864] ss:$16 sps:$4 sm:$0xff]   ;;  %v8522_v27 = vld [vmem:[%s11224_s1 + $0x186c] ss:$16 sps:$4 sm:$0xff]  }
 0x2d3   :  { %5405 = vmatpush1.bf16.msra.mxu0 %v8427_v28  ;;  %5938 = vmatpush1.bf16.msra.mxu1 %v8430_v29  ;;  %v8517_v28 = vld [vmem:[%s11224_s1 + $0x1860] ss:$16 sps:$4 sm:$0xff]   ;;  %v8520_v29 = vld [vmem:[%s11224_s1 + $0x1868] ss:$16 sps:$4 sm:$0xff]  }
 0x2d4   :  { %5406 = vmatprep.subr.bf16.mxu0 %v8435_v14  ;;  %5939 = vmatprep.subr.bf16.mxu1 %v8438_v30  ;;  %v6377_v14 = vld.sshfl [vmem:[%s11223_s0 + $0x18] sm:$0x1 pattern:$0x75316420]  ;;  %v8523_v30 = vld [vmem:[%s11226_s3 + $0x40] sm:$0xff]  }
 0x2d7   :  { %5407 = vmatpush1.bf16.msra.mxu0 %v8433_v31  ;;  %5940 = vmatpush1.bf16.msra.mxu1 %v8436_v25  ;;  %v8524_v31 = vld [vmem:[%s11226_s3 + $0xc0] sm:$0xff]   ;;  %v996_v25 = vrot.slane %v6377_v14, %v8749_v49  ;;  %v8528_v49 = vld [vmem:[%s11226_s3 + $0xc8] sm:$0xff]  }
 0x2d8   :  { %5408 = vmatprep.subr.bf16.mxu0 %v8441_v32  ;;  %5941 = vmatprep.subr.bf16.mxu1 %v8444_v33  ;;  %v8525_v32 = vld [vmem:[%s11226_s3] sm:$0xff]  }
 0x2d9   :  { %v8526_v33 = vld [vmem:[%s11226_s3 + $0x80] sm:$0xff]  }
 0x2db   :  { %5409 = vmatpush1.bf16.msra.mxu0 %v8439_v26  ;;  %5942 = vmatpush1.bf16.msra.mxu1 %v8442_v36  ;;  %v8527_v26 = vld [vmem:[%s11226_s3 + $0x48] sm:$0xff]  }
 0x2dc   :  { %5410 = vmatprep.subr.bf16.mxu0 %v8447_v37  ;;  %5943 = vmatprep.subr.bf16.mxu1 %v8450_v21  ;;  %v8529_v36 = vld [vmem:[%s11226_s3 + $0x8] sm:$0xff]   ;;  %v8531_v21 = vld [vmem:[%s11226_s3 + $0x50] sm:$0xff]  }
 0x2dd   :  { %v8530_v37 = vld [vmem:[%s11226_s3 + $0x88] sm:$0xff]  }
 0x2df   :  { %5411 = vmatpush1.bf16.msra.mxu0 %v8445_v39  ;;  %5944 = vmatpush1.bf16.msra.mxu1 %v8448_v40  ;;  %v8532_v39 = vld [vmem:[%s11226_s3 + $0xd0] sm:$0xff]  }
 0x2e0   :  { %5412 = vmatprep.subr.bf16.mxu0 %v8453_v41  ;;  %5945 = vmatprep.subr.bf16.mxu1 %v8456_v34  ;;  %v8533_v40 = vld [vmem:[%s11226_s3 + $0x10] sm:$0xff]   ;;  %v8535_v34 = vld [vmem:[%s11226_s3 + $0x58] sm:$0xff]  }
 0x2e1   :  { %v8534_v41 = vld [vmem:[%s11226_s3 + $0x90] sm:$0xff]  }
 0x2e3   :  { %5413 = vmatpush1.bf16.msra.mxu0 %v8451_v43  ;;  %5946 = vmatpush1.bf16.msra.mxu1 %v8454_v45  ;;  %v8536_v43 = vld [vmem:[%s11226_s3 + $0xd8] sm:$0xff]  }
 0x2e4   :  { %5414 = vmatprep.subr.bf16.mxu0 %v8459_v46  ;;  %5947 = vmatprep.subr.bf16.mxu1 %v8462_v35  ;;  %v8537_v45 = vld [vmem:[%s11226_s3 + $0x18] sm:$0xff]   ;;  %v8539_v35 = vld [vmem:[%s11226_s3 + $0x60] sm:$0xff]  }
 0x2e5   :  { %v8538_v46 = vld [vmem:[%s11226_s3 + $0x98] sm:$0xff]  }
 0x2e7   :  { %5415 = vmatpush1.bf16.msra.mxu0 %v8457_v50  ;;  %5948 = vmatpush1.bf16.msra.mxu1 %v8460_v53  ;;  %v8540_v50 = vld [vmem:[%s11226_s3 + $0xe0] sm:$0xff]  }
 0x2e8   :  { %5416 = vmatprep.subr.bf16.mxu0 %v8465_v38  ;;  %5949 = vmatprep.subr.bf16.mxu1 %v8468_v54  ;;  %v8541_v53 = vld [vmem:[%s11226_s3 + $0x20] sm:$0xff]   ;;  %v8543_v54 = vld [vmem:[%s11226_s3 + $0x68] sm:$0xff]  }
 0x2e9   :  { %v8542_v38 = vld [vmem:[%s11226_s3 + $0xa0] sm:$0xff]  }
 0x2eb   :  { %5417 = vmatpush1.bf16.msra.mxu0 %v8463_v55  ;;  %5950 = vmatpush1.bf16.msra.mxu1 %v8466_v56  ;;  %v8544_v55 = vld [vmem:[%s11226_s3 + $0xe8] sm:$0xff]  }
 0x2ec   :  { %5418 = vmatprep.subr.bf16.mxu0 %v8471_v47  ;;  %5951 = vmatprep.subr.bf16.mxu1 %v8474_v57  ;;  %v8545_v56 = vld [vmem:[%s11226_s3 + $0x28] sm:$0xff]   ;;  %v8547_v57 = vld [vmem:[%s11226_s3 + $0x70] sm:$0xff]  }
 0x2ed   :  { %v8546_v47 = vld [vmem:[%s11226_s3 + $0xa8] sm:$0xff]  }
 0x2ef   :  { %5419 = vmatpush1.bf16.msra.mxu0 %v8469_v58  ;;  %5952 = vmatpush1.bf16.msra.mxu1 %v8472_v59  ;;  %v8548_v58 = vld [vmem:[%s11226_s3 + $0xf0] sm:$0xff]  }
 0x2f0   :  { %5420 = vmatprep.subr.bf16.mxu0 %v8477_v48  ;;  %5953 = vmatprep.subr.bf16.mxu1 %v8480_v61  ;;  %v8549_v59 = vld [vmem:[%s11226_s3 + $0x30] sm:$0xff]   ;;  %v8551_v61 = vld [vmem:[%s11226_s3 + $0x78] sm:$0xff]  }
 0x2f1   :  { %v8550_v48 = vld [vmem:[%s11226_s3 + $0xb0] sm:$0xff]  }
 0x2f3   :  { %5421 = vmatpush1.bf16.msra.mxu0 %v8475_v63  ;;  %5954 = vmatpush1.bf16.msra.mxu1 %v8478_v44  ;;  %v8552_v63 = vld [vmem:[%s11226_s3 + $0xf8] sm:$0xff]  }
 0x2f4   :  { %5422 = vmatprep.subr.bf16.mxu0 %v8483_v1  ;;  %5955 = vmatprep.subr.bf16.mxu1 %v8486_v51  ;;  %v8553_v44 = vld [vmem:[%s11226_s3 + $0x38] sm:$0xff]   ;;  %v814_v51 = vsub.s32 0, %v8731_v42 }
 0x2f5   :  { %v8554_v1 = vld [vmem:[%s11226_s3 + $0xb8] sm:$0xff]  }
 0x2f7   :  { %5423 = vmatpush1.bf16.msra.mxu0 %v8481_v2  ;;  %5956 = vmatpush1.bf16.msra.mxu1 %v8484_v3  ;;  %v822_v2 = vsub.s32 2, %v8731_v42  ;;  %v810_v3 = vld [vmem:[%s11225_s2] sm:$0xf] }
 0x2f8   :  { %5424 = vmatprep.subr.bf16.mxu0 %v8489_v4  ;;  %5957 = vmatprep.subr.bf16.mxu1 %v8492_v60  ;;  %v818_v4 = vsub.s32 1, %v8731_v42  ;;  %v826_v60 = vsub.s32 3, %v8731_v42 }
 0x2fb   :  { %5425 = vmatpush1.bf16.msra.mxu0 %v8487_v5  ;;  %5958 = vmatpush1.bf16.msra.mxu1 %v8490_v6  ;;  %v815_v5 = vrot.slane %v810_v3, %v814_v51  ;;  %v823_v6 = vrot.slane %v810_v3, %v822_v2 }
 0x2fc   :  { %5426 = vmatprep.subr.bf16.mxu0 %v8495_v7  ;;  %5959 = vmatprep.subr.bf16.mxu1 %v8498_v62  ;;  %v819_v7 = vrot.slane %v810_v3, %v818_v4  ;;  %v827_v62 = vrot.slane %v810_v3, %v826_v60 }
 0x2ff   :  { %5427 = vmatpush1.bf16.msra.mxu0 %v8493_v10  ;;  %5960 = vmatpush1.bf16.msra.mxu1 %v8496_v11 }
 0x300   :  { %5437 = vmatprep.subr.bf16.mxu0 %v8501_v12  ;;  %5970 = vmatprep.subr.bf16.mxu1 %v8504_v0 }
 0x302   :  { %5429 = vmatmul.mubr.bf16.vlgmr.msra.gmra.mrb[0].mxu0 %v980_v52  ;;  %5962 = vmatmul.mubr.bf16.vlgmr.msra.gmra.mrb[0].mxu1 %v980_v52 }
 0x303   :  { %5438 = vmatpush1.bf16.msra.mxu0 %v8499_v15  ;;  %5971 = vmatpush1.bf16.msra.mxu1 %v8502_v16 }
 0x304   :  { %5439 = vmatprep.subr.bf16.mxu0 %v8507_v8  ;;  %5972 = vmatprep.subr.bf16.mxu1 %v8510_v9 }
 0x305   :  { %5469 = vmatprep.mubr.bf16.mxu0 %v8582_v22  ;;  %6002 = vmatprep.mubr.bf16.mxu1 %v8582_v22 }
 0x307   :  { %5440 = vmatpush1.bf16.msra.mxu0 %v8505_v17  ;;  %5973 = vmatpush1.bf16.msra.mxu1 %v8508_v18 }
 0x308   :  { %5441 = vmatprep.subr.bf16.mxu0 %v8513_v19  ;;  %5974 = vmatprep.subr.bf16.mxu1 %v8516_v20 }
 0x30b   :  { %5442 = vmatpush1.bf16.msra.mxu0 %v8511_v23  ;;  %5975 = vmatpush1.bf16.msra.mxu1 %v8514_v24 }
 0x30c   :  { %5443 = vmatprep.subr.bf16.mxu0 %v8519_v13  ;;  %5976 = vmatprep.subr.bf16.mxu1 %v8522_v27 }
 0x30f   :  { %5444 = vmatpush1.bf16.msra.mxu0 %v8517_v28  ;;  %5977 = vmatpush1.bf16.msra.mxu1 %v8520_v29 }
 0x310   :  { %7197 = vmatprep.subr.bf16.mxu0 %v8523_v30  ;;  %7219 = vmatprep.subr.bf16.mxu1 %v8524_v31  ;;  %v7164_v30 = vld [vmem:[%s11227_s4] ss:$0 sm:$0xff] }
 0x312   :  { %7162 = vmatmul.mubr.msk.bf16.vlgmr.msra.gmra.mrb[0].mxu0 %vm4941_vm0, %v996_v25  ;;  %7163 = vmatmul.mubr.msk.bf16.vlgmr.msra.gmra.mrb[0].mxu1 %vm4941_vm0, %v996_v25 }
 0x313   :  { %7198 = vmatpush3.bf16.msra.mxu0 %v8525_v32  ;;  %7220 = vmatpush3.bf16.msra.mxu1 %v8526_v33 }
 0x314   :  { %7199 = vmatprep.subr.bf16.mxu0 %v8527_v26  ;;  %7221 = vmatprep.subr.bf16.mxu1 %v8528_v49 }
 0x317   :  { %7200 = vmatpush3.bf16.msra.mxu0 %v8529_v36  ;;  %7222 = vmatpush3.bf16.msra.mxu1 %v8530_v37 }
 0x318   :  { %7201 = vmatprep.subr.bf16.mxu0 %v8531_v21  ;;  %7223 = vmatprep.subr.bf16.mxu1 %v8532_v39 }
 0x31b   :  { %7202 = vmatpush3.bf16.msra.mxu0 %v8533_v40  ;;  %7224 = vmatpush3.bf16.msra.mxu1 %v8534_v41 }
 0x31c   :  { %7203 = vmatprep.subr.bf16.mxu0 %v8535_v34  ;;  %7225 = vmatprep.subr.bf16.mxu1 %v8536_v43 }
 0x31f   :  { %7204 = vmatpush3.bf16.msra.mxu0 %v8537_v45  ;;  %7226 = vmatpush3.bf16.msra.mxu1 %v8538_v46 }
 0x320   :  { %7205 = vmatprep.subr.bf16.mxu0 %v8539_v35  ;;  %7227 = vmatprep.subr.bf16.mxu1 %v8540_v50 }
 0x323   :  { %7206 = vmatpush3.bf16.msra.mxu0 %v8541_v53  ;;  %7228 = vmatpush3.bf16.msra.mxu1 %v8542_v38 }
 0x324   :  { %7207 = vmatprep.subr.bf16.mxu0 %v8543_v54  ;;  %7229 = vmatprep.subr.bf16.mxu1 %v8544_v55 }
 0x327   :  { %7208 = vmatpush3.bf16.msra.mxu0 %v8545_v56  ;;  %7230 = vmatpush3.bf16.msra.mxu1 %v8546_v47 }
 0x328   :  { %7209 = vmatprep.subr.bf16.mxu0 %v8547_v57  ;;  %7231 = vmatprep.subr.bf16.mxu1 %v8548_v58 }
 0x32b   :  { %7210 = vmatpush3.bf16.msra.mxu0 %v8549_v59  ;;  %7232 = vmatpush3.bf16.msra.mxu1 %v8550_v48 }
 0x32c   :  { %7211 = vmatprep.subr.bf16.mxu0 %v8551_v61  ;;  %7233 = vmatprep.subr.bf16.mxu1 %v8552_v63 }
 0x32f   :  { %7212 = vmatpush3.bf16.msra.mxu0 %v8553_v44  ;;  %7234 = vmatpush3.bf16.msra.mxu1 %v8554_v1 }
 0x3e5   :  { %v5471_v10 = vpop.f32.mrb[0].mxu0  ;;  %v6004_v11 = vpop.f32.mrb[0].mxu1 }
 0x3e6   :  { %v7241_v12 = vadd.f32 %v5471_v10, %v815_v5  ;;  %v7243_v0 = vadd.f32 %v6004_v11, %v823_v6  ;;  %v5473_v52 = vpop.f32.mrb[1].mxu0  ;;  %v6006_v15 = vpop.f32.mrb[1].mxu1 }
 0x3e7   :  { %v7242_v16 = vadd.f32 %v5473_v52, %v819_v7  ;;  %v7244_v8 = vadd.f32 %v6006_v15, %v827_v62  ;;  %v5475_v9 = vpop.f32.mrb[2].mxu0  ;;  %v6008_v17 = vpop.f32.mrb[2].mxu1 }
 0x3e8   :  { %v6011_v18 = vmax.f32 %v7241_v12, 0.0  ;;  %v6013_v19 = vmax.f32 %v7243_v0, 0.0  ;;  %v5476_v20 = vpop.f32.mrb[3].mxu0  ;;  %v6009_v22 = vpop.f32.mrb[3].mxu1 }
 0x3e9   :  { %v6012_v23 = vmax.f32 %v7242_v16, 0.0  ;;  %v6014_v42 = vmax.f32 %v7244_v8, 0.0 }
 0x3ea   :  { %v6015_v27 = vpack.c.bf16 %v6011_v18, %v6011_v18  ;;  %v6017_v28 = vpack.c.bf16 %v6013_v19, %v6013_v19 }
 0x3eb   :  { %v6016_v24 = vpack.c.bf16 %v6012_v23, %v6012_v23  ;;  %v6018_v13 = vpack.c.bf16 %v6014_v42, %v6014_v42 }
 0x3ed   :  { %6314 = vmatprep.mubr.bf16.mxu0 %v6016_v24  ;;  %6354 = vmatprep.mubr.bf16.mxu1 %v6018_v13 }
 0x3ee   :  { %6315 = vmatmul.mubr.bf16.vlgmr.msra.gmra.mrb[4].mxu0 %v6015_v27  ;;  %6355 = vmatmul.mubr.bf16.vlgmr.msra.gmra.mrb[4].mxu1 %v6017_v28 }
 0x4c1   :  { %v7213_v29 = vpop.f32.mrb[4].mxu0  ;;  %v7235_v14 = vpop.f32.mrb[4].mxu1 }
 0x4c2   :  { %v7214_v31 = vpop.f32.mrb[5].mxu0  ;;  %v7236_v25 = vpop.f32.mrb[5].mxu1 }
 0x4c3   :  { %v7215_v32 = vadd.f32 %v7214_v31, %v7213_v29  ;;  %v7237_v33 = vadd.f32 %v7236_v25, %v7235_v14  ;;  %v7216_v26 = vpop.f32.mrb[6].mxu0  ;;  %v7238_v49 = vpop.f32.mrb[6].mxu1 }
 0x4c4   :  { %v7217_v36 = vpop.f32.mrb[7].mxu0  ;;  %v7239_v37 = vpop.f32.mrb[7].mxu1 }
 0x4c5   :  { %v6317_v21 = vadd.f32 %v7215_v32, %v7164_v30 }
 0x4c7   :  { %v6357_v39 = vadd.f32 %v7237_v33, %v6317_v21 }
 0x4c9   :  { %6362 = vst [vmem:[#allocation2] sm:$0x3] %v6357_v39 }
 0x4ca   :  { %8568 = shalt.err (!%p8565_p4)
}
 0x4cb   :  { %s8569_s10 = scalar_lea.hbm %s11228_s5, 32 }
 0x4cc   :  { %p8570_p5 = scmp.ne.s32.totalorder %s11228_s5, %s8569_s10  ;;  %p8573_p6 = scmp.lt.u32.totalorder %s8569_s10, %s11228_s5 }
 0x4ce   :  { %p8575_p7 = pnand %p8573_p6, %p8570_p5 }
 0x4d0   :  { %8578 = shalt.err (!%p8575_p7)
}
 0x4d1   :  { %6372 = dma.vmem_to_hbm [thread:$0]  %s6370_s7, 32, %s11228_s5, [#allocation3]  }
 0x4d2   :  { %8579 = dma.done.wait [#allocation3], 32  }
 0x4d3   :  { %8580 = vsyncadd [#allocation3], 4294967264 }
 0x4d4   :  { %6376 = vsyncpa [#allocation3], 1 }

</bundles_post_ra>
